<compile_context>
chip_gen: v5e
topology: v5e:2x2
jax: 0.10.0
libtpu: 0.0.40
codegen_flags: <defaults>
</compile_context>

<pallas_src>
import jax
import jax.numpy as jnp
import numpy as np
from jax.experimental import pallas as pl
from jax.experimental.pallas import tpu as pltpu


# ---------------------------------------------------------------------------
# Fused forward kernel (one batch sample per grid step)
# ---------------------------------------------------------------------------
def _cnn_fwd_kernel(x_ref, w1_ref, b1_ref, d1_ref, w2_ref, b2_ref, d2_ref,
                    wfc1_ref, bfc1_ref, wfc2_ref, bfc2_ref, o_ref):
    f32 = jnp.float32

    # ---- conv1 (5x5, Cin=1) + bias + ReLU + 2x2 maxpool ---------------------
    # even parity in lanes [0,256), odd parity in lanes [256,512)
    # (192 = 12 pooled cols * 16 out-channels used per half, rest zero-padded)
    acc1 = jnp.zeros((24, 512), f32)
    for i in range(5):                                   # kernel-row taps
        acc1 = acc1 + jnp.dot(x_ref[0, i:i + 24, :],     # [24, 28]
                              w1_ref[i, :, :],           # [28, 512]
                              preferred_element_type=f32)
    # max over the two W-taps of each pool window (aligned 256-lane halves),
    # then bias + ReLU (bias identical per parity, ReLU monotone -> commutes)
    h1 = jnp.maximum(jnp.maximum(acc1[:, 0:256], acc1[:, 256:512])
                     + b1_ref[...], 0.0)                 # [24, 256]
    # H-direction pool: adjacent-row max + even-row decimation (0/1 matmul)
    m1 = jnp.maximum(h1[0:23, :], h1[1:24, :])           # [23, 256]
    p1 = jnp.dot(d1_ref[...], m1, preferred_element_type=f32)   # [12, 256]

    # ---- conv2 (3x3, Cin=16) + bias + ReLU + 2x2 maxpool --------------------
    # even parity lanes [0,256) (160 used = 5 pooled cols * 32 ch), odd [256,512)
    acc2 = jnp.zeros((10, 512), f32)
    for i in range(3):
        acc2 = acc2 + jnp.dot(p1[i:i + 10, :],           # [10, 256]
                              w2_ref[i, :, :],           # [256, 512]
                              preferred_element_type=f32)
    h2 = jnp.maximum(jnp.maximum(acc2[:, 0:256], acc2[:, 256:512])
                     + b2_ref[...], 0.0)                 # [10, 256]
    m2 = jnp.maximum(h2[0:9, :], h2[1:10, :])            # [9, 256]
    p2 = jnp.dot(d2_ref[...], m2, preferred_element_type=f32)   # [5, 256]

    # ---- fc1 (no ReLU in the reference module) + fc2 ------------------------
    # fc1 accumulated over pooled rows h with h-specific weight slabs
    # (the NCHW flatten permutation is already folded into wfc1).
    hfc = bfc1_ref[...]                                  # [1, 256]
    for h in range(5):
        hfc = hfc + jnp.dot(p2[h:h + 1, :], wfc1_ref[h, :, :],
                            preferred_element_type=f32)  # [1, 256]
    out = jnp.dot(hfc, wfc2_ref[...], preferred_element_type=f32) + bfc2_ref[...]
    o_ref[0, :, :] = out                                 # [1, 128] (lanes 10.. are 0)


# ---------------------------------------------------------------------------
# Host-side (one-time) weight packing: fold conv column taps, pooling parity
# and the NHWC->NCHW flatten permutation into block weight matrices.
# ---------------------------------------------------------------------------
def prepare_params(p):
    w1 = np.asarray(p["w1"], np.float32)        # (16, 1, 5, 5)  OIHW
    w2 = np.asarray(p["w2"], np.float32)        # (32, 16, 3, 3) OIHW
    fc1_w = np.asarray(p["fc1_w"], np.float32)  # (800, 256), rows in (c,h,w) order
    fc2_w = np.asarray(p["fc2_w"], np.float32)  # (256, 10)

    # conv1: W1[i][r, par*256 + wp*16 + co] = w1[co, 0, i, r - (2*wp + par)]
    W1 = np.zeros((5, 28, 512), np.float32)
    for par in range(2):
        for i in range(5):
            for wp in range(12):
                for j in range(5):
                    r = 2 * wp + par + j
                    col = par * 256 + wp * 16
                    W1[i, r, col:col + 16] = w1[:, 0, i, j]

    # conv2: W2[i][w_in*16 + c, par*256 + wp*32 + co] = w2[co, c, i, w_in-(2wp+par)]
    W2 = np.zeros((3, 256, 512), np.float32)
    for par in range(2):
        for i in range(3):
            for wp in range(5):
                for j in range(3):
                    w_in = 2 * wp + par + j
                    col = par * 256 + wp * 32
                    W2[i, w_in * 16:(w_in + 1) * 16, col:col + 32] = w2[:, :, i, j].T

    # even-row decimation matrices (select rows 0,2,4,... after adjacent max)
    D1 = np.zeros((12, 23), np.float32)
    D1[np.arange(12), 2 * np.arange(12)] = 1.0
    D2 = np.zeros((5, 9), np.float32)
    D2[np.arange(5), 2 * np.arange(5)] = 1.0

    # fc1 weight regrouped per pooled row h, columns in (w, c) lane order —
    # folds PyTorch's NCHW flatten into the weights; lanes zero-padded to 256.
    Wfc1 = np.zeros((5, 256, 256), np.float32)
    Wfc1[:, :160, :] = (fc1_w.reshape(32, 5, 5, 256)
                        .transpose(1, 2, 0, 3).reshape(5, 160, 256))

    # bias slabs (zero-padded to the packed lane widths)
    b1 = np.zeros((1, 256), np.float32)
    b1[0, :192] = np.tile(np.asarray(p["b1"], np.float32), 12)
    b2 = np.zeros((1, 256), np.float32)
    b2[0, :160] = np.tile(np.asarray(p["b2"], np.float32), 5)

    # fc2 padded to 128 output lanes so the final store is lane-dense
    Wfc2 = np.zeros((256, 128), np.float32)
    Wfc2[:, :10] = fc2_w
    bfc2 = np.zeros((1, 128), np.float32)
    bfc2[0, :10] = np.asarray(p["fc2_b"], np.float32)

    return {
        "W1": jnp.asarray(W1), "W2": jnp.asarray(W2),
        "D1": jnp.asarray(D1), "D2": jnp.asarray(D2),
        "Wfc1": jnp.asarray(Wfc1),
        "b1": jnp.asarray(b1), "b2": jnp.asarray(b2),
        "fc1_b": jnp.asarray(p["fc1_b"], jnp.float32).reshape(1, 256),
        "Wfc2": jnp.asarray(Wfc2), "bfc2": jnp.asarray(bfc2),
    }


# ---------------------------------------------------------------------------
# Wrapper: single pallas_call over a batch grid
# ---------------------------------------------------------------------------
def cnn_forward(x, prep):
    B = x.shape[0]
    x3 = x.reshape(B, 28, 28)                       # squeeze Cin=1 (free)

    def _full_spec(arr):
        zeros = (0,) * arr.ndim
        return pl.BlockSpec(arr.shape, lambda b, _z=zeros: _z)

    weights = (prep["W1"], prep["b1"], prep["D1"],
               prep["W2"], prep["b2"], prep["D2"],
               prep["Wfc1"], prep["fc1_b"], prep["Wfc2"], prep["bfc2"])

    out = pl.pallas_call(
        _cnn_fwd_kernel,
        grid=(B,),
        out_shape=jax.ShapeDtypeStruct((B, 1, 128), jnp.float32),
        in_specs=[pl.BlockSpec((1, 28, 28), lambda b: (b, 0, 0))]
                 + [_full_spec(w) for w in weights],
        out_specs=pl.BlockSpec((1, 1, 128), lambda b: (b, 0, 0)),
        compiler_params=pltpu.CompilerParams(
            dimension_semantics=("parallel",)),      # shards batch on v7x 2-TC
    )(x3, *weights)
    return out[:, 0, :10]


# ---------------------------------------------------------------------------
# Deterministic synthetic parameters (shapes from CNNModel.__init__)
# ---------------------------------------------------------------------------
def init_params(key):
    ks = jax.random.split(key, 6)
    return {
        "w1": jax.random.normal(ks[0], (16, 1, 5, 5), jnp.float32) * 0.1,
        "b1": jax.random.normal(ks[1], (16,), jnp.float32) * 0.01,
        "w2": jax.random.normal(ks[2], (32, 16, 3, 3), jnp.float32) * 0.05,
        "b2": jax.random.normal(ks[3], (32,), jnp.float32) * 0.01,
        "fc1_w": jax.random.normal(ks[4], (32 * 5 * 5, 256), jnp.float32) * 0.02,
        "fc1_b": jnp.zeros((256,), jnp.float32),
        "fc2_w": jax.random.normal(ks[5], (256, 10), jnp.float32) * 0.05,
        "fc2_b": jnp.zeros((10,), jnp.float32),
    }


# ---------------------------------------------------------------------------
# Pure-JAX reference (numerical sanity check only)
# ---------------------------------------------------------------------------
def reference_forward(x, p):
    def conv(x, w, b):
        dn = jax.lax.conv_dimension_numbers(x.shape, w.shape, ("NCHW", "OIHW", "NCHW"))
        y = jax.lax.conv_general_dilated(x, w, (1, 1), "VALID", dimension_numbers=dn)
        return jnp.maximum(y + b[None, :, None, None], 0.0)

    def pool(y):
        return jax.lax.reduce_window(y, -jnp.inf, jax.lax.max,
                                     (1, 1, 2, 2), (1, 1, 2, 2), "VALID")

    y = pool(conv(x, p["w1"], p["b1"]))
    y = pool(conv(y, p["w2"], p["b2"]))
    flat = y.reshape(y.shape[0], -1)            # NCHW flatten, like out.view(B,-1)
    h = flat @ p["fc1_w"] + p["fc1_b"]          # fc1 (no ReLU in the module)
    return h @ p["fc2_w"] + p["fc2_b"]          # fc2 (dropouts are eval no-ops)


if __name__ == "__main__":
    key = jax.random.PRNGKey(0)
    pkey, xkey = jax.random.split(key)
    params = init_params(pkey)
    prep = prepare_params(params)               # one-time host-side packing

    # fc1 = Linear(32*5*5, 256) forces 28x28 single-channel inputs.
    x = jax.random.normal(xkey, (2, 1, 28, 28), jnp.float32)

    fwd = jax.jit(cnn_forward)
    out = jax.block_until_ready(fwd(x, prep))
    assert out.shape == (2, 10) and out.dtype == jnp.float32

    ref = reference_forward(x, params)
    assert jnp.allclose(out, ref, rtol=2e-3, atol=2e-3), "mismatch vs JAX reference"

    print("KERNEL_OK")
</pallas_src>

<mosaic_0001>
module attributes {stable_mosaic.version = 11 : i64} {
  func.func @_cnn_fwd_kernel(%arg0: i32, %arg1: memref<1x28x28xf32, #tpu.memory_space<vmem>>, %arg2: memref<5x28x512xf32, #tpu.memory_space<vmem>>, %arg3: memref<1x256xf32, #tpu.memory_space<vmem>>, %arg4: memref<12x23xf32, #tpu.memory_space<vmem>>, %arg5: memref<3x256x512xf32, #tpu.memory_space<vmem>>, %arg6: memref<1x256xf32, #tpu.memory_space<vmem>>, %arg7: memref<5x9xf32, #tpu.memory_space<vmem>>, %arg8: memref<5x256x256xf32, #tpu.memory_space<vmem>>, %arg9: memref<1x256xf32, #tpu.memory_space<vmem>>, %arg10: memref<256x128xf32, #tpu.memory_space<vmem>>, %arg11: memref<1x128xf32, #tpu.memory_space<vmem>>, %arg12: memref<1x1x128xf32, #tpu.memory_space<vmem>>) attributes {dimension_semantics = [#tpu.dimension_semantics<parallel>], iteration_bounds = array<i64: 2>, scalar_prefetch = 0 : i64, scratch_operands = 0 : i64, tpu.core_type = #tpu.core_type<tc>, window_params = [{transform_indices = @transform_0, window_bounds = array<i64: 1, 28, 28>}, {pipeline_mode = #tpu.pipeline_mode<synchronous>, transform_indices = @transform_1, window_bounds = array<i64: 5, 28, 512>}, {pipeline_mode = #tpu.pipeline_mode<synchronous>, transform_indices = @transform_2, window_bounds = array<i64: 1, 256>}, {pipeline_mode = #tpu.pipeline_mode<synchronous>, transform_indices = @transform_3, window_bounds = array<i64: 12, 23>}, {pipeline_mode = #tpu.pipeline_mode<synchronous>, transform_indices = @transform_4, window_bounds = array<i64: 3, 256, 512>}, {pipeline_mode = #tpu.pipeline_mode<synchronous>, transform_indices = @transform_5, window_bounds = array<i64: 1, 256>}, {pipeline_mode = #tpu.pipeline_mode<synchronous>, transform_indices = @transform_6, window_bounds = array<i64: 5, 9>}, {pipeline_mode = #tpu.pipeline_mode<synchronous>, transform_indices = @transform_7, window_bounds = array<i64: 5, 256, 256>}, {pipeline_mode = #tpu.pipeline_mode<synchronous>, transform_indices = @transform_8, window_bounds = array<i64: 1, 256>}, {pipeline_mode = #tpu.pipeline_mode<synchronous>, transform_indices = @transform_9, window_bounds = array<i64: 256, 128>}, {pipeline_mode = #tpu.pipeline_mode<synchronous>, transform_indices = @transform_10, window_bounds = array<i64: 1, 128>}, {transform_indices = @transform_11, window_bounds = array<i64: 1, 1, 128>}]} {
    %cst = arith.constant 0.000000e+00 : f32
    %0 = vector.broadcast %cst : f32 to vector<24x512xf32>
    %c0 = arith.constant 0 : index
    %c0_0 = arith.constant 0 : index
    %c0_1 = arith.constant 0 : index
    %1 = vector.load %arg1[%c0, %c0_0, %c0_1] : memref<1x28x28xf32, #tpu.memory_space<vmem>>, vector<1x24x28xf32>
    %2 = vector.shape_cast %1 : vector<1x24x28xf32> to vector<24x28xf32>
    %c0_2 = arith.constant 0 : index
    %c0_3 = arith.constant 0 : index
    %c0_4 = arith.constant 0 : index
    %3 = vector.load %arg2[%c0_2, %c0_3, %c0_4] : memref<5x28x512xf32, #tpu.memory_space<vmem>>, vector<1x28x512xf32>
    %4 = vector.shape_cast %3 : vector<1x28x512xf32> to vector<28x512xf32>
    %cst_5 = arith.constant dense<0.000000e+00> : vector<24x512xf32>
    %5 = tpu.matmul %2, %4, %cst_5 {dimension_numbers = #tpu.dot_dimension_numbers<[1], [0], [0], [1], [0, 0, 1, 1], [], []>} : vector<24x28xf32>, vector<28x512xf32>, vector<24x512xf32> -> vector<24x512xf32>
    %6 = arith.addf %0, %5 : vector<24x512xf32>
    %c0_6 = arith.constant 0 : index
    %c1 = arith.constant 1 : index
    %c0_7 = arith.constant 0 : index
    %7 = vector.load %arg1[%c0_6, %c1, %c0_7] : memref<1x28x28xf32, #tpu.memory_space<vmem>>, vector<1x24x28xf32>
    %8 = vector.shape_cast %7 : vector<1x24x28xf32> to vector<24x28xf32>
    %c1_8 = arith.constant 1 : index
    %c0_9 = arith.constant 0 : index
    %c0_10 = arith.constant 0 : index
    %9 = vector.load %arg2[%c1_8, %c0_9, %c0_10] : memref<5x28x512xf32, #tpu.memory_space<vmem>>, vector<1x28x512xf32>
    %10 = vector.shape_cast %9 : vector<1x28x512xf32> to vector<28x512xf32>
    %cst_11 = arith.constant dense<0.000000e+00> : vector<24x512xf32>
    %11 = tpu.matmul %8, %10, %cst_11 {dimension_numbers = #tpu.dot_dimension_numbers<[1], [0], [0], [1], [0, 0, 1, 1], [], []>} : vector<24x28xf32>, vector<28x512xf32>, vector<24x512xf32> -> vector<24x512xf32>
    %12 = arith.addf %6, %11 : vector<24x512xf32>
    %c0_12 = arith.constant 0 : index
    %c2 = arith.constant 2 : index
    %c0_13 = arith.constant 0 : index
    %13 = vector.load %arg1[%c0_12, %c2, %c0_13] : memref<1x28x28xf32, #tpu.memory_space<vmem>>, vector<1x24x28xf32>
    %14 = vector.shape_cast %13 : vector<1x24x28xf32> to vector<24x28xf32>
    %c2_14 = arith.constant 2 : index
    %c0_15 = arith.constant 0 : index
    %c0_16 = arith.constant 0 : index
    %15 = vector.load %arg2[%c2_14, %c0_15, %c0_16] : memref<5x28x512xf32, #tpu.memory_space<vmem>>, vector<1x28x512xf32>
    %16 = vector.shape_cast %15 : vector<1x28x512xf32> to vector<28x512xf32>
    %cst_17 = arith.constant dense<0.000000e+00> : vector<24x512xf32>
    %17 = tpu.matmul %14, %16, %cst_17 {dimension_numbers = #tpu.dot_dimension_numbers<[1], [0], [0], [1], [0, 0, 1, 1], [], []>} : vector<24x28xf32>, vector<28x512xf32>, vector<24x512xf32> -> vector<24x512xf32>
    %18 = arith.addf %12, %17 : vector<24x512xf32>
    %c0_18 = arith.constant 0 : index
    %c3 = arith.constant 3 : index
    %c0_19 = arith.constant 0 : index
    %19 = vector.load %arg1[%c0_18, %c3, %c0_19] : memref<1x28x28xf32, #tpu.memory_space<vmem>>, vector<1x24x28xf32>
    %20 = vector.shape_cast %19 : vector<1x24x28xf32> to vector<24x28xf32>
    %c3_20 = arith.constant 3 : index
    %c0_21 = arith.constant 0 : index
    %c0_22 = arith.constant 0 : index
    %21 = vector.load %arg2[%c3_20, %c0_21, %c0_22] : memref<5x28x512xf32, #tpu.memory_space<vmem>>, vector<1x28x512xf32>
    %22 = vector.shape_cast %21 : vector<1x28x512xf32> to vector<28x512xf32>
    %cst_23 = arith.constant dense<0.000000e+00> : vector<24x512xf32>
    %23 = tpu.matmul %20, %22, %cst_23 {dimension_numbers = #tpu.dot_dimension_numbers<[1], [0], [0], [1], [0, 0, 1, 1], [], []>} : vector<24x28xf32>, vector<28x512xf32>, vector<24x512xf32> -> vector<24x512xf32>
    %24 = arith.addf %18, %23 : vector<24x512xf32>
    %c0_24 = arith.constant 0 : index
    %c4 = arith.constant 4 : index
    %c0_25 = arith.constant 0 : index
    %25 = vector.load %arg1[%c0_24, %c4, %c0_25] : memref<1x28x28xf32, #tpu.memory_space<vmem>>, vector<1x24x28xf32>
    %26 = vector.shape_cast %25 : vector<1x24x28xf32> to vector<24x28xf32>
    %c4_26 = arith.constant 4 : index
    %c0_27 = arith.constant 0 : index
    %c0_28 = arith.constant 0 : index
    %27 = vector.load %arg2[%c4_26, %c0_27, %c0_28] : memref<5x28x512xf32, #tpu.memory_space<vmem>>, vector<1x28x512xf32>
    %28 = vector.shape_cast %27 : vector<1x28x512xf32> to vector<28x512xf32>
    %cst_29 = arith.constant dense<0.000000e+00> : vector<24x512xf32>
    %29 = tpu.matmul %26, %28, %cst_29 {dimension_numbers = #tpu.dot_dimension_numbers<[1], [0], [0], [1], [0, 0, 1, 1], [], []>} : vector<24x28xf32>, vector<28x512xf32>, vector<24x512xf32> -> vector<24x512xf32>
    %30 = arith.addf %24, %29 : vector<24x512xf32>
    %31 = vector.extract_strided_slice %30 {offsets = [0, 0], sizes = [24, 256], strides = [1, 1]} : vector<24x512xf32> to vector<24x256xf32>
    %32 = vector.extract_strided_slice %30 {offsets = [0, 256], sizes = [24, 256], strides = [1, 1]} : vector<24x512xf32> to vector<24x256xf32>
    %33 = arith.maximumf %31, %32 : vector<24x256xf32>
    %c0_30 = arith.constant 0 : index
    %c0_31 = arith.constant 0 : index
    %34 = vector.load %arg3[%c0_30, %c0_31] : memref<1x256xf32, #tpu.memory_space<vmem>>, vector<1x256xf32>
    %35 = vector.broadcast %34 : vector<1x256xf32> to vector<24x256xf32>
    %36 = arith.addf %33, %35 : vector<24x256xf32>
    %cst_32 = arith.constant 0.000000e+00 : f32
    %37 = vector.broadcast %cst_32 : f32 to vector<24x256xf32>
    %38 = arith.maximumf %36, %37 : vector<24x256xf32>
    %39 = vector.extract_strided_slice %38 {offsets = [0, 0], sizes = [23, 256], strides = [1, 1]} : vector<24x256xf32> to vector<23x256xf32>
    %40 = vector.extract_strided_slice %38 {offsets = [1, 0], sizes = [23, 256], strides = [1, 1]} : vector<24x256xf32> to vector<23x256xf32>
    %41 = arith.maximumf %39, %40 : vector<23x256xf32>
    %c0_33 = arith.constant 0 : index
    %c0_34 = arith.constant 0 : index
    %42 = vector.load %arg4[%c0_33, %c0_34] : memref<12x23xf32, #tpu.memory_space<vmem>>, vector<12x23xf32>
    %cst_35 = arith.constant dense<0.000000e+00> : vector<12x256xf32>
    %43 = tpu.matmul %42, %41, %cst_35 {dimension_numbers = #tpu.dot_dimension_numbers<[1], [0], [0], [1], [0, 0, 1, 1], [], []>} : vector<12x23xf32>, vector<23x256xf32>, vector<12x256xf32> -> vector<12x256xf32>
    %cst_36 = arith.constant 0.000000e+00 : f32
    %44 = vector.broadcast %cst_36 : f32 to vector<10x512xf32>
    %45 = vector.extract_strided_slice %43 {offsets = [0, 0], sizes = [10, 256], strides = [1, 1]} : vector<12x256xf32> to vector<10x256xf32>
    %c0_37 = arith.constant 0 : index
    %c0_38 = arith.constant 0 : index
    %c0_39 = arith.constant 0 : index
    %46 = vector.load %arg5[%c0_37, %c0_38, %c0_39] : memref<3x256x512xf32, #tpu.memory_space<vmem>>, vector<1x256x512xf32>
    %47 = vector.shape_cast %46 : vector<1x256x512xf32> to vector<256x512xf32>
    %cst_40 = arith.constant dense<0.000000e+00> : vector<10x512xf32>
    %48 = tpu.matmul %45, %47, %cst_40 {dimension_numbers = #tpu.dot_dimension_numbers<[1], [0], [0], [1], [0, 0, 1, 1], [], []>} : vector<10x256xf32>, vector<256x512xf32>, vector<10x512xf32> -> vector<10x512xf32>
    %49 = arith.addf %44, %48 : vector<10x512xf32>
    %50 = vector.extract_strided_slice %43 {offsets = [1, 0], sizes = [10, 256], strides = [1, 1]} : vector<12x256xf32> to vector<10x256xf32>
    %c1_41 = arith.constant 1 : index
    %c0_42 = arith.constant 0 : index
    %c0_43 = arith.constant 0 : index
    %51 = vector.load %arg5[%c1_41, %c0_42, %c0_43] : memref<3x256x512xf32, #tpu.memory_space<vmem>>, vector<1x256x512xf32>
    %52 = vector.shape_cast %51 : vector<1x256x512xf32> to vector<256x512xf32>
    %cst_44 = arith.constant dense<0.000000e+00> : vector<10x512xf32>
    %53 = tpu.matmul %50, %52, %cst_44 {dimension_numbers = #tpu.dot_dimension_numbers<[1], [0], [0], [1], [0, 0, 1, 1], [], []>} : vector<10x256xf32>, vector<256x512xf32>, vector<10x512xf32> -> vector<10x512xf32>
    %54 = arith.addf %49, %53 : vector<10x512xf32>
    %55 = vector.extract_strided_slice %43 {offsets = [2, 0], sizes = [10, 256], strides = [1, 1]} : vector<12x256xf32> to vector<10x256xf32>
    %c2_45 = arith.constant 2 : index
    %c0_46 = arith.constant 0 : index
    %c0_47 = arith.constant 0 : index
    %56 = vector.load %arg5[%c2_45, %c0_46, %c0_47] : memref<3x256x512xf32, #tpu.memory_space<vmem>>, vector<1x256x512xf32>
    %57 = vector.shape_cast %56 : vector<1x256x512xf32> to vector<256x512xf32>
    %cst_48 = arith.constant dense<0.000000e+00> : vector<10x512xf32>
    %58 = tpu.matmul %55, %57, %cst_48 {dimension_numbers = #tpu.dot_dimension_numbers<[1], [0], [0], [1], [0, 0, 1, 1], [], []>} : vector<10x256xf32>, vector<256x512xf32>, vector<10x512xf32> -> vector<10x512xf32>
    %59 = arith.addf %54, %58 : vector<10x512xf32>
    %60 = vector.extract_strided_slice %59 {offsets = [0, 0], sizes = [10, 256], strides = [1, 1]} : vector<10x512xf32> to vector<10x256xf32>
    %61 = vector.extract_strided_slice %59 {offsets = [0, 256], sizes = [10, 256], strides = [1, 1]} : vector<10x512xf32> to vector<10x256xf32>
    %62 = arith.maximumf %60, %61 : vector<10x256xf32>
    %c0_49 = arith.constant 0 : index
    %c0_50 = arith.constant 0 : index
    %63 = vector.load %arg6[%c0_49, %c0_50] : memref<1x256xf32, #tpu.memory_space<vmem>>, vector<1x256xf32>
    %64 = vector.broadcast %63 : vector<1x256xf32> to vector<10x256xf32>
    %65 = arith.addf %62, %64 : vector<10x256xf32>
    %cst_51 = arith.constant 0.000000e+00 : f32
    %66 = vector.broadcast %cst_51 : f32 to vector<10x256xf32>
    %67 = arith.maximumf %65, %66 : vector<10x256xf32>
    %68 = vector.extract_strided_slice %67 {offsets = [0, 0], sizes = [9, 256], strides = [1, 1]} : vector<10x256xf32> to vector<9x256xf32>
    %69 = vector.extract_strided_slice %67 {offsets = [1, 0], sizes = [9, 256], strides = [1, 1]} : vector<10x256xf32> to vector<9x256xf32>
    %70 = arith.maximumf %68, %69 : vector<9x256xf32>
    %c0_52 = arith.constant 0 : index
    %c0_53 = arith.constant 0 : index
    %71 = vector.load %arg7[%c0_52, %c0_53] : memref<5x9xf32, #tpu.memory_space<vmem>>, vector<5x9xf32>
    %cst_54 = arith.constant dense<0.000000e+00> : vector<5x256xf32>
    %72 = tpu.matmul %71, %70, %cst_54 {dimension_numbers = #tpu.dot_dimension_numbers<[1], [0], [0], [1], [0, 0, 1, 1], [], []>} : vector<5x9xf32>, vector<9x256xf32>, vector<5x256xf32> -> vector<5x256xf32>
    %c0_55 = arith.constant 0 : index
    %c0_56 = arith.constant 0 : index
    %73 = vector.load %arg9[%c0_55, %c0_56] : memref<1x256xf32, #tpu.memory_space<vmem>>, vector<1x256xf32>
    %74 = vector.extract_strided_slice %72 {offsets = [0, 0], sizes = [1, 256], strides = [1, 1]} : vector<5x256xf32> to vector<1x256xf32>
    %c0_57 = arith.constant 0 : index
    %c0_58 = arith.constant 0 : index
    %c0_59 = arith.constant 0 : index
    %75 = vector.load %arg8[%c0_57, %c0_58, %c0_59] : memref<5x256x256xf32, #tpu.memory_space<vmem>>, vector<1x256x256xf32>
    %76 = vector.shape_cast %75 : vector<1x256x256xf32> to vector<256x256xf32>
    %cst_60 = arith.constant dense<0.000000e+00> : vector<1x256xf32>
    %77 = tpu.matmul %74, %76, %cst_60 {dimension_numbers = #tpu.dot_dimension_numbers<[1], [0], [0], [1], [0, 0, 1, 1], [], []>} : vector<1x256xf32>, vector<256x256xf32>, vector<1x256xf32> -> vector<1x256xf32>
    %78 = arith.addf %73, %77 : vector<1x256xf32>
    %79 = vector.extract_strided_slice %72 {offsets = [1, 0], sizes = [1, 256], strides = [1, 1]} : vector<5x256xf32> to vector<1x256xf32>
    %c1_61 = arith.constant 1 : index
    %c0_62 = arith.constant 0 : index
    %c0_63 = arith.constant 0 : index
    %80 = vector.load %arg8[%c1_61, %c0_62, %c0_63] : memref<5x256x256xf32, #tpu.memory_space<vmem>>, vector<1x256x256xf32>
    %81 = vector.shape_cast %80 : vector<1x256x256xf32> to vector<256x256xf32>
    %cst_64 = arith.constant dense<0.000000e+00> : vector<1x256xf32>
    %82 = tpu.matmul %79, %81, %cst_64 {dimension_numbers = #tpu.dot_dimension_numbers<[1], [0], [0], [1], [0, 0, 1, 1], [], []>} : vector<1x256xf32>, vector<256x256xf32>, vector<1x256xf32> -> vector<1x256xf32>
    %83 = arith.addf %78, %82 : vector<1x256xf32>
    %84 = vector.extract_strided_slice %72 {offsets = [2, 0], sizes = [1, 256], strides = [1, 1]} : vector<5x256xf32> to vector<1x256xf32>
    %c2_65 = arith.constant 2 : index
    %c0_66 = arith.constant 0 : index
    %c0_67 = arith.constant 0 : index
    %85 = vector.load %arg8[%c2_65, %c0_66, %c0_67] : memref<5x256x256xf32, #tpu.memory_space<vmem>>, vector<1x256x256xf32>
    %86 = vector.shape_cast %85 : vector<1x256x256xf32> to vector<256x256xf32>
    %cst_68 = arith.constant dense<0.000000e+00> : vector<1x256xf32>
    %87 = tpu.matmul %84, %86, %cst_68 {dimension_numbers = #tpu.dot_dimension_numbers<[1], [0], [0], [1], [0, 0, 1, 1], [], []>} : vector<1x256xf32>, vector<256x256xf32>, vector<1x256xf32> -> vector<1x256xf32>
    %88 = arith.addf %83, %87 : vector<1x256xf32>
    %89 = vector.extract_strided_slice %72 {offsets = [3, 0], sizes = [1, 256], strides = [1, 1]} : vector<5x256xf32> to vector<1x256xf32>
    %c3_69 = arith.constant 3 : index
    %c0_70 = arith.constant 0 : index
    %c0_71 = arith.constant 0 : index
    %90 = vector.load %arg8[%c3_69, %c0_70, %c0_71] : memref<5x256x256xf32, #tpu.memory_space<vmem>>, vector<1x256x256xf32>
    %91 = vector.shape_cast %90 : vector<1x256x256xf32> to vector<256x256xf32>
    %cst_72 = arith.constant dense<0.000000e+00> : vector<1x256xf32>
    %92 = tpu.matmul %89, %91, %cst_72 {dimension_numbers = #tpu.dot_dimension_numbers<[1], [0], [0], [1], [0, 0, 1, 1], [], []>} : vector<1x256xf32>, vector<256x256xf32>, vector<1x256xf32> -> vector<1x256xf32>
    %93 = arith.addf %88, %92 : vector<1x256xf32>
    %94 = vector.extract_strided_slice %72 {offsets = [4, 0], sizes = [1, 256], strides = [1, 1]} : vector<5x256xf32> to vector<1x256xf32>
    %c4_73 = arith.constant 4 : index
    %c0_74 = arith.constant 0 : index
    %c0_75 = arith.constant 0 : index
    %95 = vector.load %arg8[%c4_73, %c0_74, %c0_75] : memref<5x256x256xf32, #tpu.memory_space<vmem>>, vector<1x256x256xf32>
    %96 = vector.shape_cast %95 : vector<1x256x256xf32> to vector<256x256xf32>
    %cst_76 = arith.constant dense<0.000000e+00> : vector<1x256xf32>
    %97 = tpu.matmul %94, %96, %cst_76 {dimension_numbers = #tpu.dot_dimension_numbers<[1], [0], [0], [1], [0, 0, 1, 1], [], []>} : vector<1x256xf32>, vector<256x256xf32>, vector<1x256xf32> -> vector<1x256xf32>
    %98 = arith.addf %93, %97 : vector<1x256xf32>
    %c0_77 = arith.constant 0 : index
    %c0_78 = arith.constant 0 : index
    %99 = vector.load %arg10[%c0_77, %c0_78] : memref<256x128xf32, #tpu.memory_space<vmem>>, vector<256x128xf32>
    %cst_79 = arith.constant dense<0.000000e+00> : vector<1x128xf32>
    %100 = tpu.matmul %98, %99, %cst_79 {dimension_numbers = #tpu.dot_dimension_numbers<[1], [0], [0], [1], [0, 0, 1, 1], [], []>} : vector<1x256xf32>, vector<256x128xf32>, vector<1x128xf32> -> vector<1x128xf32>
    %c0_80 = arith.constant 0 : index
    %c0_81 = arith.constant 0 : index
    %101 = vector.load %arg11[%c0_80, %c0_81] : memref<1x128xf32, #tpu.memory_space<vmem>>, vector<1x128xf32>
    %102 = arith.addf %100, %101 : vector<1x128xf32>
    %c0_82 = arith.constant 0 : index
    %c0_83 = arith.constant 0 : index
    %c0_84 = arith.constant 0 : index
    %103 = vector.load %arg12[%c0_82, %c0_83, %c0_84] : memref<1x1x128xf32, #tpu.memory_space<vmem>>, vector<1x1x128xf32>
    %104 = vector.shape_cast %103 : vector<1x1x128xf32> to vector<1x128xf32>
    %105 = vector.shape_cast %102 : vector<1x128xf32> to vector<1x1x128xf32>
    tpu.vector_store %arg12[%c0_82, %c0_83, %c0_84], %105 {strides = array<i32>} : memref<1x1x128xf32, #tpu.memory_space<vmem>>, vector<1x1x128xf32>,
    return
  }
  func.func @transform_0(%arg0: i32) -> (i32, i32, i32) {
    %c0_i32 = arith.constant 0 : i32
    %c0_i32_0 = arith.constant 0 : i32
    %c0_i32_1 = arith.constant 0 : i32
    return %arg0, %c0_i32, %c0_i32_0 : i32, i32, i32
  }
  func.func @transform_1(%arg0: i32) -> (i32, i32, i32) {
    %c0_i32 = arith.constant 0 : i32
    %c0_i32_0 = arith.constant 0 : i32
    %c0_i32_1 = arith.constant 0 : i32
    %c0_i32_2 = arith.constant 0 : i32
    return %c0_i32, %c0_i32_0, %c0_i32_1 : i32, i32, i32
  }
  func.func @transform_2(%arg0: i32) -> (i32, i32) {
    %c0_i32 = arith.constant 0 : i32
    %c0_i32_0 = arith.constant 0 : i32
    %c0_i32_1 = arith.constant 0 : i32
    return %c0_i32, %c0_i32_0 : i32, i32
  }
  func.func @transform_3(%arg0: i32) -> (i32, i32) {
    %c0_i32 = arith.constant 0 : i32
    %c0_i32_0 = arith.constant 0 : i32
    %c0_i32_1 = arith.constant 0 : i32
    return %c0_i32, %c0_i32_0 : i32, i32
  }
  func.func @transform_4(%arg0: i32) -> (i32, i32, i32) {
    %c0_i32 = arith.constant 0 : i32
    %c0_i32_0 = arith.constant 0 : i32
    %c0_i32_1 = arith.constant 0 : i32
    %c0_i32_2 = arith.constant 0 : i32
    return %c0_i32, %c0_i32_0, %c0_i32_1 : i32, i32, i32
  }
  func.func @transform_5(%arg0: i32) -> (i32, i32) {
    %c0_i32 = arith.constant 0 : i32
    %c0_i32_0 = arith.constant 0 : i32
    %c0_i32_1 = arith.constant 0 : i32
    return %c0_i32, %c0_i32_0 : i32, i32
  }
  func.func @transform_6(%arg0: i32) -> (i32, i32) {
    %c0_i32 = arith.constant 0 : i32
    %c0_i32_0 = arith.constant 0 : i32
    %c0_i32_1 = arith.constant 0 : i32
    return %c0_i32, %c0_i32_0 : i32, i32
  }
  func.func @transform_7(%arg0: i32) -> (i32, i32, i32) {
    %c0_i32 = arith.constant 0 : i32
    %c0_i32_0 = arith.constant 0 : i32
    %c0_i32_1 = arith.constant 0 : i32
    %c0_i32_2 = arith.constant 0 : i32
    return %c0_i32, %c0_i32_0, %c0_i32_1 : i32, i32, i32
  }
  func.func @transform_8(%arg0: i32) -> (i32, i32) {
    %c0_i32 = arith.constant 0 : i32
    %c0_i32_0 = arith.constant 0 : i32
    %c0_i32_1 = arith.constant 0 : i32
    return %c0_i32, %c0_i32_0 : i32, i32
  }
  func.func @transform_9(%arg0: i32) -> (i32, i32) {
    %c0_i32 = arith.constant 0 : i32
    %c0_i32_0 = arith.constant 0 : i32
    %c0_i32_1 = arith.constant 0 : i32
    return %c0_i32, %c0_i32_0 : i32, i32
  }
  func.func @transform_10(%arg0: i32) -> (i32, i32) {
    %c0_i32 = arith.constant 0 : i32
    %c0_i32_0 = arith.constant 0 : i32
    %c0_i32_1 = arith.constant 0 : i32
    return %c0_i32, %c0_i32_0 : i32, i32
  }
  func.func @transform_11(%arg0: i32) -> (i32, i32, i32) {
    %c0_i32 = arith.constant 0 : i32
    %c0_i32_0 = arith.constant 0 : i32
    %c0_i32_1 = arith.constant 0 : i32
    return %arg0, %c0_i32, %c0_i32_0 : i32, i32, i32
  }
}

</mosaic_0001>

<bundles_post_ra>
// kernel: cnn_forward.1
= control target key start
LH: loop header
LB: loop body
LE: loop exit
PB: predicated region body
PF: predicated region fallthrough
CT: control target
= control target key end

     0   :  { %s4726_s0 = inlined_call_operand.vmem [shape: f32[2,28,28], index: 0, kind: input, shape index: {}]   ;;  %s4727_s1 = inlined_call_operand.hbm [shape: f32[5,28,512], index: 1, kind: input, shape index: {}]   ;;  %s4728_s2 = inlined_call_operand.hbm [shape: f32[1,256], index: 2, kind: input, shape index: {}]   ;;  %s4729_s3 = inlined_call_operand.hbm [shape: f32[12,23], index: 3, kind: input, shape index: {}]   ;;  %s4730_s4 = inlined_call_operand.hbm [shape: f32[3,256,512], index: 4, kind: input, shape index: {}]   ;;  %s4731_s5 = inlined_call_operand.hbm [shape: f32[1,256], index: 5, kind: input, shape index: {}]   ;;  %s4732_s6 = inlined_call_operand.hbm [shape: f32[5,9], index: 6, kind: input, shape index: {}]   ;;  %s4733_s7 = inlined_call_operand.hbm [shape: f32[5,256,256], index: 7, kind: input, shape index: {}]   ;;  %s4734_s8 = inlined_call_operand.hbm [shape: f32[1,256], index: 8, kind: input, shape index: {}]   ;;  %s4735_s9 = inlined_call_operand.hbm [shape: f32[256,128], index: 9, kind: input, shape index: {}]   ;;  %s4736_s10 = inlined_call_operand.hbm [shape: f32[1,128], index: 10, kind: input, shape index: {}]   ;;  %s4737_s11 = inlined_call_operand.hbm [shape: f32[2,1,128], index: 11, kind: output, shape index: {}]  }
   0x1   :  { %4742 = sst [smem:[#allocation39_spill]] %s4727_s1 }
   0x2   :  { %4743 = sst [smem:[#allocation40_spill]] %s4728_s2 }
   0x3   :  { %4744 = sst [smem:[#allocation41_spill]] %s4730_s4 }
   0x4   :  { %4745 = sst [smem:[#allocation42_spill]] %s4732_s6 }
   0x5   :  { %16 = vsyncpa [#allocation3], 0 }
   0x6   :  { %17 = vsyncpa [#allocation6], 0 }
   0x7   :  { %18 = vsyncpa [#allocation9], 0 }
   0x8   :  { %19 = vsyncpa [#allocation12], 0 }
   0x9   :  { %20 = vsyncpa [#allocation15], 0 }
   0xa   :  { %21 = vsyncpa [#allocation18], 0 }
   0xb   :  { %22 = vsyncpa [#allocation4], 0 }
   0xc   :  { %24 = vsyncpa [#allocation4 + $0x1], 0  ;;  %s4230_s17 = smov 0   ;;  %s4232_s18 = smov 0  }
   0xd   :  { %s4234_s19 = smov 0   ;;  %s4236_s20 = smov 0  }
   0xe LB: > { %4746 = sst [smem:[#allocation27_spill]] %s4148_s19  ;;  %s4251_s21 = sadd.s32 4294967295, %s4152_s20   ;;  %s4152_s20 = sphi %s4236_s20, %s4775_s20   ;;  %s4148_s19 = sphi %s4234_s19, %s4777_s19   ;;  %s4144_s18 = sphi %s4232_s18, %s4779_s18   ;;  %s4140_s17 = sphi %s4230_s17, %s4778_s17  }
   0xf   : > { %s3493_s22 = sadd.s32 4294967294, %s4152_s20   ;;  %s4255_s23 = sadd.s32 1, %s4152_s20  }
  0x10   : > { %4747 = sst [smem:[#allocation28_spill]] %s4255_s23  ;;  %s273_s24 = sadd.s32 1, %s4148_s19 }
  0x11   : > { %s270_s25 = ssub.s32 %s4152_s20, %s4255_s23  ;;  %p283_p0 = scmp.ne.s32.totalorder %s4148_s19, %s4144_s18 }
  0x12   : > { %p271_p1 = scmp.eq.s32.totalorder %s270_s25, 0  ;;  %p284_p2 = scmp.eq.s32.totalorder %s4251_s21, 1 }
  0x13   : > { %p289_p3 = scmp.ne.s32.totalorder %s4144_s18, %s4140_s17  ;;  %p290_p4 = scmp.eq.s32.totalorder %s3493_s22, 1 }
  0x14   : > { %s4266_s26 = scalar_select %p271_p1, %s4148_s19, %s273_s24  }
  0x15   : > { %p4268_p5 = por %p284_p2, %p283_p0  ;;  %p4272_p6 = por %p290_p4, %p289_p3 }
  0x16   : > { %4748 = sst [smem:[#allocation29_spill]] %s4266_s26  ;;  %p3494_p7 = scmp.ge.s32.totalorder %s4152_s20, 1 }
  0x17   : > { %s4750_s28 = scalar_select %p4272_p6, 1, 0 }
  0x18   : > { %p297_p8 = scmp.lt.s32.totalorder %s4152_s20, 3  ;;  %p3697_p9 = scmp.eq.s32.totalorder %s4251_s21, 0 }
  0x19   : > { %4751 = sst [smem:[#allocation30_spill]] %s4750_s28  ;;  %s4154_s14 = smov [#allocation5]  }
  0x1a   : > { %p4279_p10 = pnand %p3494_p7, %p297_p8  ;;  %s4753_s2 = sld [smem:[#allocation40_spill]] }
  0x1b   : > { %s325_s15 = sshll.u32 %s4154_s14, 4  ;;  %s4755_s4 = sld [smem:[#allocation41_spill]]  ;;  %s326_s15 = int_to_ptr.vmem [resolvable:$true] %s325_s15 }
  0x1c   : > { %p3662_p11 = pneg %p4279_p10  ;;  %s4155_s30 = smov [#allocation8]  }
  0x1d   : > { %s350_s12 = sshll.u32 %s4155_s30, 4  ;;  %s4756_s6 = sld [smem:[#allocation42_spill]]  ;;  %s351_s12 = int_to_ptr.vmem [resolvable:$true] %s350_s12 }
  0x1e   : > { %p4290_p12 = pnand %p3697_p9, %p3662_p11  ;;  %s4156_s19 = smov 512  }
  0x1f   : > { %s4157_s23 = smov 32   ;;  %s4158_s28 = smov [#allocation11]  }
  0x20   : > { %s323_s13 = sshll.u32 %s4753_s2, 4  ;;  %s4159_s2 = smov [#allocation14]   ;;  %s324_s13 = int_to_ptr.hbm [resolvable:$true] %s323_s13 }
  0x21   : > { %s348_s25 = sshll.u32 %s4755_s4, 4  ;;  %s401_s4 = sshll.u32 %s4734_s8, 4  ;;  %s349_s25 = int_to_ptr.hbm [resolvable:$true] %s348_s25  ;;  %s402_s4 = int_to_ptr.hbm [resolvable:$true] %s401_s4 }
  0x22   : > { %3668 = dma.hbm_to_vmem [thread:$0]  (!%p4290_p12), %s324_s13, 32, %s326_s15, [#allocation6]  }
  0x23   : > { %s375_s26 = sshll.u32 %s4756_s6, 4  ;;  %s377_s13 = sshll.u32 %s4158_s28, 4  ;;  %s376_s26 = int_to_ptr.hbm [resolvable:$true] %s375_s26  ;;  %s378_s13 = int_to_ptr.vmem [resolvable:$true] %s377_s13 }
  0x24   : > { %3674 = dma.hbm_to_vmem [thread:$0]  (!%p4290_p12), %s349_s25, 49152, %s351_s12, [#allocation9], %s4156_s19, %s4156_s19, %s4157_s23  }
  0x25   : > { %3680 = dma.hbm_to_vmem [thread:$0]  (!%p4290_p12), %s376_s26, 128, %s378_s13, [#allocation12]  }
  0x26   : > { %s403_s15 = sshll.u32 %s4159_s2, 4  ;;  %s4757_s1 = sld [smem:[#allocation39_spill]]  ;;  %s404_s15 = int_to_ptr.vmem [resolvable:$true] %s403_s15 }
  0x27   : > { %3686 = dma.hbm_to_vmem [thread:$0]  (!%p4290_p12), %s402_s4, 32, %s404_s15, [#allocation15]  }
  0x28   : > { %s334_s22 = sshll.u32 %s4729_s3, 4  ;;  %s4160_s28 = smov [#allocation2]   ;;  %s335_s22 = int_to_ptr.hbm [resolvable:$true] %s334_s22 }
  0x29   : > { %s310_s24 = sshll.u32 %s4160_s28, 4  ;;  %s4161_s26 = smov [#allocation7]   ;;  %s311_s24 = int_to_ptr.vmem [resolvable:$true] %s310_s24 }
  0x2a   : > { %s336_s13 = sshll.u32 %s4161_s26, 4  ;;  %s4162_s2 = smov 128   ;;  %s337_s13 = int_to_ptr.vmem [resolvable:$true] %s336_s13 }
  0x2b   : > { %s4163_s30 = smov 8   ;;  %s363_s14 = sshll.u32 %s4731_s5, 4  ;;  %s364_s14 = int_to_ptr.hbm [resolvable:$true] %s363_s14 }
  0x2c   : > { %s308_s6 = sshll.u32 %s4757_s1, 4  ;;  %s4164_s25 = smov [#allocation10]   ;;  %s309_s6 = int_to_ptr.hbm [resolvable:$true] %s308_s6 }
  0x2d   : > { %3665 = dma.hbm_to_vmem [thread:$0]  (!%p4290_p12), %s309_s6, 10240, %s311_s24, [#allocation3], %s4156_s19, %s4156_s19, %s4157_s23  }
  0x2e   : > { %3671 = dma.hbm_to_vmem [thread:$0]  (!%p4290_p12), %s335_s22, 256, %s337_s13, [#allocation6], %s4162_s2, %s4162_s2, %s4163_s30  }
  0x2f   : > { %s365_s12 = sshll.u32 %s4164_s25, 4  ;;  %s386_s6 = sshll.u32 %s4733_s7, 4  ;;  %s366_s12 = int_to_ptr.vmem [resolvable:$true] %s365_s12  ;;  %s387_s6 = int_to_ptr.hbm [resolvable:$true] %s386_s6 }
  0x30   : > { %3677 = dma.hbm_to_vmem [thread:$0]  (!%p4290_p12), %s364_s14, 32, %s366_s12, [#allocation9]  }
  0x31   : > { %s4165_s19 = smov [#allocation13]   ;;  %s4166_s22 = smov 256  }
  0x32   : > { %s388_s23 = sshll.u32 %s4165_s19, 4  ;;  %s4167_s24 = smov 16   ;;  %s389_s23 = int_to_ptr.vmem [resolvable:$true] %s388_s23 }
  0x33   : > { %3683 = dma.hbm_to_vmem [thread:$0]  (!%p4290_p12), %s387_s6, 40960, %s389_s23, [#allocation12], %s4166_s22, %s4166_s22, %s4167_s24  }
  0x34   : > { %s412_s4 = sshll.u32 %s4735_s9, 4  ;;  %s4168_s15 = smov [#allocation16]   ;;  %s413_s4 = int_to_ptr.hbm [resolvable:$true] %s412_s4 }
  0x35   : > { %s414_s1 = sshll.u32 %s4168_s15, 4  ;;  %s427_s14 = sshll.u32 %s4736_s10, 4  ;;  %s415_s1 = int_to_ptr.vmem [resolvable:$true] %s414_s1  ;;  %s428_s14 = int_to_ptr.hbm [resolvable:$true] %s427_s14 }
  0x36   : > { %3689 = dma.hbm_to_vmem [thread:$0]  (!%p4290_p12), %s413_s4, 4096, %s415_s1, [#allocation15], %s4162_s2, %s4162_s2, %s4163_s30  }
  0x37   : > { %s4169_s12 = smov [#allocation17]   ;;  %450 = sbr.rel (%p4279_p10) target bundleno = 1308 (0x51c), region = 64 }
  0x38   : > { %s429_s19 = sshll.u32 %s4169_s12, 4  ;;  %s430_s19 = int_to_ptr.vmem [resolvable:$true] %s429_s19 }
  0x39   : > { %3692 = dma.hbm_to_vmem [thread:$0]  (!%p4290_p12), %s428_s14, 16, %s430_s19, [#allocation18]  }
  0x3c   : > { %4111 = dma.done.wait (%p3697_p9), [#allocation3], 10240  }
  0x3d   : > { %4113 = vsyncadd (%p3697_p9), [#allocation3], 4294957056 }
  0x3e   : > { %4115 = dma.done.wait (%p3697_p9), [#allocation6], 288  }
  0x3f   : > { %4117 = vsyncadd (%p3697_p9), [#allocation6], 4294967008 }
  0x40   : > { %4119 = dma.done.wait (%p3697_p9), [#allocation9], 49184  }
  0x41   : > { %4121 = vsyncadd (%p3697_p9), [#allocation9], 4294918112 }
  0x42   : > { %4123 = dma.done.wait (%p3697_p9), [#allocation12], 41088  }
  0x43   : > { %4125 = vsyncadd (%p3697_p9), [#allocation12], 4294926208 }
  0x44   : > { %4127 = dma.done.wait (%p3697_p9), [#allocation15], 4128  }
  0x45   : > { %4129 = vsyncadd (%p3697_p9), [#allocation15], 4294963168 }
  0x46   : > { %4131 = dma.done.wait (%p3697_p9), [#allocation18], 16  }
  0x47   : > { %4133 = vsyncadd (%p3697_p9), [#allocation18], 4294967280  ;;  %p535_p13 = scmp.lt.s32.totalorder %s4251_s21, 1  ;;  %vm589_vm0 = vcmask 1043456   ;;  %v575_v0 = vld [vmem:[#allocation2 + $0xe0] sm:$0xf]  ;;  %s3336_s26 = scalar_lea.hbm %s4737_s11, %s4251_s21 }
  0x48   : > { %v576_v1 = vld [vmem:[#allocation2 + $0xe8] sm:$0xf]  ;;  %v577_v2 = vld [vmem:[#allocation2 + $0xf0] sm:$0xf]  ;;  %3519 = vmatpush.msk.msra.mxu0 %vm589_vm0, %v575_v0  ;;  %v578_v3 = vld [vmem:[#allocation2 + $0xf8] sm:$0xf] }
  0x49   : > { %s536_s29 = scalar_select %p535_p13, %s4251_s21, 1  ;;  %3523 = vmatpush.msk.msra.mxu1 %vm589_vm0, %v576_v1  ;;  %v571_v4 = vld [vmem:[#allocation2 + $0xc0] sm:$0xff]  ;;  %v572_v5 = vld [vmem:[#allocation2 + $0xc8] sm:$0xff]  ;;  %3612 = vmatpush.msk.msra.mxu2 %vm589_vm0, %v577_v2  ;;  %v573_v6 = vld [vmem:[#allocation2 + $0xd0] sm:$0xff]  ;;  %vm579_vm1 = vcmask 228352   ;;  %vm1332_vm2 = vcmask 1046528  }
  0x4a   : > { %3616 = vmatpush.msk.msra.mxu3 %vm589_vm0, %v578_v3  ;;  %v574_v7 = vld [vmem:[#allocation2 + $0xd8] sm:$0xff]  ;;  %v567_v8 = vld [vmem:[#allocation2 + $0xa0] sm:$0xff]  ;;  %615 = vmatpush.msra.mxu0 %v571_v4  ;;  %v568_v9 = vld [vmem:[#allocation2 + $0xa8] sm:$0xff]  ;;  %vm1357_vm3 = vcmask 187392   ;;  %vm2184_vm4 = vcmask 1045504   ;;  %vm2428_vm5 = vcmask 1040384  }
  0x4b   : > { %s3611_s16 = sshll.u32 %s536_s29, 5  ;;  %641 = vmatpush.msra.mxu1 %v572_v5  ;;  %v569_v10 = vld [vmem:[#allocation2 + $0xb0] sm:$0xff]  ;;  %v570_v11 = vld [vmem:[#allocation2 + $0xb8] sm:$0xff]  ;;  %3613 = vmatpush.msra.mxu2 %v573_v6  ;;  %v563_v12 = vld [vmem:[#allocation2 + $0x80] sm:$0xff]  ;;  %vm2424_vm6 = vcmask 72704   ;;  %s533_s23 = sand.u32 1, %s4144_s18  }
  0x4c   : > { %s4376_s6 = scalar_lea.vmem %s4726_s0, %s3611_s16  ;;  %3617 = vmatpush.msra.mxu3 %v574_v7  ;;  %v564_v13 = vld [vmem:[#allocation2 + $0x88] sm:$0xff]  ;;  %616 = vmatpush.msra.mxu0 %v567_v8  ;;  %v565_v14 = vld [vmem:[#allocation2 + $0x90] sm:$0xff]  ;;  %v566_v15 = vld [vmem:[#allocation2 + $0x98] sm:$0xff]  ;;  %s534_s13 = scalar_lea.vmem [#allocation19], %s533_s23 }
  0x4d   : > { %642 = vmatpush.msra.mxu1 %v568_v9  ;;  %3614 = vmatpush.msra.mxu2 %v569_v10  ;;  %v4379_v16 = vld [vmem:[%s4376_s6 + $0x1] sm:$0xff]  ;;  %v561_v17 = vld [vmem:[%s4376_s6 + $0x11] sm:$0xff]  ;;  %v4393_v26 = vld [vmem:[%s4376_s6 + $0x9] sm:$0xff]  ;;  %s3338_s4 = sshll.u32 %s534_s13, 4  ;;  %s3340_s15 = sshll.u32 %s3336_s26, 4  ;;  %s3339_s4 = int_to_ptr.vmem [resolvable:$true] %s3338_s4  ;;  %s3341_s15 = int_to_ptr.hbm [resolvable:$true] %s3340_s15 }
  0x4e   : > { %3618 = vmatpush.msra.mxu3 %v570_v11  ;;  %617 = vmatpush.msra.mxu0 %v563_v12  ;;  %v557_v18 = vld [vmem:[#allocation2 + $0x70] sm:$0xf]  ;;  %v558_v19 = vld [vmem:[#allocation2 + $0x78] sm:$0xf]  ;;  %v4396_v27 = vld [vmem:[%s4376_s6] sm:$0xff]  ;;  %s3328_s1 = scalar_lea.sflag [#allocation4], %s533_s23 }
  0x4f   : > { %643 = vmatpush.msra.mxu1 %v564_v13  ;;  %3615 = vmatpush.msra.mxu2 %v565_v14  ;;  %v553_v20 = vld [vmem:[#allocation2 + $0x50] sm:$0xff]  ;;  %v554_v21 = vld [vmem:[#allocation2 + $0x58] sm:$0xff]  ;;  %v555_v30 = vld [vmem:[#allocation2 + $0x60] sm:$0xf]  ;;  %s4080_s25 = sshra.s32 %s3341_s15, 4  ;;  %s4086_s12 = scalar_lea.hbm %s4737_s11, 2  ;;  %s4081_s25 = int_to_ptr.hbm [resolvable:$true] %s4080_s25 }
  0x50   : > { %3619 = vmatpush.msra.mxu3 %v566_v15  ;;  %3520 = vmatmul.msk.f32.vlgmr.msra.gmra.mxu0 %vm579_vm1, %v4379_v16  ;;  %v549_v22 = vld [vmem:[#allocation2 + $0x30] sm:$0xff]  ;;  %v550_v23 = vld [vmem:[#allocation2 + $0x38] sm:$0xff]  ;;  %v556_v31 = vld [vmem:[#allocation2 + $0x68] sm:$0xf]  ;;  %s4082_s28 = scalar_lea.hbm %s4081_s25, 1  ;;  %p4087_p3 = scmp.lt.s32.totalorder %s4081_s25, %s4737_s11 }
  0x51   : > { %3524 = vmatmul.msk.f32.vlgmr.msra.gmra.mxu1 %vm579_vm1, %v4379_v16  ;;  %3530 = vmatmul.msk.f32.vlgmr.msra.gmra.mxu2 %vm579_vm1, %v561_v17  ;;  %v545_v24 = vld [vmem:[#allocation2 + $0x10] sm:$0xff]  ;;  %v546_v25 = vld [vmem:[#allocation2 + $0x18] sm:$0xff]  ;;  %v551_v34 = vld [vmem:[#allocation2 + $0x40] sm:$0xff]  ;;  %p4083_p0 = scmp.ne.s32.totalorder %s4081_s25, %s4082_s28  ;;  %p4088_p4 = scmp.lt.s32.totalorder %s4086_s12, %s4082_s28 }
  0x52   : > { %3534 = vmatmul.msk.f32.vlgmr.msra.gmra.mxu3 %vm579_vm1, %v561_v17  ;;  %3543 = vmatpush.msk.msrb.mxu2 %vm589_vm0, %v557_v18  ;;  %v849_v28 = vld [vmem:[#allocation2 + $0x170] sm:$0xf]  ;;  %v850_v29 = vld [vmem:[#allocation2 + $0x178] sm:$0xf]  ;;  %v552_v35 = vld [vmem:[#allocation2 + $0x48] sm:$0xff] }
  0x53   : > { %3547 = vmatpush.msk.msrb.mxu3 %vm589_vm0, %v558_v19  ;;  %3527 = vmatpush.msk.msrb.mxu0 %vm589_vm0, %v577_v2  ;;  %v845_v32 = vld [vmem:[#allocation2 + $0x150] sm:$0xff]  ;;  %v846_v33 = vld [vmem:[#allocation2 + $0x158] sm:$0xff]  ;;  %v4411_v38 = vld [vmem:[%s4376_s6 + $0x8] sm:$0xff]  ;;  %p4084_p1 = pnand %p4083_p0, %p4268_p5  ;;  %p4089_p7 = por %p4088_p4, %p4087_p3 }
  0x54   : > { %3531 = vmatpush.msk.msrb.mxu1 %vm589_vm0, %v578_v3  ;;  %792 = vmatpush.msrb.mxu2 %v553_v20  ;;  %v841_v36 = vld [vmem:[#allocation2 + $0x130] sm:$0xff]  ;;  %v842_v37 = vld [vmem:[#allocation2 + $0x138] sm:$0xff]  ;;  %v547_v41 = vld [vmem:[#allocation2 + $0x20] sm:$0xff] }
  0x55   : > { %818 = vmatpush.msrb.mxu3 %v554_v21  ;;  %667 = vmatpush.msrb.mxu0 %v573_v6  ;;  %v837_v39 = vld [vmem:[#allocation2 + $0x110] sm:$0xff]  ;;  %v838_v40 = vld [vmem:[#allocation2 + $0x118] sm:$0xff]  ;;  %v548_v42 = vld [vmem:[#allocation2 + $0x28] sm:$0xff]  ;;  %p4085_p2 = pneg %p4084_p1 }
  0x56   : > { %693 = vmatpush.msrb.mxu1 %v574_v7  ;;  %793 = vmatpush.msrb.mxu2 %v549_v22  ;;  %v1006_v43 = vld [vmem:[#allocation2 + $0x1f0] sm:$0xf]  ;;  %v1007_v44 = vld [vmem:[#allocation2 + $0x1f8] sm:$0xf]  ;;  %v543_v45 = vld [vmem:[#allocation2] sm:$0xff] }
  0x57   : > { %819 = vmatpush.msrb.mxu3 %v550_v23  ;;  %668 = vmatpush.msrb.mxu0 %v569_v10  ;;  %v544_v46 = vld [vmem:[#allocation2 + $0x8] sm:$0xff]  ;;  %v1002_v47 = vld [vmem:[#allocation2 + $0x1d0] sm:$0xff]  ;;  %v1003_v48 = vld [vmem:[#allocation2 + $0x1d8] sm:$0xff]  ;;  %p4090_p8 = pnand %p4089_p7, %p4085_p2 }
  0x58   : > { %694 = vmatpush.msrb.mxu1 %v570_v11  ;;  %794 = vmatpush.msrb.mxu2 %v545_v24  ;;  %v4422_v49 = vld [vmem:[%s4376_s6 + $0x10] sm:$0xff]  ;;  %v999_v51 = vld [vmem:[#allocation2 + $0x1b8] sm:$0xff]  ;;  %v847_v54 = vld [vmem:[#allocation2 + $0x160] sm:$0xf] }
  0x59   : > { %820 = vmatpush.msrb.mxu3 %v546_v25  ;;  %3521 = vmatmul.msk.f32.gmra.mxu0 %vm579_vm1, %v4393_v26  ;;  %v998_v50 = vld [vmem:[#allocation2 + $0x1b0] sm:$0xff]  ;;  %v995_v53 = vld [vmem:[#allocation2 + $0x198] sm:$0xff]  ;;  %v848_v55 = vld [vmem:[#allocation2 + $0x168] sm:$0xf] }
  0x5a   : > { %3525 = vmatmul.msk.f32.gmra.mxu1 %vm579_vm1, %v4393_v26  ;;  %3544 = vmatmul.msk.f32.vlgmr.msrb.gmra.mxu2 %vm579_vm1, %v4396_v27  ;;  %v994_v52 = vld [vmem:[#allocation2 + $0x190] sm:$0xff]  ;;  %v843_v56 = vld [vmem:[#allocation2 + $0x140] sm:$0xff]  ;;  %v844_v57 = vld [vmem:[#allocation2 + $0x148] sm:$0xff] }
  0x5b   : > { %3548 = vmatmul.msk.f32.vlgmr.msrb.gmra.mxu3 %vm579_vm1, %v4396_v27  ;;  %669 = vmatpush.msrb.mxu0 %v565_v14  ;;  %v839_v58 = vld [vmem:[#allocation2 + $0x120] sm:$0xff]  ;;  %v840_v59 = vld [vmem:[#allocation2 + $0x128] sm:$0xff]  ;;  %v1163_v0 = vld [vmem:[#allocation2 + $0x270] sm:$0xf] }
  0x5c   : > { %695 = vmatpush.msrb.mxu1 %v566_v15  ;;  %3559 = vmatpush.msk.msra.mxu2 %vm589_vm0, %v849_v28  ;;  %v831_v60 = vld [vmem:[%s4376_s6 + $0x2] sm:$0xff]  ;;  %v832_v63 = vld [vmem:[%s4376_s6 + $0xa] sm:$0xff]  ;;  %v1164_v1 = vld [vmem:[#allocation2 + $0x278] sm:$0xf] }
  0x5d   : > { %3563 = vmatpush.msk.msra.mxu3 %vm589_vm0, %v850_v29  ;;  %3535 = vmatpush.msk.msra.mxu0 %vm589_vm0, %v555_v30  ;;  %v835_v61 = vld [vmem:[#allocation2 + $0x100] sm:$0xff]  ;;  %v836_v62 = vld [vmem:[#allocation2 + $0x108] sm:$0xff]  ;;  %v1159_v2 = vld [vmem:[#allocation2 + $0x250] sm:$0xff] }
  0x5e   : > { %3539 = vmatpush.msk.msra.mxu1 %vm589_vm0, %v556_v31  ;;  %937 = vmatpush.msra.mxu2 %v845_v32  ;;  %v1160_v3 = vld [vmem:[#allocation2 + $0x258] sm:$0xff]  ;;  %v1155_v4 = vld [vmem:[#allocation2 + $0x230] sm:$0xff]  ;;  %v1004_v9 = vld [vmem:[#allocation2 + $0x1e0] sm:$0xf] }
  0x5f   : > { %963 = vmatpush.msra.mxu3 %v846_v33  ;;  %740 = vmatpush.msra.mxu0 %v551_v34  ;;  %v1156_v5 = vld [vmem:[#allocation2 + $0x238] sm:$0xff]  ;;  %v1151_v7 = vld [vmem:[#allocation2 + $0x210] sm:$0xff]  ;;  %v1005_v10 = vld [vmem:[#allocation2 + $0x1e8] sm:$0xf] }
  0x60   : > { %766 = vmatpush.msra.mxu1 %v552_v35  ;;  %938 = vmatpush.msra.mxu2 %v841_v36  ;;  %v833_v6 = vld [vmem:[%s4376_s6 + $0x12] sm:$0xff]  ;;  %v1000_v11 = vld [vmem:[#allocation2 + $0x1c0] sm:$0xff]  ;;  %v1001_v12 = vld [vmem:[#allocation2 + $0x1c8] sm:$0xff] }
  0x61   : > { %964 = vmatpush.msra.mxu3 %v842_v37  ;;  %3522 = vmatmul.msk.f32.gmra.mxu0 %vm579_vm1, %v561_v17  ;;  %v1152_v8 = vld [vmem:[#allocation2 + $0x218] sm:$0xff]  ;;  %v996_v13 = vld [vmem:[#allocation2 + $0x1a0] sm:$0xff]  ;;  %v997_v14 = vld [vmem:[#allocation2 + $0x1a8] sm:$0xff] }
  0x62   : > { %3526 = vmatmul.msk.f32.gmra.mxu1 %vm579_vm1, %v561_v17  ;;  %3545 = vmatmul.msk.f32.gmra.mxu2 %vm579_vm1, %v4411_v38  ;;  %v988_v15 = vld [vmem:[%s4376_s6 + $0x3] sm:$0xff]  ;;  %v989_v18 = vld [vmem:[%s4376_s6 + $0xb] sm:$0xff]  ;;  %v990_v19 = vld [vmem:[%s4376_s6 + $0x13] sm:$0xff] }
  0x63   : > { %3549 = vmatmul.msk.f32.gmra.mxu3 %vm579_vm1, %v4411_v38  ;;  %939 = vmatpush.msra.mxu2 %v837_v39  ;;  %v993_v17 = vld [vmem:[#allocation2 + $0x188] sm:$0xff]  ;;  %v1161_v20 = vld [vmem:[#allocation2 + $0x260] sm:$0xf]  ;;  %v1147_v30 = vld [vmem:[%s4376_s6 + $0x14] sm:$0xff] }
  0x64   : > { %965 = vmatpush.msra.mxu3 %v838_v40  ;;  %741 = vmatpush.msra.mxu0 %v547_v41  ;;  %v1162_v21 = vld [vmem:[#allocation2 + $0x268] sm:$0xf]  ;;  %v1157_v22 = vld [vmem:[#allocation2 + $0x240] sm:$0xff]  ;;  %v1146_v29 = vld [vmem:[%s4376_s6 + $0xc] sm:$0xff] }
  0x65   : > { %767 = vmatpush.msra.mxu1 %v548_v42  ;;  %3575 = vmatpush.msk.msrb.mxu2 %vm589_vm0, %v1006_v43  ;;  %v1158_v23 = vld [vmem:[#allocation2 + $0x248] sm:$0xff]  ;;  %v1153_v24 = vld [vmem:[#allocation2 + $0x220] sm:$0xff] }
  0x66   : > { %3579 = vmatpush.msk.msrb.mxu3 %vm589_vm0, %v1007_v44  ;;  %742 = vmatpush.msra.mxu0 %v543_v45  ;;  %v1154_v25 = vld [vmem:[#allocation2 + $0x228] sm:$0xff] }
  0x67   : > { %768 = vmatpush.msra.mxu1 %v544_v46  ;;  %1094 = vmatpush.msrb.mxu2 %v1002_v47  ;;  %v1150_v28 = vld [vmem:[#allocation2 + $0x208] sm:$0xff] }
  0x68   : > { %1120 = vmatpush.msrb.mxu3 %v1003_v48 }
  0x69   : > { %3528 = vmatmul.msk.f32.vlgmr.msrb.gmra.mxu0 %vm579_vm1, %v4379_v16  ;;  %1095 = vmatpush.msrb.mxu2 %v998_v50 }
  0x6a   : > { %3532 = vmatmul.msk.f32.vlgmr.msrb.gmra.mxu1 %vm579_vm1, %v4379_v16  ;;  %3546 = vmatmul.msk.f32.gmra.mxu2 %vm579_vm1, %v4422_v49  ;;  %v992_v16 = vld [vmem:[#allocation2 + $0x180] sm:$0xff] }
  0x6b   : > { %3550 = vmatmul.msk.f32.gmra.mxu3 %vm579_vm1, %v4422_v49  ;;  %3551 = vmatpush.msk.msrb.mxu0 %vm589_vm0, %v847_v54 }
  0x6c   : > { %1121 = vmatpush.msrb.mxu3 %v999_v51  ;;  %3555 = vmatpush.msk.msrb.mxu1 %vm589_vm0, %v848_v55 }
  0x6d   : > { %1096 = vmatpush.msrb.mxu2 %v994_v52  ;;  %885 = vmatpush.msrb.mxu0 %v843_v56 }
  0x6e   : > { %1122 = vmatpush.msrb.mxu3 %v995_v53  ;;  %911 = vmatpush.msrb.mxu1 %v844_v57 }
  0x6f   : > { %886 = vmatpush.msrb.mxu0 %v839_v58 }
  0x70   : > { %912 = vmatpush.msrb.mxu1 %v840_v59 }
  0x71   : > { %3529 = vmatmul.msk.f32.gmra.mxu0 %vm579_vm1, %v4393_v26 }
  0x72   : > { %3533 = vmatmul.msk.f32.gmra.mxu1 %vm579_vm1, %v4393_v26  ;;  %3560 = vmatmul.msk.f32.vlgmr.msra.gmra.mxu2 %vm579_vm1, %v831_v60  ;;  %v1145_v26 = vld [vmem:[%s4376_s6 + $0x4] sm:$0xff] }
  0x73   : > { %3564 = vmatmul.msk.f32.vlgmr.msra.gmra.mxu3 %vm579_vm1, %v831_v60  ;;  %887 = vmatpush.msrb.mxu0 %v835_v61 }
  0x74   : > { %913 = vmatpush.msrb.mxu1 %v836_v62  ;;  %3591 = vmatpush.msk.msra.mxu2 %vm589_vm0, %v1163_v0 }
  0x75   : > { %3595 = vmatpush.msk.msra.mxu3 %vm589_vm0, %v1164_v1 }
  0x76   : > { %1251 = vmatpush.msra.mxu2 %v1159_v2 }
  0x77   : > { %1277 = vmatpush.msra.mxu3 %v1160_v3 }
  0x78   : > { %1252 = vmatpush.msra.mxu2 %v1155_v4 }
  0x79   : > { %3536 = vmatmul.msk.f32.vlgmr.msra.gmra.mxu0 %vm579_vm1, %v4396_v27  ;;  %1278 = vmatpush.msra.mxu3 %v1156_v5 }
  0x7a   : > { %3540 = vmatmul.msk.f32.vlgmr.msra.gmra.mxu1 %vm579_vm1, %v4396_v27  ;;  %3561 = vmatmul.msk.f32.gmra.mxu2 %vm579_vm1, %v832_v63  ;;  %v1149_v27 = vld [vmem:[#allocation2 + $0x200] sm:$0xff] }
  0x7b   : > { %3565 = vmatmul.msk.f32.gmra.mxu3 %vm579_vm1, %v832_v63  ;;  %1253 = vmatpush.msra.mxu2 %v1151_v7 }
  0x7c   : > { %1279 = vmatpush.msra.mxu3 %v1152_v8  ;;  %3567 = vmatpush.msk.msra.mxu0 %vm589_vm0, %v1004_v9 }
  0x7d   : > { %3571 = vmatpush.msk.msra.mxu1 %vm589_vm0, %v1005_v10 }
  0x7e   : > { %1042 = vmatpush.msra.mxu0 %v1000_v11 }
  0x7f   : > { %1068 = vmatpush.msra.mxu1 %v1001_v12 }
  0x80   : > { %1043 = vmatpush.msra.mxu0 %v996_v13 }
  0x81   : > { %3537 = vmatmul.msk.f32.gmra.mxu0 %vm579_vm1, %v4411_v38  ;;  %1069 = vmatpush.msra.mxu1 %v997_v14 }
  0x82   : > { %3541 = vmatmul.msk.f32.gmra.mxu1 %vm579_vm1, %v4411_v38  ;;  %3562 = vmatmul.msk.f32.gmra.mxu2 %vm579_vm1, %v833_v6 }
  0x83   : > { %3566 = vmatmul.msk.f32.gmra.mxu3 %vm579_vm1, %v833_v6  ;;  %1044 = vmatpush.msra.mxu0 %v992_v16 }
  0x84   : > { %1070 = vmatpush.msra.mxu1 %v993_v17 }
  0x89   : > { %3538 = vmatmul.msk.f32.gmra.mxu0 %vm579_vm1, %v4422_v49 }
  0x8a   : > { %3542 = vmatmul.msk.f32.gmra.mxu1 %vm579_vm1, %v4422_v49  ;;  %3576 = vmatmul.msk.f32.vlgmr.msrb.gmra.mxu2 %vm579_vm1, %v988_v15 }
  0x8b   : > { %3580 = vmatmul.msk.f32.vlgmr.msrb.gmra.mxu3 %vm579_vm1, %v988_v15 }
  0x91   : > { %3552 = vmatmul.msk.f32.vlgmr.msrb.gmra.mxu0 %vm579_vm1, %v831_v60 }
  0x92   : > { %3556 = vmatmul.msk.f32.vlgmr.msrb.gmra.mxu1 %vm579_vm1, %v831_v60  ;;  %3577 = vmatmul.msk.f32.gmra.mxu2 %vm579_vm1, %v989_v18 }
  0x93   : > { %3581 = vmatmul.msk.f32.gmra.mxu3 %vm579_vm1, %v989_v18  ;;  %3583 = vmatpush.msk.msrb.mxu0 %vm589_vm0, %v1161_v20 }
  0x94   : > { %3587 = vmatpush.msk.msrb.mxu1 %vm589_vm0, %v1162_v21 }
  0x95   : > { %1199 = vmatpush.msrb.mxu0 %v1157_v22 }
  0x96   : > { %1225 = vmatpush.msrb.mxu1 %v1158_v23 }
  0x97   : > { %1200 = vmatpush.msrb.mxu0 %v1153_v24 }
  0x98   : > { %1226 = vmatpush.msrb.mxu1 %v1154_v25 }
  0x99   : > { %3553 = vmatmul.msk.f32.gmra.mxu0 %vm579_vm1, %v832_v63 }
  0x9a   : > { %3557 = vmatmul.msk.f32.gmra.mxu1 %vm579_vm1, %v832_v63  ;;  %3578 = vmatmul.msk.f32.gmra.mxu2 %vm579_vm1, %v990_v19 }
  0x9b   : > { %3582 = vmatmul.msk.f32.gmra.mxu3 %vm579_vm1, %v990_v19  ;;  %1201 = vmatpush.msrb.mxu0 %v1149_v27 }
  0x9c   : > { %1227 = vmatpush.msrb.mxu1 %v1150_v28 }
  0xa1   : > { %3554 = vmatmul.msk.f32.gmra.mxu0 %vm579_vm1, %v833_v6 }
  0xa2   : > { %3558 = vmatmul.msk.f32.gmra.mxu1 %vm579_vm1, %v833_v6  ;;  %3592 = vmatmul.msk.f32.vlgmr.msra.gmra.mxu2 %vm579_vm1, %v1145_v26 }
  0xa3   : > { %3596 = vmatmul.msk.f32.vlgmr.msra.gmra.mxu3 %vm579_vm1, %v1145_v26 }
  0xa9   : > { %3568 = vmatmul.msk.f32.vlgmr.msra.gmra.mxu0 %vm579_vm1, %v988_v15 }
  0xaa   : > { %3572 = vmatmul.msk.f32.vlgmr.msra.gmra.mxu1 %vm579_vm1, %v988_v15  ;;  %3593 = vmatmul.msk.f32.gmra.mxu2 %vm579_vm1, %v1146_v29 }
  0xab   : > { %3597 = vmatmul.msk.f32.gmra.mxu3 %vm579_vm1, %v1146_v29 }
  0xb1   : > { %3569 = vmatmul.msk.f32.gmra.mxu0 %vm579_vm1, %v989_v18 }
  0xb2   : > { %3573 = vmatmul.msk.f32.gmra.mxu1 %vm579_vm1, %v989_v18  ;;  %3594 = vmatmul.msk.f32.gmra.mxu2 %vm579_vm1, %v1147_v30 }
  0xb3   : > { %3598 = vmatmul.msk.f32.gmra.mxu3 %vm579_vm1, %v1147_v30 }
  0xb9   : > { %3570 = vmatmul.msk.f32.gmra.mxu0 %vm579_vm1, %v990_v19 }
  0xba   : > { %3574 = vmatmul.msk.f32.gmra.mxu1 %vm579_vm1, %v990_v19 }
  0xc1   : > { %3584 = vmatmul.msk.f32.vlgmr.msrb.gmra.mxu0 %vm579_vm1, %v1145_v26 }
  0xc2   : > { %3588 = vmatmul.msk.f32.vlgmr.msrb.gmra.mxu1 %vm579_vm1, %v1145_v26 }
  0xc9   : > { %3585 = vmatmul.msk.f32.gmra.mxu0 %vm579_vm1, %v1146_v29 }
  0xca   : > { %3589 = vmatmul.msk.f32.gmra.mxu1 %vm579_vm1, %v1146_v29 }
  0xcd   : > { %v619_v31 = vpop.f32.mrf.mxu0 }
  0xce   : > { %v645_v32 = vpop.f32.mrf.mxu1 }
  0xd1   : > { %3586 = vmatmul.msk.f32.gmra.mxu0 %vm579_vm1, %v1147_v30 }
  0xd2   : > { %3590 = vmatmul.msk.f32.gmra.mxu1 %vm579_vm1, %v1147_v30 }
  0xd4   : > { %v677_v33 = vpop.f32.mrf.mxu2 }
  0xd5   : > { %v703_v34 = vpop.f32.mrf.mxu3 }
  0xd6   : > { %v622_v35 = vpop.f32.mrf.mxu0 }
  0xd7   : > { %v648_v36 = vpop.f32.mrf.mxu1 }
  0xdd   : > { %v796_v37 = vpop.f32.mrf.mxu2 }
  0xde   : > { %v822_v38 = vpop.f32.mrf.mxu3  ;;  %v4501_v39 = vpop.f32.mrf.mxu0 }
  0xdf   : > { %v4503_v40 = vpop.f32.mrf.mxu1 }
  0xe0   : > { %4758 = vst [vmem:[#allocation31_spill] sm:$0xff] %v4503_v40 }
  0xe5   : > { %v799_v43 = vpop.f32.mrf.mxu2 }
  0xe6   : > { %v671_v41 = vpop.f32.mrf.mxu0  ;;  %v825_v44 = vpop.f32.mrf.mxu3 }
  0xe7   : > { %v697_v42 = vpop.f32.mrf.mxu1  ;;  %v797_v19 = vadd.f32 %v796_v37, %v671_v41 }
  0xe8   : > { %v823_v20 = vadd.f32 %v822_v38, %v697_v42 }
  0xed   : > { %v802_v47 = vpop.f32.mrf.mxu2 }
  0xee   : > { %v674_v45 = vpop.f32.mrf.mxu0  ;;  %v828_v48 = vpop.f32.mrf.mxu3  ;;  %v803_v21 = vadd.f32 %v802_v47, %v677_v33 }
  0xef   : > { %v700_v46 = vpop.f32.mrf.mxu1  ;;  %v800_v25 = vadd.f32 %v799_v43, %v674_v45  ;;  %v829_v30 = vadd.f32 %v828_v48, %v703_v34 }
  0xf0   : > { %v826_v26 = vadd.f32 %v825_v44, %v700_v46 }
  0xf5   : > { %v941_v51 = vpop.f32.mrf.mxu2 }
  0xf6   : > { %v744_v49 = vpop.f32.mrf.mxu0  ;;  %v967_v52 = vpop.f32.mrf.mxu3 }
  0xf7   : > { %v770_v50 = vpop.f32.mrf.mxu1  ;;  %v745_v27 = vadd.f32 %v744_v49, %v619_v31 }
  0xf8   : > { %v771_v28 = vadd.f32 %v770_v50, %v645_v32  ;;  %v1605_v50 = vld [vmem:[#allocation8 + $0x5e0] sm:$0xff] }
  0xf9   : > { %1687 = vmatpush.msrb.mxu2 %v1605_v50 }
  0xfd   : > { %v944_v55 = vpop.f32.mrf.mxu2 }
  0xfe   : > { %v747_v53 = vpop.f32.mrf.mxu0  ;;  %v970_v56 = vpop.f32.mrf.mxu3 }
  0xff   : > { %v773_v54 = vpop.f32.mrf.mxu1  ;;  %v748_v22 = vadd.f32 %v747_v53, %v622_v35 }
 0x100   : > { %v774_v23 = vadd.f32 %v773_v54, %v648_v36 }
 0x105   : > { %v947_v61 = vpop.f32.mrf.mxu2 }
 0x106   : > { %v4505_v57 = vpop.f32.mrf.mxu0  ;;  %v973_v62 = vpop.f32.mrf.mxu3  ;;  %v986_v37 = vadd.f32 %v947_v61, %v803_v21 }
 0x107   : > { %4759 = vst [vmem:[#allocation32_spill] sm:$0xff] %v4505_v57  ;;  %v4507_v58 = vpop.f32.mrf.mxu1  ;;  %v979_v57 = vadd.f32 %v967_v52, %v823_v20  ;;  %v987_v52 = vadd.f32 %v973_v62, %v829_v30 }
 0x108   : > { %4760 = vst [vmem:[#allocation33_spill] sm:$0xff] %v4507_v58 }
 0x10d   : > { %v1098_v1 = vpop.f32.mrf.mxu2 }
 0x10e   : > { %v889_v59 = vpop.f32.mrf.mxu0  ;;  %v1124_v2 = vpop.f32.mrf.mxu3  ;;  %v4766_v53 = vld [vmem:[#allocation32_spill] sm:$0xff] }
 0x10f   : > { %v915_v60 = vpop.f32.mrf.mxu1  ;;  %v976_v58 = vadd.f32 %v889_v59, %v745_v27  ;;  %v1136_v44 = vadd.f32 %v1124_v2, %v979_v57  ;;  %v751_v54 = vadd.f32 %v4766_v53, %v4501_v39  ;;  %v1601_v59 = vld [vmem:[#allocation8 + $0x5c0] sm:$0xff] }
 0x110   : > { %v977_v40 = vadd.f32 %v915_v60, %v771_v28  ;;  %v1665_v57 = vld [vmem:[#allocation8 + $0x7c0] sm:$0xff]  ;;  %1688 = vmatpush.msrb.mxu2 %v1601_v59 }
 0x111   : > { %v1661_v39 = vld [vmem:[#allocation8 + $0x7a0] sm:$0xff] }
 0x115   : > { %v1101_v5 = vpop.f32.mrf.mxu2 }
 0x116   : > { %v892_v63 = vpop.f32.mrf.mxu0  ;;  %v1127_v6 = vpop.f32.mrf.mxu3 }
 0x117   : > { %v918_v0 = vpop.f32.mrf.mxu1 }
 0x11d   : > { %v1104_v9 = vpop.f32.mrf.mxu2 }
 0x11e   : > { %v4509_v3 = vpop.f32.mrf.mxu0  ;;  %v4513_v10 = vpop.f32.mrf.mxu3  ;;  %v1143_v2 = vadd.f32 %v1104_v9, %v986_v37 }
 0x11f   : > { %4761 = vst [vmem:[#allocation34_spill] sm:$0xff] %v4509_v3  ;;  %v4511_v4 = vpop.f32.mrf.mxu1  ;;  %v983_v3 = vadd.f32 %v970_v56, %v826_v26  ;;  %v4768_v56 = vld [vmem:[#allocation33_spill] sm:$0xff] }
 0x120   : > { %4762 = vst [vmem:[#allocation35_spill] sm:$0xff] %v4511_v4  ;;  %v981_v4 = vadd.f32 %v918_v0, %v774_v23 }
 0x121   : > { %4763 = vst [vmem:[#allocation36_spill] sm:$0xff] %v4513_v10  ;;  %v978_v10 = vadd.f32 %v941_v51, %v797_v19  ;;  %v1140_v36 = vadd.f32 %v1127_v6, %v983_v3  ;;  %v1669_v51 = vld [vmem:[#allocation8 + $0x7e0] sm:$0xff] }
 0x122   : > { %1710 = vmatpush.msrb.mxu3 %v1669_v51 }
 0x123   : > { %v1135_v32 = vadd.f32 %v1098_v1, %v978_v10  ;;  %v1597_v1 = vld [vmem:[#allocation8 + $0x5a0] sm:$0xff] }
 0x124   : > { %1711 = vmatpush.msrb.mxu3 %v1665_v57  ;;  %1689 = vmatpush.msrb.mxu2 %v1597_v1 }
 0x125   : > { %v1255_v15 = vpop.f32.mrf.mxu2 }
 0x126   : > { %v1046_v7 = vpop.f32.mrf.mxu0  ;;  %v1281_v16 = vpop.f32.mrf.mxu3  ;;  %v1292_v60 = vadd.f32 %v1255_v15, %v1135_v32  ;;  %v4769_v3 = vld [vmem:[#allocation34_spill] sm:$0xff]  ;;  %1712 = vmatpush.msrb.mxu3 %v1661_v39  ;;  %v1355_v39 = vld [vmem:[#allocation7] sm:$0xff] }
 0x127   : > { %v1072_v8 = vpop.f32.mrf.mxu1  ;;  %v1133_v41 = vadd.f32 %v1046_v7, %v976_v58  ;;  %v1293_v61 = vadd.f32 %v1281_v16, %v1136_v44  ;;  %v4770_v62 = vld [vmem:[#allocation35_spill] sm:$0xff]  ;;  %v1645_v44 = vld [vmem:[#allocation8 + $0x720] sm:$0xff] }
 0x128   : > { %v1134_v42 = vadd.f32 %v1072_v8, %v977_v40  ;;  %v1308_v40 = vld [vmem:[#allocation5] sm:$0x3]  ;;  %v4771_v15 = vld [vmem:[#allocation36_spill] sm:$0xff] }
 0x129   : > { %v1310_v10 = vperm.slane %v1308_v40, 0  ;;  %v1144_v16 = vadd.f32 %v4771_v15, %v987_v52  ;;  %v1573_v52 = vld [vmem:[#allocation8 + $0x4e0] sm:$0xff] }
 0x12a   : > { %v1621_v15 = vld [vmem:[#allocation8 + $0x660] sm:$0xff] }
 0x12d   : > { %v1258_v24 = vpop.f32.mrf.mxu2 }
 0x12e   : > { %v1049_v11 = vpop.f32.mrf.mxu0  ;;  %v1284_v29 = vpop.f32.mrf.mxu3 }
 0x12f   : > { %v1075_v12 = vpop.f32.mrf.mxu1  ;;  %v1297_v47 = vadd.f32 %v1284_v29, %v1140_v36  ;;  %v1653_v29 = vld [vmem:[#allocation8 + $0x760] sm:$0xff] }
 0x130   : > { %v1138_v33 = vadd.f32 %v1075_v12, %v981_v4  ;;  %v984_v4 = vadd.f32 %v4769_v3, %v751_v54  ;;  %v1311_v12 = vperm.slane %v1308_v40, 1  ;;  %v1649_v36 = vld [vmem:[#allocation8 + $0x740] sm:$0xff] }
 0x135   : > { %v1261_v6 = vpop.f32.mrf.mxu2 }
 0x136   : > { %v4515_v13 = vpop.f32.mrf.mxu0  ;;  %v1287_v7 = vpop.f32.mrf.mxu3  ;;  %v1300_v20 = vadd.f32 %v1261_v6, %v1143_v2 }
 0x137   : > { %4764 = vst [vmem:[#allocation37_spill] sm:$0xff] %v4515_v13  ;;  %v4517_v14 = vpop.f32.mrf.mxu1  ;;  %v980_v13 = vadd.f32 %v892_v63, %v748_v22  ;;  %v1301_v26 = vadd.f32 %v1287_v7, %v1144_v16  ;;  %v1606_v7 = vld [vmem:[#allocation8 + $0x5e8] sm:$0xff] }
 0x138   : > { %4765 = vst [vmem:[#allocation38_spill] sm:$0xff] %v4517_v14  ;;  %v982_v14 = vadd.f32 %v944_v55, %v800_v25  ;;  %v4767_v55 = vld [vmem:[#allocation31_spill] sm:$0xff]  ;;  %v1589_v25 = vld [vmem:[#allocation8 + $0x560] sm:$0xff]  ;;  %v1598_v16 = vld [vmem:[#allocation8 + $0x5a8] sm:$0xff] }
 0x139   : > { %v1137_v38 = vadd.f32 %v1049_v11, %v980_v13  ;;  %v777_v58 = vadd.f32 %v4768_v56, %v4767_v55  ;;  %v1593_v13 = vld [vmem:[#allocation8 + $0x580] sm:$0xff] }
 0x13a   : > { %v1139_v35 = vadd.f32 %v1101_v5, %v982_v14  ;;  %v1657_v14 = vld [vmem:[#allocation8 + $0x780] sm:$0xff]  ;;  %1690 = vmatpush.msrb.mxu2 %v1593_v13  ;;  %v1666_v13 = vld [vmem:[#allocation8 + $0x7c8] sm:$0xff] }
 0x13b   : > { %v985_v5 = vadd.f32 %v4770_v62, %v777_v58  ;;  %1713 = vmatpush.msrb.mxu3 %v1657_v14  ;;  %v1637_v55 = vld [vmem:[#allocation8 + $0x6e0] sm:$0xff] }
 0x13c   : > { %v1296_v46 = vadd.f32 %v1258_v24, %v1139_v35  ;;  %1691 = vmatpush.msrb.mxu2 %v1589_v25  ;;  %v1629_v62 = vld [vmem:[#allocation8 + $0x6a0] sm:$0xff] }
 0x13d   : > { %1714 = vmatpush.msrb.mxu3 %v1653_v29  ;;  %v1557_v14 = vld [vmem:[#allocation8 + $0x460] sm:$0xff] }
 0x13e   : > { %v1203_v17 = vpop.f32.mrf.mxu0  ;;  %v1613_v25 = vld [vmem:[#allocation8 + $0x620] sm:$0xff] }
 0x13f   : > { %v1229_v18 = vpop.f32.mrf.mxu1  ;;  %v1290_v48 = vadd.f32 %v1203_v17, %v1133_v41  ;;  %v4772_v17 = vld [vmem:[#allocation37_spill] sm:$0xff]  ;;  %v4773_v9 = vld [vmem:[#allocation38_spill] sm:$0xff]  ;;  %1715 = vmatpush.msrb.mxu3 %v1649_v36 }
 0x140   : > { %v1291_v49 = vadd.f32 %v1229_v18, %v1134_v42  ;;  %v1141_v18 = vadd.f32 %v4772_v17, %v984_v4  ;;  %v1142_v19 = vadd.f32 %v4773_v9, %v985_v5  ;;  %v1565_v4 = vld [vmem:[#allocation8 + $0x4a0] sm:$0xff]  ;;  %v1662_v17 = vld [vmem:[#allocation8 + $0x7a8] sm:$0xff] }
 0x141   : > { %v1302_v8 = vmax.f32 %v1290_v48, %v1292_v60  ;;  %1716 = vmatpush.msrb.mxu3 %v1645_v44  ;;  %v1617_v9 = vld [vmem:[#allocation8 + $0x640] sm:$0xff]  ;;  %v1642_v36 = vld [vmem:[#allocation8 + $0x708] sm:$0xff]  ;;  %v1663_v44 = vld [vmem:[#allocation8 + $0x7b0] sm:$0xff] }
 0x142   : > { %v1303_v11 = vmax.f32 %v1291_v49, %v1293_v61  ;;  %v1641_v49 = vld [vmem:[#allocation8 + $0x700] sm:$0xff] }
 0x143   : > { %v1314_v30 = vadd.f32 %v1310_v10, %v1302_v8  ;;  %1717 = vmatpush.msrb.mxu3 %v1641_v49  ;;  %v1569_v61 = vld [vmem:[#allocation8 + $0x4c0] sm:$0xff]  ;;  %v1670_v8 = vld [vmem:[#allocation8 + $0x7e8] sm:$0xff] }
 0x144   : > { %v1315_v37 = vadd.f32 %v1311_v12, %v1303_v11  ;;  %v1625_v11 = vld [vmem:[#allocation8 + $0x680] sm:$0xff]  ;;  %v1630_v49 = vld [vmem:[#allocation8 + $0x6a8] sm:$0xff] }
 0x145   : > { %1718 = vmatpush.msrb.mxu3 %v1637_v55  ;;  %v1609_v29 = vld [vmem:[#allocation8 + $0x600] sm:$0xff]  ;;  %v1651_v55 = vld [vmem:[#allocation8 + $0x750] sm:$0xff] }
 0x146   : > { %v1206_v43 = vpop.f32.mrf.mxu0 }
 0x147   : > { %v1232_v31 = vpop.f32.mrf.mxu1  ;;  %v1294_v34 = vadd.f32 %v1206_v43, %v1137_v38  ;;  %v1585_v38 = vld [vmem:[#allocation8 + $0x540] sm:$0xff] }
 0x148   : > { %v1295_v45 = vadd.f32 %v1232_v31, %v1138_v33  ;;  %v1581_v43 = vld [vmem:[#allocation8 + $0x520] sm:$0xff]  ;;  %1692 = vmatpush.msrb.mxu2 %v1585_v38  ;;  %v1607_v38 = vld [vmem:[#allocation8 + $0x5f0] sm:$0xff] }
 0x149   : > { %v1304_v63 = vmax.f32 %v1294_v34, %v1296_v46  ;;  %v1320_v34 = vmax.f32 %v1314_v30, 0.0  ;;  %v1577_v46 = vld [vmem:[#allocation8 + $0x500] sm:$0xff]  ;;  %v1582_v30 = vld [vmem:[#allocation8 + $0x528] sm:$0xff] }
 0x14a   : > { %v1305_v0 = vmax.f32 %v1295_v45, %v1297_v47  ;;  %v1321_v45 = vmax.f32 %v1315_v37, 0.0  ;;  %1693 = vmatpush.msrb.mxu2 %v1581_v43  ;;  %v1646_v37 = vld [vmem:[#allocation8 + $0x728] sm:$0xff] }
 0x14b   : > { %v1316_v21 = vadd.f32 %v1310_v10, %v1304_v63  ;;  %v1333_v56 = vrot.slane %v1320_v34, 1  ;;  %v1633_v63 = vld [vmem:[#allocation8 + $0x6c0] sm:$0xff]  ;;  %v1574_v43 = vld [vmem:[#allocation8 + $0x4e8] sm:$0xff] }
 0x14c   : > { %v1317_v22 = vadd.f32 %v1311_v12, %v1305_v0  ;;  %1694 = vmatpush.msrb.mxu2 %v1577_v46  ;;  %v1336_v58 = vrot.slane %v1321_v45, 1  ;;  %1719 = vmatpush.msrb.mxu3 %v1633_v63  ;;  %v1595_v46 = vld [vmem:[#allocation8 + $0x590] sm:$0xff] }
 0x14d   : > { %v1322_v41 = vmax.f32 %v1316_v21, 0.0  ;;  %v1356_v21 = vld [vmem:[#allocation7 + $0x8] sm:$0xf]  ;;  %v1643_v63 = vld [vmem:[#allocation8 + $0x710] sm:$0xff] }
 0x14e   : > { %v1209_v23 = vpop.f32.mrf.mxu0  ;;  %v1323_v42 = vmax.f32 %v1317_v22, 0.0  ;;  %1695 = vmatpush.msrb.mxu2 %v1573_v52  ;;  %1720 = vmatpush.msrb.mxu3 %v1629_v62  ;;  %v1590_v22 = vld [vmem:[#allocation8 + $0x568] sm:$0xff] }
 0x14f   : > { %v1235_v24 = vpop.f32.mrf.mxu1  ;;  %v1298_v27 = vadd.f32 %v1209_v23, %v1141_v18  ;;  %v1334_v50 = vrot.slane %v1322_v41, 1  ;;  %v1553_v18 = vld [vmem:[#allocation8 + $0x440] sm:$0xff]  ;;  %v1654_v23 = vld [vmem:[#allocation8 + $0x768] sm:$0xff] }
 0x150   : > { %v1299_v28 = vadd.f32 %v1235_v24, %v1142_v19  ;;  %v1337_v51 = vrot.slane %v1323_v42, 1  ;;  %1696 = vmatpush.msrb.mxu2 %v1569_v61  ;;  %1721 = vmatpush.msrb.mxu3 %v1625_v11  ;;  %v1594_v19 = vld [vmem:[#allocation8 + $0x588] sm:$0xff]  ;;  %v1549_v24 = vld [vmem:[#allocation8 + $0x420] sm:$0xff]  ;;  %v1579_v61 = vld [vmem:[#allocation8 + $0x510] sm:$0xff] }
 0x151   : > { %v1306_v33 = vmax.f32 %v1298_v27, %v1300_v20  ;;  %v1335_v2 = vsel %vm1332_vm2, %v1333_v56, %v1334_v50  ;;  %v1658_v20 = vld [vmem:[#allocation8 + $0x788] sm:$0xff]  ;;  %v1600_v11 = vld [vmem:[#allocation8 + $0x5b8] sm:$0xff] }
 0x152   : > { %v1307_v35 = vmax.f32 %v1299_v28, %v1301_v26  ;;  %v1338_v3 = vsel %vm1332_vm2, %v1336_v58, %v1337_v51  ;;  %v1349_v5 = vmax.f32 %v1320_v34, %v1335_v2  ;;  %1697 = vmatpush.msrb.mxu2 %v1565_v4  ;;  %1722 = vmatpush.msrb.mxu3 %v1621_v15  ;;  %v1586_v26 = vld [vmem:[#allocation8 + $0x548] sm:$0xff]  ;;  %v1545_v28 = vld [vmem:[#allocation8 + $0x400] sm:$0xff]  ;;  %v1575_v2 = vld [vmem:[#allocation8 + $0x4f0] sm:$0xff] }
 0x153   : > { %v1318_v31 = vadd.f32 %v1310_v10, %v1306_v33  ;;  %v1350_v6 = vmax.f32 %v1321_v45, %v1338_v3  ;;  %v1561_v10 = vld [vmem:[#allocation8 + $0x480] sm:$0xff]  ;;  %v1650_v27 = vld [vmem:[#allocation8 + $0x748] sm:$0xff]  ;;  %v1671_v33 = vld [vmem:[#allocation8 + $0x7f0] sm:$0xff] }
 0x154   : > { %v1319_v32 = vadd.f32 %v1311_v12, %v1307_v35  ;;  %v1602_v12 = vld [vmem:[#allocation8 + $0x5c8] sm:$0xff]  ;;  %1698 = vmatpush.msrb.mxu2 %v1561_v10  ;;  %1723 = vmatpush.msrb.mxu3 %v1617_v9  ;;  %v1639_v3 = vld [vmem:[#allocation8 + $0x6f0] sm:$0xff]  ;;  %v1668_v10 = vld [vmem:[#allocation8 + $0x7d8] sm:$0xff] }
 0x155   : > { %v1324_v47 = vmax.f32 %v1318_v31, 0.0  ;;  %v1578_v35 = vld [vmem:[#allocation8 + $0x508] sm:$0xff]  ;;  %v1592_v15 = vld [vmem:[#allocation8 + $0x578] sm:$0xff] }
 0x156   : > { %v1325_v48 = vmax.f32 %v1319_v32, 0.0  ;;  %1699 = vmatpush.msrb.mxu2 %v1557_v14  ;;  %1724 = vmatpush.msrb.mxu3 %v1613_v25  ;;  %v1638_v31 = vld [vmem:[#allocation8 + $0x6e8] sm:$0xff]  ;;  %v1599_v32 = vld [vmem:[#allocation8 + $0x5b0] sm:$0xff]  ;;  %v1660_v14 = vld [vmem:[#allocation8 + $0x798] sm:$0xff] }
 0x157   : > { %v1339_v53 = vrot.slane %v1324_v47, 1  ;;  %v1570_v34 = vld [vmem:[#allocation8 + $0x4c8] sm:$0xff]  ;;  %v1584_v9 = vld [vmem:[#allocation8 + $0x538] sm:$0xff] }
 0x158   : > { %v1341_v54 = vrot.slane %v1325_v48, 1  ;;  %1700 = vmatpush.msrb.mxu2 %v1553_v18  ;;  %1725 = vmatpush.msrb.mxu3 %v1609_v29  ;;  %v1634_v45 = vld [vmem:[#allocation8 + $0x6c8] sm:$0xff]  ;;  %v1652_v18 = vld [vmem:[#allocation8 + $0x758] sm:$0xff] }
 0x159   : > { %v1353_v40 = vmax.f32 %v1324_v47, %v1339_v53  ;;  %v1340_v57 = vsel %vm1332_vm2, %v1334_v50, %v1339_v53  ;;  %v1659_v47 = vld [vmem:[#allocation8 + $0x790] sm:$0xff]  ;;  %v1562_v52 = vld [vmem:[#allocation8 + $0x488] sm:$0xff]  ;;  %v1636_v25 = vld [vmem:[#allocation8 + $0x6d8] sm:$0xff] }
 0x15a   : > { %v1354_v59 = vmax.f32 %v1325_v48, %v1341_v54  ;;  %v1342_v60 = vsel %vm1332_vm2, %v1337_v51, %v1341_v54  ;;  %v1351_v0 = vmax.f32 %v1322_v41, %v1340_v57  ;;  %1701 = vmatpush.msrb.mxu2 %v1549_v24  ;;  %v1603_v41 = vld [vmem:[#allocation8 + $0x5d0] sm:$0xff]  ;;  %1802 = vmatpush.msra.mxu3 %v1671_v33  ;;  %v1566_v48 = vld [vmem:[#allocation8 + $0x4a8] sm:$0xff]  ;;  %v1572_v24 = vld [vmem:[#allocation8 + $0x4d8] sm:$0xff] }
 0x15b   : > { %v1352_v1 = vmax.f32 %v1323_v42, %v1342_v60  ;;  %3599 = vmatpush.msk.msra.mxu0 %vm1332_vm2, %v1353_v40  ;;  %v1667_v42 = vld [vmem:[#allocation8 + $0x7d0] sm:$0xff]  ;;  %v1626_v53 = vld [vmem:[#allocation8 + $0x688] sm:$0xff]  ;;  %v1632_v29 = vld [vmem:[#allocation8 + $0x6b8] sm:$0xff] }
 0x15c   : > { %3602 = vmatpush.msk.msra.mxu1 %vm1332_vm2, %v1354_v59  ;;  %1702 = vmatpush.msrb.mxu2 %v1545_v28  ;;  %v1591_v50 = vld [vmem:[#allocation8 + $0x570] sm:$0xff]  ;;  %v1558_v56 = vld [vmem:[#allocation8 + $0x468] sm:$0xff]  ;;  %v1568_v28 = vld [vmem:[#allocation8 + $0x4b8] sm:$0xff] }
 0x15d   : > { %1384 = vmatpush.msra.mxu0 %v1351_v0  ;;  %1803 = vmatpush.msra.mxu3 %v1667_v42  ;;  %v1655_v51 = vld [vmem:[#allocation8 + $0x770] sm:$0xff]  ;;  %v1622_v58 = vld [vmem:[#allocation8 + $0x668] sm:$0xff]  ;;  %v1628_v33 = vld [vmem:[#allocation8 + $0x698] sm:$0xff] }
 0x15e   : > { %1407 = vmatpush.msra.mxu1 %v1352_v1  ;;  %1779 = vmatpush.msra.mxu2 %v1607_v38  ;;  %v1587_v54 = vld [vmem:[#allocation8 + $0x550] sm:$0xff]  ;;  %v1554_v57 = vld [vmem:[#allocation8 + $0x448] sm:$0xff]  ;;  %v1564_v38 = vld [vmem:[#allocation8 + $0x498] sm:$0xff] }
 0x15f   : > { %1385 = vmatpush.msra.mxu0 %v1349_v5  ;;  %1804 = vmatpush.msra.mxu3 %v1663_v44  ;;  %v1583_v40 = vld [vmem:[#allocation8 + $0x530] sm:$0xff]  ;;  %v1618_v60 = vld [vmem:[#allocation8 + $0x648] sm:$0xff]  ;;  %v1608_v5 = vld [vmem:[#allocation8 + $0x5f8] sm:$0xff] }
 0x160   : > { %1408 = vmatpush.msra.mxu1 %v1350_v6  ;;  %3600 = vmatmul.msk.f32.vlgmr.msra.gmra.mxu0 %vm1357_vm3, %v1355_v39  ;;  %v1647_v59 = vld [vmem:[#allocation8 + $0x730] sm:$0xff]  ;;  %v1550_v0 = vld [vmem:[#allocation8 + $0x428] sm:$0xff]  ;;  %v1672_v6 = vld [vmem:[#allocation8 + $0x7f8] sm:$0xff] }
 0x161   : > { %3603 = vmatmul.msk.f32.vlgmr.msra.gmra.mxu1 %vm1357_vm3, %v1355_v39  ;;  %1733 = vmatpush.msrb.mxu0 %v1606_v7  ;;  %v1614_v1 = vld [vmem:[#allocation8 + $0x628] sm:$0xff]  ;;  %v1571_v39 = vld [vmem:[#allocation8 + $0x4d0] sm:$0xff]  ;;  %v1624_v42 = vld [vmem:[#allocation8 + $0x678] sm:$0xff] }
 0x162   : > { %1756 = vmatpush.msrb.mxu1 %v1670_v8  ;;  %1780 = vmatpush.msra.mxu2 %v1603_v41  ;;  %v1546_v4 = vld [vmem:[#allocation8 + $0x408] sm:$0xff]  ;;  %v1635_v7 = vld [vmem:[#allocation8 + $0x6d0] sm:$0xff]  ;;  %v1604_v8 = vld [vmem:[#allocation8 + $0x5d8] sm:$0xff] }
 0x163   : > { %1734 = vmatpush.msrb.mxu0 %v1602_v12  ;;  %1805 = vmatpush.msra.mxu3 %v1659_v47  ;;  %v1610_v62 = vld [vmem:[#allocation8 + $0x608] sm:$0xff]  ;;  %v1664_v12 = vld [vmem:[#allocation8 + $0x7b8] sm:$0xff] }
 0x164   : > { %1757 = vmatpush.msrb.mxu1 %v1666_v13  ;;  %1781 = vmatpush.msra.mxu2 %v1599_v32  ;;  %v1596_v13 = vld [vmem:[#allocation8 + $0x598] sm:$0xff] }
 0x165   : > { %1735 = vmatpush.msrb.mxu0 %v1598_v16  ;;  %1806 = vmatpush.msra.mxu3 %v1655_v51  ;;  %v1656_v16 = vld [vmem:[#allocation8 + $0x778] sm:$0xff] }
 0x166   : > { %1758 = vmatpush.msrb.mxu1 %v1662_v17  ;;  %1782 = vmatpush.msra.mxu2 %v1595_v46  ;;  %v1588_v17 = vld [vmem:[#allocation8 + $0x558] sm:$0xff] }
 0x167   : > { %1736 = vmatpush.msrb.mxu0 %v1594_v19  ;;  %1807 = vmatpush.msra.mxu3 %v1651_v55  ;;  %v1648_v19 = vld [vmem:[#allocation8 + $0x738] sm:$0xff] }
 0x168   : > { %1759 = vmatpush.msrb.mxu1 %v1658_v20  ;;  %3601 = vmatmul.msk.f32.gmra.mxu0 %vm1357_vm3, %v1356_v21  ;;  %v1580_v20 = vld [vmem:[#allocation8 + $0x518] sm:$0xff] }
 0x169   : > { %3604 = vmatmul.msk.f32.gmra.mxu1 %vm1357_vm3, %v1356_v21  ;;  %1737 = vmatpush.msrb.mxu0 %v1590_v22  ;;  %v1644_v21 = vld [vmem:[#allocation8 + $0x718] sm:$0xff] }
 0x16a   : > { %1760 = vmatpush.msrb.mxu1 %v1654_v23  ;;  %1783 = vmatpush.msra.mxu2 %v1591_v50  ;;  %v1576_v22 = vld [vmem:[#allocation8 + $0x4f8] sm:$0xff] }
 0x16b   : > { %1738 = vmatpush.msrb.mxu0 %v1586_v26  ;;  %1808 = vmatpush.msra.mxu3 %v1647_v59  ;;  %v1640_v23 = vld [vmem:[#allocation8 + $0x6f8] sm:$0xff]  ;;  %v1567_v26 = vld [vmem:[#allocation8 + $0x4b0] sm:$0xff] }
 0x16c   : > { %1761 = vmatpush.msrb.mxu1 %v1650_v27  ;;  %1784 = vmatpush.msra.mxu2 %v1587_v54  ;;  %v1631_v27 = vld [vmem:[#allocation8 + $0x6b0] sm:$0xff]  ;;  %v1560_v41 = vld [vmem:[#allocation8 + $0x478] sm:$0xff] }
 0x16d   : > { %1739 = vmatpush.msrb.mxu0 %v1582_v30  ;;  %1809 = vmatpush.msra.mxu3 %v1643_v63  ;;  %v1563_v30 = vld [vmem:[#allocation8 + $0x490] sm:$0xff]  ;;  %v1556_v32 = vld [vmem:[#allocation8 + $0x458] sm:$0xff]  ;;  %v1540_v63 = vld [vmem:[#allocation8 + $0x3e0] sm:$0xff] }
 0x16e   : > { %1762 = vmatpush.msrb.mxu1 %v1646_v37  ;;  %1785 = vmatpush.msra.mxu2 %v1583_v40  ;;  %v1627_v37 = vld [vmem:[#allocation8 + $0x690] sm:$0xff]  ;;  %v1620_v44 = vld [vmem:[#allocation8 + $0x658] sm:$0xff] }
 0x16f   : > { %1740 = vmatpush.msrb.mxu0 %v1578_v35  ;;  %1810 = vmatpush.msra.mxu3 %v1639_v3  ;;  %v1559_v35 = vld [vmem:[#allocation8 + $0x470] sm:$0xff]  ;;  %v1552_v46 = vld [vmem:[#allocation8 + $0x438] sm:$0xff]  ;;  %v1536_v3 = vld [vmem:[#allocation8 + $0x3c0] sm:$0xff] }
 0x170   : > { %1763 = vmatpush.msrb.mxu1 %v1642_v36  ;;  %1786 = vmatpush.msra.mxu2 %v1579_v61  ;;  %v1623_v36 = vld [vmem:[#allocation8 + $0x670] sm:$0xff]  ;;  %v1616_v47 = vld [vmem:[#allocation8 + $0x638] sm:$0xff]  ;;  %v1476_v61 = vld [vmem:[#allocation8 + $0x1e0] sm:$0xff] }
 0x171   : > { %1741 = vmatpush.msrb.mxu0 %v1574_v43  ;;  %1811 = vmatpush.msra.mxu3 %v1635_v7  ;;  %v1555_v43 = vld [vmem:[#allocation8 + $0x450] sm:$0xff]  ;;  %v1548_v50 = vld [vmem:[#allocation8 + $0x418] sm:$0xff]  ;;  %v1533_v7 = vld [vmem:[#allocation8 + $0x3a8] sm:$0xff] }
 0x172   : > { %1764 = vmatpush.msrb.mxu1 %v1638_v31  ;;  %1787 = vmatpush.msra.mxu2 %v1575_v2  ;;  %v1619_v31 = vld [vmem:[#allocation8 + $0x650] sm:$0xff]  ;;  %v1612_v51 = vld [vmem:[#allocation8 + $0x618] sm:$0xff]  ;;  %v1472_v2 = vld [vmem:[#allocation8 + $0x1c0] sm:$0xff] }
 0x173   : > { %1742 = vmatpush.msrb.mxu0 %v1570_v34  ;;  %1812 = vmatpush.msra.mxu3 %v1631_v27  ;;  %v1551_v34 = vld [vmem:[#allocation8 + $0x430] sm:$0xff]  ;;  %v1513_v27 = vld [vmem:[#allocation8 + $0x308] sm:$0xff] }
 0x174   : > { %1765 = vmatpush.msrb.mxu1 %v1634_v45  ;;  %1788 = vmatpush.msra.mxu2 %v1571_v39  ;;  %v1615_v45 = vld [vmem:[#allocation8 + $0x630] sm:$0xff]  ;;  %v1469_v39 = vld [vmem:[#allocation8 + $0x1a8] sm:$0xff] }
 0x175   : > { %1743 = vmatpush.msrb.mxu0 %v1566_v48  ;;  %1813 = vmatpush.msra.mxu3 %v1627_v37  ;;  %v1547_v48 = vld [vmem:[#allocation8 + $0x410] sm:$0xff]  ;;  %v1509_v37 = vld [vmem:[#allocation8 + $0x2e8] sm:$0xff] }
 0x176   : > { %1766 = vmatpush.msrb.mxu1 %v1630_v49  ;;  %1789 = vmatpush.msra.mxu2 %v1567_v26  ;;  %v1611_v49 = vld [vmem:[#allocation8 + $0x610] sm:$0xff]  ;;  %v1449_v26 = vld [vmem:[#allocation8 + $0x108] sm:$0xff] }
 0x177   : > { %1744 = vmatpush.msrb.mxu0 %v1562_v52  ;;  %1814 = vmatpush.msra.mxu3 %v1623_v36  ;;  %v1505_v36 = vld [vmem:[#allocation8 + $0x2c8] sm:$0xff] }
 0x178   : > { %1767 = vmatpush.msrb.mxu1 %v1626_v53  ;;  %1790 = vmatpush.msra.mxu2 %v1563_v30  ;;  %v1445_v30 = vld [vmem:[#allocation8 + $0xe8] sm:$0xff] }
 0x179   : > { %1745 = vmatpush.msrb.mxu0 %v1558_v56  ;;  %1815 = vmatpush.msra.mxu3 %v1619_v31  ;;  %v1501_v31 = vld [vmem:[#allocation8 + $0x2a8] sm:$0xff] }
 0x17a   : > { %1768 = vmatpush.msrb.mxu1 %v1622_v58  ;;  %1791 = vmatpush.msra.mxu2 %v1559_v35  ;;  %v1441_v35 = vld [vmem:[#allocation8 + $0xc8] sm:$0xff] }
 0x17b   : > { %1746 = vmatpush.msrb.mxu0 %v1554_v57  ;;  %1816 = vmatpush.msra.mxu3 %v1615_v45  ;;  %v1497_v45 = vld [vmem:[#allocation8 + $0x288] sm:$0xff] }
 0x17c   : > { %1769 = vmatpush.msrb.mxu1 %v1618_v60  ;;  %1792 = vmatpush.msra.mxu2 %v1555_v43  ;;  %v1437_v43 = vld [vmem:[#allocation8 + $0xa8] sm:$0xff] }
 0x17d   : > { %1747 = vmatpush.msrb.mxu0 %v1550_v0  ;;  %1817 = vmatpush.msra.mxu3 %v1611_v49  ;;  %v1477_v0 = vld [vmem:[#allocation8 + $0x1e8] sm:$0xff] }
 0x17e   : > { %1770 = vmatpush.msrb.mxu1 %v1614_v1  ;;  %1793 = vmatpush.msra.mxu2 %v1551_v34  ;;  %v1541_v1 = vld [vmem:[#allocation8 + $0x3e8] sm:$0xff] }
 0x17f   : > { %1748 = vmatpush.msrb.mxu0 %v1546_v4  ;;  %v1473_v4 = vld [vmem:[#allocation8 + $0x1c8] sm:$0xff] }
 0x180   : > { %1771 = vmatpush.msrb.mxu1 %v1610_v62  ;;  %1794 = vmatpush.msra.mxu2 %v1547_v48  ;;  %v1537_v62 = vld [vmem:[#allocation8 + $0x3c8] sm:$0xff] }
 0x181   : > { %1825 = vmatpush.msra.mxu0 %v1608_v5  ;;  %v1468_v5 = vld [vmem:[#allocation8 + $0x1a0] sm:$0xff]  ;;  %v1433_v34 = vld [vmem:[#allocation8 + $0x88] sm:$0xff] }
 0x182   : > { %1848 = vmatpush.msra.mxu1 %v1672_v6  ;;  %v1532_v6 = vld [vmem:[#allocation8 + $0x3a0] sm:$0xff]  ;;  %v1429_v48 = vld [vmem:[#allocation8 + $0x68] sm:$0xff] }
 0x183   : > { %1826 = vmatpush.msra.mxu0 %v1604_v8  ;;  %v1464_v8 = vld [vmem:[#allocation8 + $0x180] sm:$0xff]  ;;  %v1493_v49 = vld [vmem:[#allocation8 + $0x268] sm:$0xff] }
 0x184   : > { %1849 = vmatpush.msra.mxu1 %v1668_v10  ;;  %v1528_v10 = vld [vmem:[#allocation8 + $0x380] sm:$0xff] }
 0x185   : > { %1827 = vmatpush.msra.mxu0 %v1600_v11  ;;  %v1465_v11 = vld [vmem:[#allocation8 + $0x188] sm:$0xff] }
 0x186   : > { %1850 = vmatpush.msra.mxu1 %v1664_v12  ;;  %v1529_v12 = vld [vmem:[#allocation8 + $0x388] sm:$0xff] }
 0x187   : > { %1828 = vmatpush.msra.mxu0 %v1596_v13  ;;  %v1460_v13 = vld [vmem:[#allocation8 + $0x160] sm:$0xff] }
 0x188   : > { %1851 = vmatpush.msra.mxu1 %v1660_v14  ;;  %v1524_v14 = vld [vmem:[#allocation8 + $0x360] sm:$0xff] }
 0x189   : > { %1829 = vmatpush.msra.mxu0 %v1592_v15  ;;  %v1461_v15 = vld [vmem:[#allocation8 + $0x168] sm:$0xff] }
 0x18a   : > { %1852 = vmatpush.msra.mxu1 %v1656_v16  ;;  %v1525_v16 = vld [vmem:[#allocation8 + $0x368] sm:$0xff] }
 0x18b   : > { %1830 = vmatpush.msra.mxu0 %v1588_v17  ;;  %v1456_v17 = vld [vmem:[#allocation8 + $0x140] sm:$0xff] }
 0x18c   : > { %1853 = vmatpush.msra.mxu1 %v1652_v18  ;;  %v1520_v18 = vld [vmem:[#allocation8 + $0x340] sm:$0xff] }
 0x18d   : > { %1831 = vmatpush.msra.mxu0 %v1584_v9  ;;  %v1457_v9 = vld [vmem:[#allocation8 + $0x148] sm:$0xff] }
 0x18e   : > { %1854 = vmatpush.msra.mxu1 %v1648_v19  ;;  %v1521_v19 = vld [vmem:[#allocation8 + $0x348] sm:$0xff] }
 0x18f   : > { %1832 = vmatpush.msra.mxu0 %v1580_v20  ;;  %v1452_v20 = vld [vmem:[#allocation8 + $0x120] sm:$0xff] }
 0x190   : > { %1855 = vmatpush.msra.mxu1 %v1644_v21  ;;  %v1516_v21 = vld [vmem:[#allocation8 + $0x320] sm:$0xff] }
 0x191   : > { %1833 = vmatpush.msra.mxu0 %v1576_v22  ;;  %v1453_v22 = vld [vmem:[#allocation8 + $0x128] sm:$0xff] }
 0x192   : > { %1856 = vmatpush.msra.mxu1 %v1640_v23  ;;  %v1517_v23 = vld [vmem:[#allocation8 + $0x328] sm:$0xff] }
 0x193   : > { %1834 = vmatpush.msra.mxu0 %v1572_v24  ;;  %v1448_v24 = vld [vmem:[#allocation8 + $0x100] sm:$0xff] }
 0x194   : > { %1857 = vmatpush.msra.mxu1 %v1636_v25  ;;  %v1512_v25 = vld [vmem:[#allocation8 + $0x300] sm:$0xff] }
 0x195   : > { %1835 = vmatpush.msra.mxu0 %v1568_v28  ;;  %v1444_v28 = vld [vmem:[#allocation8 + $0xe0] sm:$0xff] }
 0x196   : > { %1858 = vmatpush.msra.mxu1 %v1632_v29  ;;  %v1508_v29 = vld [vmem:[#allocation8 + $0x2e0] sm:$0xff] }
 0x197   : > { %1836 = vmatpush.msra.mxu0 %v1564_v38  ;;  %v1440_v38 = vld [vmem:[#allocation8 + $0xc0] sm:$0xff] }
 0x198   : > { %1859 = vmatpush.msra.mxu1 %v1628_v33  ;;  %v1504_v33 = vld [vmem:[#allocation8 + $0x2c0] sm:$0xff] }
 0x199   : > { %1837 = vmatpush.msra.mxu0 %v1560_v41  ;;  %v1436_v41 = vld [vmem:[#allocation8 + $0xa0] sm:$0xff] }
 0x19a   : > { %1860 = vmatpush.msra.mxu1 %v1624_v42  ;;  %v1500_v42 = vld [vmem:[#allocation8 + $0x2a0] sm:$0xff] }
 0x19b   : > { %1838 = vmatpush.msra.mxu0 %v1556_v32  ;;  %v1432_v32 = vld [vmem:[#allocation8 + $0x80] sm:$0xff] }
 0x19c   : > { %1861 = vmatpush.msra.mxu1 %v1620_v44  ;;  %v1496_v44 = vld [vmem:[#allocation8 + $0x280] sm:$0xff] }
 0x19d   : > { %1839 = vmatpush.msra.mxu0 %v1552_v46  ;;  %v1428_v46 = vld [vmem:[#allocation8 + $0x60] sm:$0xff] }
 0x19e   : > { %1862 = vmatpush.msra.mxu1 %v1616_v47  ;;  %v1492_v47 = vld [vmem:[#allocation8 + $0x260] sm:$0xff] }
 0x19f   : > { %1840 = vmatpush.msra.mxu0 %v1548_v50  ;;  %v1424_v50 = vld [vmem:[#allocation8 + $0x40] sm:$0xff] }
 0x1a0   : > { %1863 = vmatpush.msra.mxu1 %v1612_v51  ;;  %v1488_v51 = vld [vmem:[#allocation8 + $0x240] sm:$0xff] }
 0x1dd   : > { %v4538_v52 = vpop.f32.mrf.mxu0 }
 0x1de   : > { %v4540_v53 = vpop.f32.mrf.mxu1  ;;  %v1677_v40 = vrot.slane %v4538_v52, 1 }
 0x1df   : > { %v1680_v59 = vrot.slane %v4540_v53, 1 }
 0x1e5   : > { %v4542_v54 = vpop.f32.mrf.mxu0 }
 0x1e6   : > { %v4544_v55 = vpop.f32.mrf.mxu1  ;;  %v4547_v56 = vrot.slane %v4542_v54, 1 }
 0x1e7   : > { %v4550_v58 = vrot.slane %v4544_v55, 1 }
 0x1e8   : > { %v4556_v57 = vsel %vm1332_vm2, %v1677_v40, %v4547_v56  ;;  %v1425_v40 = vld [vmem:[#allocation8 + $0x48] sm:$0xff] }
 0x1e9   : > { %v4560_v60 = vsel %vm1332_vm2, %v1680_v59, %v4550_v58  ;;  %1703 = vmatmul.f32.vlgmr.msrb.gmra.mxu2 %v4556_v57  ;;  %1749 = vmatmul.f32.vlgmr.msrb.gmra.mxu0 %v4556_v57  ;;  %v1489_v59 = vld [vmem:[#allocation8 + $0x248] sm:$0xff] }
 0x1ea   : > { %1726 = vmatmul.f32.vlgmr.msrb.gmra.mxu3 %v4560_v60  ;;  %1772 = vmatmul.f32.vlgmr.msrb.gmra.mxu1 %v4560_v60 }
 0x1eb   : > { %1871 = vmatpush.msrb.mxu2 %v1476_v61  ;;  %1894 = vmatpush.msrb.mxu3 %v1540_v63  ;;  %v1421_v61 = vld [vmem:[#allocation8 + $0x28] sm:$0xff] }
 0x1ec   : > { %1917 = vmatpush.msrb.mxu0 %v1477_v0  ;;  %1940 = vmatpush.msrb.mxu1 %v1541_v1  ;;  %v1485_v63 = vld [vmem:[#allocation8 + $0x228] sm:$0xff]  ;;  %v1416_v0 = vld [vmem:[#allocation8] sm:$0xff] }
 0x1ed   : > { %1872 = vmatpush.msrb.mxu2 %v1472_v2  ;;  %1895 = vmatpush.msrb.mxu3 %v1536_v3  ;;  %v1481_v1 = vld [vmem:[#allocation8 + $0x208] sm:$0xff]  ;;  %v1478_v2 = vld [vmem:[#allocation8 + $0x1f0] sm:$0xff] }
 0x1ee   : > { %1918 = vmatpush.msrb.mxu0 %v1473_v4  ;;  %1941 = vmatpush.msrb.mxu1 %v1537_v62  ;;  %v1542_v3 = vld [vmem:[#allocation8 + $0x3f0] sm:$0xff]  ;;  %v1479_v4 = vld [vmem:[#allocation8 + $0x1f8] sm:$0xff] }
 0x1ef   : > { %1873 = vmatpush.msrb.mxu2 %v1468_v5  ;;  %1896 = vmatpush.msrb.mxu3 %v1532_v6  ;;  %v1543_v62 = vld [vmem:[#allocation8 + $0x3f8] sm:$0xff]  ;;  %v1474_v5 = vld [vmem:[#allocation8 + $0x1d0] sm:$0xff] }
 0x1f0   : > { %1919 = vmatpush.msrb.mxu0 %v1469_v39  ;;  %1942 = vmatpush.msrb.mxu1 %v1533_v7  ;;  %v1538_v6 = vld [vmem:[#allocation8 + $0x3d0] sm:$0xff]  ;;  %v1475_v39 = vld [vmem:[#allocation8 + $0x1d8] sm:$0xff] }
 0x1f1   : > { %1874 = vmatpush.msrb.mxu2 %v1464_v8  ;;  %1897 = vmatpush.msrb.mxu3 %v1528_v10  ;;  %v1539_v7 = vld [vmem:[#allocation8 + $0x3d8] sm:$0xff]  ;;  %v1470_v8 = vld [vmem:[#allocation8 + $0x1b0] sm:$0xff] }
 0x1f2   : > { %1920 = vmatpush.msrb.mxu0 %v1465_v11  ;;  %1943 = vmatpush.msrb.mxu1 %v1529_v12  ;;  %v1534_v10 = vld [vmem:[#allocation8 + $0x3b0] sm:$0xff]  ;;  %v1471_v11 = vld [vmem:[#allocation8 + $0x1b8] sm:$0xff] }
 0x1f3   : > { %1706 = vmatmul.f32.gmra.mxu2 %v4547_v56  ;;  %1729 = vmatmul.f32.gmra.mxu3 %v4550_v58  ;;  %v1535_v12 = vld [vmem:[#allocation8 + $0x3b8] sm:$0xff] }
 0x1f4   : > { %1752 = vmatmul.f32.gmra.mxu0 %v4547_v56  ;;  %1775 = vmatmul.f32.gmra.mxu1 %v4550_v58 }
 0x1f5   : > { %1875 = vmatpush.msrb.mxu2 %v1460_v13  ;;  %1898 = vmatpush.msrb.mxu3 %v1524_v14  ;;  %v1466_v13 = vld [vmem:[#allocation8 + $0x190] sm:$0xff] }
 0x1f6   : > { %1921 = vmatpush.msrb.mxu0 %v1461_v15  ;;  %1944 = vmatpush.msrb.mxu1 %v1525_v16  ;;  %v1530_v14 = vld [vmem:[#allocation8 + $0x390] sm:$0xff]  ;;  %v1467_v15 = vld [vmem:[#allocation8 + $0x198] sm:$0xff] }
 0x1f7   : > { %1876 = vmatpush.msrb.mxu2 %v1456_v17  ;;  %1899 = vmatpush.msrb.mxu3 %v1520_v18  ;;  %v1531_v16 = vld [vmem:[#allocation8 + $0x398] sm:$0xff]  ;;  %v1462_v17 = vld [vmem:[#allocation8 + $0x170] sm:$0xff] }
 0x1f8   : > { %1922 = vmatpush.msrb.mxu0 %v1457_v9  ;;  %1945 = vmatpush.msrb.mxu1 %v1521_v19  ;;  %v1526_v18 = vld [vmem:[#allocation8 + $0x370] sm:$0xff]  ;;  %v1463_v9 = vld [vmem:[#allocation8 + $0x178] sm:$0xff] }
 0x1f9   : > { %1877 = vmatpush.msrb.mxu2 %v1452_v20  ;;  %1900 = vmatpush.msrb.mxu3 %v1516_v21  ;;  %v1527_v19 = vld [vmem:[#allocation8 + $0x378] sm:$0xff]  ;;  %v1458_v20 = vld [vmem:[#allocation8 + $0x150] sm:$0xff] }
 0x1fa   : > { %1923 = vmatpush.msrb.mxu0 %v1453_v22  ;;  %1946 = vmatpush.msrb.mxu1 %v1517_v23  ;;  %v1522_v21 = vld [vmem:[#allocation8 + $0x350] sm:$0xff]  ;;  %v1459_v22 = vld [vmem:[#allocation8 + $0x158] sm:$0xff] }
 0x1fb   : > { %1878 = vmatpush.msrb.mxu2 %v1448_v24  ;;  %1901 = vmatpush.msrb.mxu3 %v1512_v25  ;;  %v1523_v23 = vld [vmem:[#allocation8 + $0x358] sm:$0xff]  ;;  %v1454_v24 = vld [vmem:[#allocation8 + $0x130] sm:$0xff] }
 0x1fc   : > { %1924 = vmatpush.msrb.mxu0 %v1449_v26  ;;  %1947 = vmatpush.msrb.mxu1 %v1513_v27  ;;  %v1518_v25 = vld [vmem:[#allocation8 + $0x330] sm:$0xff]  ;;  %v1455_v26 = vld [vmem:[#allocation8 + $0x138] sm:$0xff] }
 0x1fd   : > { %1795 = vmatmul.f32.vlgmr.msra.gmra.mxu2 %v4556_v57  ;;  %1818 = vmatmul.f32.vlgmr.msra.gmra.mxu3 %v4560_v60  ;;  %v1519_v27 = vld [vmem:[#allocation8 + $0x338] sm:$0xff] }
 0x1fe   : > { %1841 = vmatmul.f32.vlgmr.msra.gmra.mxu0 %v4556_v57  ;;  %1864 = vmatmul.f32.vlgmr.msra.gmra.mxu1 %v4560_v60  ;;  %v1420_v57 = vld [vmem:[#allocation8 + $0x20] sm:$0xff] }
 0x1ff   : > { %1879 = vmatpush.msrb.mxu2 %v1444_v28  ;;  %1902 = vmatpush.msrb.mxu3 %v1508_v29  ;;  %v1484_v60 = vld [vmem:[#allocation8 + $0x220] sm:$0xff]  ;;  %v1450_v28 = vld [vmem:[#allocation8 + $0x110] sm:$0xff] }
 0x200   : > { %1925 = vmatpush.msrb.mxu0 %v1445_v30  ;;  %1948 = vmatpush.msrb.mxu1 %v1509_v37  ;;  %v1514_v29 = vld [vmem:[#allocation8 + $0x310] sm:$0xff]  ;;  %v1451_v30 = vld [vmem:[#allocation8 + $0x118] sm:$0xff] }
 0x201   : > { %1880 = vmatpush.msrb.mxu2 %v1440_v38  ;;  %1903 = vmatpush.msrb.mxu3 %v1504_v33  ;;  %v1515_v37 = vld [vmem:[#allocation8 + $0x318] sm:$0xff]  ;;  %v1446_v38 = vld [vmem:[#allocation8 + $0xf0] sm:$0xff] }
 0x202   : > { %1926 = vmatpush.msrb.mxu0 %v1441_v35  ;;  %1949 = vmatpush.msrb.mxu1 %v1505_v36  ;;  %v1510_v33 = vld [vmem:[#allocation8 + $0x2f0] sm:$0xff]  ;;  %v1447_v35 = vld [vmem:[#allocation8 + $0xf8] sm:$0xff] }
 0x203   : > { %1881 = vmatpush.msrb.mxu2 %v1436_v41  ;;  %1904 = vmatpush.msrb.mxu3 %v1500_v42  ;;  %v1511_v36 = vld [vmem:[#allocation8 + $0x2f8] sm:$0xff]  ;;  %v1442_v41 = vld [vmem:[#allocation8 + $0xd0] sm:$0xff] }
 0x204   : > { %1927 = vmatpush.msrb.mxu0 %v1437_v43  ;;  %1950 = vmatpush.msrb.mxu1 %v1501_v31  ;;  %v1506_v42 = vld [vmem:[#allocation8 + $0x2d0] sm:$0xff]  ;;  %v1443_v43 = vld [vmem:[#allocation8 + $0xd8] sm:$0xff] }
 0x205   : > { %1882 = vmatpush.msrb.mxu2 %v1432_v32  ;;  %1905 = vmatpush.msrb.mxu3 %v1496_v44  ;;  %v1507_v31 = vld [vmem:[#allocation8 + $0x2d8] sm:$0xff]  ;;  %v1438_v32 = vld [vmem:[#allocation8 + $0xb0] sm:$0xff] }
 0x206   : > { %1928 = vmatpush.msrb.mxu0 %v1433_v34  ;;  %1951 = vmatpush.msrb.mxu1 %v1497_v45  ;;  %v1502_v44 = vld [vmem:[#allocation8 + $0x2b0] sm:$0xff]  ;;  %v1439_v34 = vld [vmem:[#allocation8 + $0xb8] sm:$0xff] }
 0x207   : > { %1798 = vmatmul.f32.gmra.mxu2 %v4547_v56  ;;  %1821 = vmatmul.f32.gmra.mxu3 %v4550_v58  ;;  %v1503_v45 = vld [vmem:[#allocation8 + $0x2b8] sm:$0xff] }
 0x208   : > { %1844 = vmatmul.f32.gmra.mxu0 %v4547_v56  ;;  %1867 = vmatmul.f32.gmra.mxu1 %v4550_v58  ;;  %v1480_v56 = vld [vmem:[#allocation8 + $0x200] sm:$0xff]  ;;  %v1417_v58 = vld [vmem:[#allocation8 + $0x8] sm:$0xff] }
 0x209   : > { %1883 = vmatpush.msrb.mxu2 %v1428_v46  ;;  %1906 = vmatpush.msrb.mxu3 %v1492_v47  ;;  %v1434_v46 = vld [vmem:[#allocation8 + $0x90] sm:$0xff] }
 0x20a   : > { %1929 = vmatpush.msrb.mxu0 %v1429_v48  ;;  %1952 = vmatpush.msrb.mxu1 %v1493_v49  ;;  %v1498_v47 = vld [vmem:[#allocation8 + $0x290] sm:$0xff]  ;;  %v1435_v48 = vld [vmem:[#allocation8 + $0x98] sm:$0xff] }
 0x20b   : > { %1884 = vmatpush.msrb.mxu2 %v1424_v50  ;;  %1907 = vmatpush.msrb.mxu3 %v1488_v51  ;;  %v1499_v49 = vld [vmem:[#allocation8 + $0x298] sm:$0xff]  ;;  %v1430_v50 = vld [vmem:[#allocation8 + $0x70] sm:$0xff] }
 0x20c   : > { %1930 = vmatpush.msrb.mxu0 %v1425_v40  ;;  %1953 = vmatpush.msrb.mxu1 %v1489_v59  ;;  %v1494_v51 = vld [vmem:[#allocation8 + $0x270] sm:$0xff]  ;;  %v1431_v40 = vld [vmem:[#allocation8 + $0x78] sm:$0xff] }
 0x20d   : > { %1885 = vmatpush.msrb.mxu2 %v1420_v57  ;;  %1908 = vmatpush.msrb.mxu3 %v1484_v60  ;;  %v1495_v59 = vld [vmem:[#allocation8 + $0x278] sm:$0xff]  ;;  %v1426_v57 = vld [vmem:[#allocation8 + $0x50] sm:$0xff] }
 0x20e   : > { %1931 = vmatpush.msrb.mxu0 %v1421_v61  ;;  %1954 = vmatpush.msrb.mxu1 %v1485_v63  ;;  %v1490_v60 = vld [vmem:[#allocation8 + $0x250] sm:$0xff]  ;;  %v1427_v61 = vld [vmem:[#allocation8 + $0x58] sm:$0xff] }
 0x20f   : > { %1886 = vmatpush.msrb.mxu2 %v1416_v0  ;;  %1909 = vmatpush.msrb.mxu3 %v1480_v56  ;;  %v1491_v63 = vld [vmem:[#allocation8 + $0x258] sm:$0xff]  ;;  %v1422_v0 = vld [vmem:[#allocation8 + $0x30] sm:$0xff] }
 0x210   : > { %1932 = vmatpush.msrb.mxu0 %v1417_v58  ;;  %1955 = vmatpush.msrb.mxu1 %v1481_v1  ;;  %v1486_v56 = vld [vmem:[#allocation8 + $0x230] sm:$0xff]  ;;  %v1423_v58 = vld [vmem:[#allocation8 + $0x38] sm:$0xff] }
 0x211   : > { %1963 = vmatpush.msra.mxu2 %v1478_v2  ;;  %1986 = vmatpush.msra.mxu3 %v1542_v3  ;;  %v1487_v1 = vld [vmem:[#allocation8 + $0x238] sm:$0xff]  ;;  %v1418_v2 = vld [vmem:[#allocation8 + $0x10] sm:$0xff] }
 0x212   : > { %2009 = vmatpush.msra.mxu0 %v1479_v4  ;;  %2032 = vmatpush.msra.mxu1 %v1543_v62  ;;  %v1482_v3 = vld [vmem:[#allocation8 + $0x210] sm:$0xff]  ;;  %v1419_v4 = vld [vmem:[#allocation8 + $0x18] sm:$0xff] }
 0x213   : > { %1887 = vmatmul.f32.vlgmr.msrb.gmra.mxu2 %v4538_v52  ;;  %1910 = vmatmul.f32.vlgmr.msrb.gmra.mxu3 %v4540_v53  ;;  %v1483_v62 = vld [vmem:[#allocation8 + $0x218] sm:$0xff] }
 0x214   : > { %1933 = vmatmul.f32.vlgmr.msrb.gmra.mxu0 %v4538_v52  ;;  %1956 = vmatmul.f32.vlgmr.msrb.gmra.mxu1 %v4540_v53 }
 0x215   : > { %1964 = vmatpush.msra.mxu2 %v1474_v5  ;;  %1987 = vmatpush.msra.mxu3 %v1538_v6  ;;  %v2116_v5 = vld [vmem:[#allocation8 + $0x9e0] sm:$0xff] }
 0x216   : > { %2010 = vmatpush.msra.mxu0 %v1475_v39  ;;  %2033 = vmatpush.msra.mxu1 %v1539_v7  ;;  %v2180_v6 = vld [vmem:[#allocation8 + $0xbe0] sm:$0xff]  ;;  %v2117_v39 = vld [vmem:[#allocation8 + $0x9e8] sm:$0xff] }
 0x217   : > { %1965 = vmatpush.msra.mxu2 %v1470_v8  ;;  %1988 = vmatpush.msra.mxu3 %v1534_v10  ;;  %v2181_v7 = vld [vmem:[#allocation8 + $0xbe8] sm:$0xff]  ;;  %v2112_v8 = vld [vmem:[#allocation8 + $0x9c0] sm:$0xff] }
 0x218   : > { %2011 = vmatpush.msra.mxu0 %v1471_v11  ;;  %2034 = vmatpush.msra.mxu1 %v1535_v12  ;;  %v2176_v10 = vld [vmem:[#allocation8 + $0xbc0] sm:$0xff]  ;;  %v2113_v11 = vld [vmem:[#allocation8 + $0x9c8] sm:$0xff] }
 0x219   : > { %1966 = vmatpush.msra.mxu2 %v1466_v13  ;;  %1989 = vmatpush.msra.mxu3 %v1530_v14  ;;  %v2177_v12 = vld [vmem:[#allocation8 + $0xbc8] sm:$0xff]  ;;  %v2108_v13 = vld [vmem:[#allocation8 + $0x9a0] sm:$0xff] }
 0x21a   : > { %2012 = vmatpush.msra.mxu0 %v1467_v15  ;;  %2035 = vmatpush.msra.mxu1 %v1531_v16  ;;  %v2172_v14 = vld [vmem:[#allocation8 + $0xba0] sm:$0xff]  ;;  %v2109_v15 = vld [vmem:[#allocation8 + $0x9a8] sm:$0xff] }
 0x21b   : > { %1967 = vmatpush.msra.mxu2 %v1462_v17  ;;  %1990 = vmatpush.msra.mxu3 %v1526_v18  ;;  %v2173_v16 = vld [vmem:[#allocation8 + $0xba8] sm:$0xff]  ;;  %v2104_v17 = vld [vmem:[#allocation8 + $0x980] sm:$0xff] }
 0x21c   : > { %2013 = vmatpush.msra.mxu0 %v1463_v9  ;;  %2036 = vmatpush.msra.mxu1 %v1527_v19  ;;  %v2168_v18 = vld [vmem:[#allocation8 + $0xb80] sm:$0xff]  ;;  %v2105_v9 = vld [vmem:[#allocation8 + $0x988] sm:$0xff] }
 0x21d   : > { %1890 = vmatmul.f32.gmra.mxu2 %v4542_v54  ;;  %1913 = vmatmul.f32.gmra.mxu3 %v4544_v55  ;;  %v2169_v19 = vld [vmem:[#allocation8 + $0xb88] sm:$0xff] }
 0x21e   : > { %1936 = vmatmul.f32.gmra.mxu0 %v4542_v54  ;;  %1959 = vmatmul.f32.gmra.mxu1 %v4544_v55 }
 0x21f   : > { %1968 = vmatpush.msra.mxu2 %v1458_v20  ;;  %1991 = vmatpush.msra.mxu3 %v1522_v21  ;;  %v2100_v20 = vld [vmem:[#allocation8 + $0x960] sm:$0xff] }
 0x220   : > { %2014 = vmatpush.msra.mxu0 %v1459_v22  ;;  %2037 = vmatpush.msra.mxu1 %v1523_v23  ;;  %v2164_v21 = vld [vmem:[#allocation8 + $0xb60] sm:$0xff]  ;;  %v2101_v22 = vld [vmem:[#allocation8 + $0x968] sm:$0xff] }
 0x221   : > { %1969 = vmatpush.msra.mxu2 %v1454_v24  ;;  %1992 = vmatpush.msra.mxu3 %v1518_v25  ;;  %v2165_v23 = vld [vmem:[#allocation8 + $0xb68] sm:$0xff]  ;;  %v2096_v24 = vld [vmem:[#allocation8 + $0x940] sm:$0xff] }
 0x222   : > { %2015 = vmatpush.msra.mxu0 %v1455_v26  ;;  %2038 = vmatpush.msra.mxu1 %v1519_v27  ;;  %v2160_v25 = vld [vmem:[#allocation8 + $0xb40] sm:$0xff]  ;;  %v2097_v26 = vld [vmem:[#allocation8 + $0x948] sm:$0xff] }
 0x223   : > { %1970 = vmatpush.msra.mxu2 %v1450_v28  ;;  %1993 = vmatpush.msra.mxu3 %v1514_v29  ;;  %v2161_v27 = vld [vmem:[#allocation8 + $0xb48] sm:$0xff]  ;;  %v2092_v28 = vld [vmem:[#allocation8 + $0x920] sm:$0xff] }
 0x224   : > { %2016 = vmatpush.msra.mxu0 %v1451_v30  ;;  %2039 = vmatpush.msra.mxu1 %v1515_v37  ;;  %v2156_v29 = vld [vmem:[#allocation8 + $0xb20] sm:$0xff]  ;;  %v2093_v30 = vld [vmem:[#allocation8 + $0x928] sm:$0xff] }
 0x225   : > { %1971 = vmatpush.msra.mxu2 %v1446_v38  ;;  %1994 = vmatpush.msra.mxu3 %v1510_v33  ;;  %v2157_v37 = vld [vmem:[#allocation8 + $0xb28] sm:$0xff]  ;;  %v2088_v38 = vld [vmem:[#allocation8 + $0x900] sm:$0xff] }
 0x226   : > { %2017 = vmatpush.msra.mxu0 %v1447_v35  ;;  %2040 = vmatpush.msra.mxu1 %v1511_v36  ;;  %v2152_v33 = vld [vmem:[#allocation8 + $0xb00] sm:$0xff]  ;;  %v2089_v35 = vld [vmem:[#allocation8 + $0x908] sm:$0xff] }
 0x227   : > { %1972 = vmatpush.msra.mxu2 %v1442_v41  ;;  %1995 = vmatpush.msra.mxu3 %v1506_v42  ;;  %v2153_v36 = vld [vmem:[#allocation8 + $0xb08] sm:$0xff]  ;;  %v2084_v41 = vld [vmem:[#allocation8 + $0x8e0] sm:$0xff] }
 0x228   : > { %2018 = vmatpush.msra.mxu0 %v1443_v43  ;;  %2041 = vmatpush.msra.mxu1 %v1507_v31  ;;  %v2148_v42 = vld [vmem:[#allocation8 + $0xae0] sm:$0xff]  ;;  %v2085_v43 = vld [vmem:[#allocation8 + $0x8e8] sm:$0xff] }
 0x229   : > { %1973 = vmatpush.msra.mxu2 %v1438_v32  ;;  %1996 = vmatpush.msra.mxu3 %v1502_v44  ;;  %v2149_v31 = vld [vmem:[#allocation8 + $0xae8] sm:$0xff]  ;;  %v2080_v32 = vld [vmem:[#allocation8 + $0x8c0] sm:$0xff] }
 0x22a   : > { %2019 = vmatpush.msra.mxu0 %v1439_v34  ;;  %2042 = vmatpush.msra.mxu1 %v1503_v45  ;;  %v2144_v44 = vld [vmem:[#allocation8 + $0xac0] sm:$0xff]  ;;  %v2081_v34 = vld [vmem:[#allocation8 + $0x8c8] sm:$0xff] }
 0x22b   : > { %1974 = vmatpush.msra.mxu2 %v1434_v46  ;;  %1997 = vmatpush.msra.mxu3 %v1498_v47  ;;  %v2145_v45 = vld [vmem:[#allocation8 + $0xac8] sm:$0xff]  ;;  %v2076_v46 = vld [vmem:[#allocation8 + $0x8a0] sm:$0xff] }
 0x22c   : > { %2020 = vmatpush.msra.mxu0 %v1435_v48  ;;  %2043 = vmatpush.msra.mxu1 %v1499_v49  ;;  %v2140_v47 = vld [vmem:[#allocation8 + $0xaa0] sm:$0xff]  ;;  %v2077_v48 = vld [vmem:[#allocation8 + $0x8a8] sm:$0xff] }
 0x22d   : > { %1975 = vmatpush.msra.mxu2 %v1430_v50  ;;  %1998 = vmatpush.msra.mxu3 %v1494_v51  ;;  %v2141_v49 = vld [vmem:[#allocation8 + $0xaa8] sm:$0xff]  ;;  %v2072_v50 = vld [vmem:[#allocation8 + $0x880] sm:$0xff] }
 0x22e   : > { %2021 = vmatpush.msra.mxu0 %v1431_v40  ;;  %2044 = vmatpush.msra.mxu1 %v1495_v59  ;;  %v2136_v51 = vld [vmem:[#allocation8 + $0xa80] sm:$0xff]  ;;  %v2073_v40 = vld [vmem:[#allocation8 + $0x888] sm:$0xff] }
 0x22f   : > { %1976 = vmatpush.msra.mxu2 %v1426_v57  ;;  %1999 = vmatpush.msra.mxu3 %v1490_v60  ;;  %v2137_v59 = vld [vmem:[#allocation8 + $0xa88] sm:$0xff]  ;;  %v2068_v57 = vld [vmem:[#allocation8 + $0x860] sm:$0xff] }
 0x230   : > { %2022 = vmatpush.msra.mxu0 %v1427_v61  ;;  %2045 = vmatpush.msra.mxu1 %v1491_v63  ;;  %v2132_v60 = vld [vmem:[#allocation8 + $0xa60] sm:$0xff]  ;;  %v2069_v61 = vld [vmem:[#allocation8 + $0x868] sm:$0xff] }
 0x231   : > { %1977 = vmatpush.msra.mxu2 %v1422_v0  ;;  %2000 = vmatpush.msra.mxu3 %v1486_v56  ;;  %v2133_v63 = vld [vmem:[#allocation8 + $0xa68] sm:$0xff]  ;;  %v2064_v0 = vld [vmem:[#allocation8 + $0x840] sm:$0xff] }
 0x232   : > { %2023 = vmatpush.msra.mxu0 %v1423_v58  ;;  %2046 = vmatpush.msra.mxu1 %v1487_v1  ;;  %v2128_v56 = vld [vmem:[#allocation8 + $0xa40] sm:$0xff]  ;;  %v2065_v58 = vld [vmem:[#allocation8 + $0x848] sm:$0xff] }
 0x233   : > { %1978 = vmatpush.msra.mxu2 %v1418_v2  ;;  %2001 = vmatpush.msra.mxu3 %v1482_v3  ;;  %v2129_v1 = vld [vmem:[#allocation8 + $0xa48] sm:$0xff]  ;;  %v2060_v2 = vld [vmem:[#allocation8 + $0x820] sm:$0xff] }
 0x234   : > { %2024 = vmatpush.msra.mxu0 %v1419_v4  ;;  %2047 = vmatpush.msra.mxu1 %v1483_v62  ;;  %v2124_v3 = vld [vmem:[#allocation8 + $0xa20] sm:$0xff]  ;;  %v2061_v4 = vld [vmem:[#allocation8 + $0x828] sm:$0xff] }
 0x235   : > { %1979 = vmatmul.f32.vlgmr.msra.gmra.mxu2 %v4538_v52  ;;  %2002 = vmatmul.f32.vlgmr.msra.gmra.mxu3 %v4540_v53  ;;  %v2125_v62 = vld [vmem:[#allocation8 + $0xa28] sm:$0xff] }
 0x236   : > { %2025 = vmatmul.f32.vlgmr.msra.gmra.mxu0 %v4538_v52  ;;  %2048 = vmatmul.f32.vlgmr.msra.gmra.mxu1 %v4540_v53 }
 0x237   : > { %2195 = vmatpush.msrb.mxu2 %v2116_v5  ;;  %2218 = vmatpush.msrb.mxu3 %v2180_v6  ;;  %v4595_v5 = vrot.slane %v4542_v54, 2  ;;  %v4598_v6 = vrot.slane %v4544_v55, 2 }
 0x238   : > { %2241 = vmatpush.msrb.mxu0 %v2117_v39  ;;  %2264 = vmatpush.msrb.mxu1 %v2181_v7  ;;  %v2056_v39 = vld [vmem:[#allocation8 + $0x800] sm:$0xff] }
 0x239   : > { %2196 = vmatpush.msrb.mxu2 %v2112_v8  ;;  %2219 = vmatpush.msrb.mxu3 %v2176_v10  ;;  %v2120_v7 = vld [vmem:[#allocation8 + $0xa00] sm:$0xff]  ;;  %v2057_v8 = vld [vmem:[#allocation8 + $0x808] sm:$0xff] }
 0x23a   : > { %2242 = vmatpush.msrb.mxu0 %v2113_v11  ;;  %2265 = vmatpush.msrb.mxu1 %v2177_v12  ;;  %v2121_v10 = vld [vmem:[#allocation8 + $0xa08] sm:$0xff]  ;;  %v2185_v11 = vrot.slane %v4538_v52, 2  ;;  %v2188_v12 = vrot.slane %v4540_v53, 2  ;;  %v2183_v52 = vld [vmem:[#allocation8 + $0xbf8] sm:$0xff]  ;;  %v2114_v53 = vld [vmem:[#allocation8 + $0x9d0] sm:$0xff] }
 0x23b   : > { %2197 = vmatpush.msrb.mxu2 %v2108_v13  ;;  %2220 = vmatpush.msrb.mxu3 %v2172_v14  ;;  %v2118_v13 = vld [vmem:[#allocation8 + $0x9f0] sm:$0xff] }
 0x23c   : > { %2243 = vmatpush.msrb.mxu0 %v2109_v15  ;;  %2266 = vmatpush.msrb.mxu1 %v2173_v16  ;;  %v2182_v14 = vld [vmem:[#allocation8 + $0xbf0] sm:$0xff]  ;;  %v2119_v15 = vld [vmem:[#allocation8 + $0x9f8] sm:$0xff] }
 0x23d   : > { %2198 = vmatpush.msrb.mxu2 %v2104_v17  ;;  %2221 = vmatpush.msrb.mxu3 %v2168_v18  ;;  %v2178_v16 = vld [vmem:[#allocation8 + $0xbd0] sm:$0xff]  ;;  %v2115_v17 = vld [vmem:[#allocation8 + $0x9d8] sm:$0xff] }
 0x23e   : > { %2244 = vmatpush.msrb.mxu0 %v2105_v9  ;;  %2267 = vmatpush.msrb.mxu1 %v2169_v19  ;;  %v2179_v18 = vld [vmem:[#allocation8 + $0xbd8] sm:$0xff]  ;;  %v2110_v9 = vld [vmem:[#allocation8 + $0x9b0] sm:$0xff] }
 0x23f   : > { %1982 = vmatmul.f32.gmra.mxu2 %v4542_v54  ;;  %2005 = vmatmul.f32.gmra.mxu3 %v4544_v55  ;;  %v2174_v19 = vld [vmem:[#allocation8 + $0xbb0] sm:$0xff] }
 0x240   : > { %2028 = vmatmul.f32.gmra.mxu0 %v4542_v54  ;;  %2051 = vmatmul.f32.gmra.mxu1 %v4544_v55  ;;  %v4603_v54 = vsel %vm2184_vm4, %v2185_v11, %v4595_v5  ;;  %v4606_v55 = vsel %vm2184_vm4, %v2188_v12, %v4598_v6  ;;  %v2071_v12 = vld [vmem:[#allocation8 + $0x878] sm:$0xff] }
 0x241   : > { %2199 = vmatpush.msrb.mxu2 %v2100_v20  ;;  %2222 = vmatpush.msrb.mxu3 %v2164_v21  ;;  %v2111_v20 = vld [vmem:[#allocation8 + $0x9b8] sm:$0xff] }
 0x242   : > { %2245 = vmatpush.msrb.mxu0 %v2101_v22  ;;  %2268 = vmatpush.msrb.mxu1 %v2165_v23  ;;  %v2175_v21 = vld [vmem:[#allocation8 + $0xbb8] sm:$0xff]  ;;  %v2106_v22 = vld [vmem:[#allocation8 + $0x990] sm:$0xff] }
 0x243   : > { %2200 = vmatpush.msrb.mxu2 %v2096_v24  ;;  %2223 = vmatpush.msrb.mxu3 %v2160_v25  ;;  %v2170_v23 = vld [vmem:[#allocation8 + $0xb90] sm:$0xff]  ;;  %v2107_v24 = vld [vmem:[#allocation8 + $0x998] sm:$0xff] }
 0x244   : > { %2246 = vmatpush.msrb.mxu0 %v2097_v26  ;;  %2269 = vmatpush.msrb.mxu1 %v2161_v27  ;;  %v2171_v25 = vld [vmem:[#allocation8 + $0xb98] sm:$0xff]  ;;  %v2102_v26 = vld [vmem:[#allocation8 + $0x970] sm:$0xff] }
 0x245   : > { %2201 = vmatpush.msrb.mxu2 %v2092_v28  ;;  %2224 = vmatpush.msrb.mxu3 %v2156_v29  ;;  %v2166_v27 = vld [vmem:[#allocation8 + $0xb70] sm:$0xff]  ;;  %v2103_v28 = vld [vmem:[#allocation8 + $0x978] sm:$0xff] }
 0x246   : > { %2247 = vmatpush.msrb.mxu0 %v2093_v30  ;;  %2270 = vmatpush.msrb.mxu1 %v2157_v37  ;;  %v2167_v29 = vld [vmem:[#allocation8 + $0xb78] sm:$0xff]  ;;  %v2098_v30 = vld [vmem:[#allocation8 + $0x950] sm:$0xff] }
 0x247   : > { %2202 = vmatpush.msrb.mxu2 %v2088_v38  ;;  %2225 = vmatpush.msrb.mxu3 %v2152_v33  ;;  %v2162_v37 = vld [vmem:[#allocation8 + $0xb50] sm:$0xff]  ;;  %v2099_v38 = vld [vmem:[#allocation8 + $0x958] sm:$0xff] }
 0x248   : > { %2248 = vmatpush.msrb.mxu0 %v2089_v35  ;;  %2271 = vmatpush.msrb.mxu1 %v2153_v36  ;;  %v2163_v33 = vld [vmem:[#allocation8 + $0xb58] sm:$0xff]  ;;  %v2094_v35 = vld [vmem:[#allocation8 + $0x930] sm:$0xff] }
 0x249   : > { %2203 = vmatpush.msrb.mxu2 %v2084_v41  ;;  %2226 = vmatpush.msrb.mxu3 %v2148_v42  ;;  %v2158_v36 = vld [vmem:[#allocation8 + $0xb30] sm:$0xff]  ;;  %v2095_v41 = vld [vmem:[#allocation8 + $0x938] sm:$0xff] }
 0x24a   : > { %2249 = vmatpush.msrb.mxu0 %v2085_v43  ;;  %2272 = vmatpush.msrb.mxu1 %v2149_v31  ;;  %v2159_v42 = vld [vmem:[#allocation8 + $0xb38] sm:$0xff] }
 0x24b   : > { %2204 = vmatpush.msrb.mxu2 %v2080_v32  ;;  %2227 = vmatpush.msrb.mxu3 %v2144_v44  ;;  %v2090_v32 = vld [vmem:[#allocation8 + $0x910] sm:$0xff] }
 0x24c   : > { %2250 = vmatpush.msrb.mxu0 %v2081_v34  ;;  %2273 = vmatpush.msrb.mxu1 %v2145_v45  ;;  %v2154_v44 = vld [vmem:[#allocation8 + $0xb10] sm:$0xff]  ;;  %v2091_v45 = vld [vmem:[#allocation8 + $0x918] sm:$0xff] }
 0x24d   : > { %2205 = vmatpush.msrb.mxu2 %v2076_v46  ;;  %2228 = vmatpush.msrb.mxu3 %v2140_v47  ;;  %v2155_v46 = vld [vmem:[#allocation8 + $0xb18] sm:$0xff]  ;;  %v2086_v47 = vld [vmem:[#allocation8 + $0x8f0] sm:$0xff] }
 0x24e   : > { %2251 = vmatpush.msrb.mxu0 %v2077_v48  ;;  %2274 = vmatpush.msrb.mxu1 %v2141_v49  ;;  %v2150_v48 = vld [vmem:[#allocation8 + $0xaf0] sm:$0xff]  ;;  %v2087_v49 = vld [vmem:[#allocation8 + $0x8f8] sm:$0xff] }
 0x24f   : > { %2206 = vmatpush.msrb.mxu2 %v2072_v50  ;;  %2229 = vmatpush.msrb.mxu3 %v2136_v51  ;;  %v2151_v50 = vld [vmem:[#allocation8 + $0xaf8] sm:$0xff]  ;;  %v2082_v51 = vld [vmem:[#allocation8 + $0x8d0] sm:$0xff] }
 0x250   : > { %2252 = vmatpush.msrb.mxu0 %v2073_v40  ;;  %2275 = vmatpush.msrb.mxu1 %v2137_v59  ;;  %v2146_v40 = vld [vmem:[#allocation8 + $0xad0] sm:$0xff] }
 0x251   : > { %2207 = vmatpush.msrb.mxu2 %v2068_v57  ;;  %2230 = vmatpush.msrb.mxu3 %v2132_v60  ;;  %v2083_v60 = vld [vmem:[#allocation8 + $0x8d8] sm:$0xff] }
 0x252   : > { %2253 = vmatpush.msrb.mxu0 %v2069_v61  ;;  %2276 = vmatpush.msrb.mxu1 %v2133_v63  ;;  %v2147_v61 = vld [vmem:[#allocation8 + $0xad8] sm:$0xff] }
 0x253   : > { %2208 = vmatpush.msrb.mxu2 %v2064_v0  ;;  %2231 = vmatpush.msrb.mxu3 %v2128_v56  ;;  %v2078_v0 = vld [vmem:[#allocation8 + $0x8b0] sm:$0xff] }
 0x254   : > { %2254 = vmatpush.msrb.mxu0 %v2065_v58  ;;  %2277 = vmatpush.msrb.mxu1 %v2129_v1  ;;  %v2142_v56 = vld [vmem:[#allocation8 + $0xab0] sm:$0xff]  ;;  %v2079_v58 = vld [vmem:[#allocation8 + $0x8b8] sm:$0xff] }
 0x255   : > { %2209 = vmatpush.msrb.mxu2 %v2060_v2  ;;  %2232 = vmatpush.msrb.mxu3 %v2124_v3  ;;  %v2143_v1 = vld [vmem:[#allocation8 + $0xab8] sm:$0xff]  ;;  %v2074_v2 = vld [vmem:[#allocation8 + $0x890] sm:$0xff] }
 0x256   : > { %2255 = vmatpush.msrb.mxu0 %v2061_v4  ;;  %2278 = vmatpush.msrb.mxu1 %v2125_v62  ;;  %v2138_v3 = vld [vmem:[#allocation8 + $0xa90] sm:$0xff]  ;;  %v2075_v4 = vld [vmem:[#allocation8 + $0x898] sm:$0xff] }
 0x257   : > { %2210 = vmatpush.msrb.mxu2 %v2056_v39  ;;  %2233 = vmatpush.msrb.mxu3 %v2120_v7  ;;  %v2139_v62 = vld [vmem:[#allocation8 + $0xa98] sm:$0xff] }
 0x258   : > { %2256 = vmatpush.msrb.mxu0 %v2057_v8  ;;  %2279 = vmatpush.msrb.mxu1 %v2121_v10  ;;  %v2070_v8 = vld [vmem:[#allocation8 + $0x870] sm:$0xff] }
 0x259   : > { %2211 = vmatmul.f32.vlgmr.msrb.gmra.mxu2 %v4603_v54  ;;  %2234 = vmatmul.f32.vlgmr.msrb.gmra.mxu3 %v4606_v55  ;;  %v2134_v10 = vld [vmem:[#allocation8 + $0xa70] sm:$0xff] }
 0x25a   : > { %2257 = vmatmul.f32.vlgmr.msrb.gmra.mxu0 %v4603_v54  ;;  %2280 = vmatmul.f32.vlgmr.msrb.gmra.mxu1 %v4606_v55 }
 0x25b   : > { %2287 = vmatpush.msra.mxu2 %v2118_v13  ;;  %2310 = vmatpush.msra.mxu3 %v2182_v14  ;;  %v2135_v13 = vld [vmem:[#allocation8 + $0xa78] sm:$0xff]  ;;  %v2066_v14 = vld [vmem:[#allocation8 + $0x850] sm:$0xff] }
 0x25c   : > { %2333 = vmatpush.msra.mxu0 %v2119_v15  ;;  %2356 = vmatpush.msra.mxu1 %v2183_v52  ;;  %v2130_v15 = vld [vmem:[#allocation8 + $0xa50] sm:$0xff]  ;;  %v2067_v52 = vld [vmem:[#allocation8 + $0x858] sm:$0xff] }
 0x25d   : > { %2288 = vmatpush.msra.mxu2 %v2114_v53  ;;  %2311 = vmatpush.msra.mxu3 %v2178_v16  ;;  %v2131_v53 = vld [vmem:[#allocation8 + $0xa58] sm:$0xff]  ;;  %v2062_v16 = vld [vmem:[#allocation8 + $0x830] sm:$0xff] }
 0x25e   : > { %2334 = vmatpush.msra.mxu0 %v2115_v17  ;;  %2357 = vmatpush.msra.mxu1 %v2179_v18  ;;  %v2126_v17 = vld [vmem:[#allocation8 + $0xa30] sm:$0xff] }
 0x25f   : > { %2289 = vmatpush.msra.mxu2 %v2110_v9  ;;  %2312 = vmatpush.msra.mxu3 %v2174_v19  ;;  %v2063_v19 = vld [vmem:[#allocation8 + $0x838] sm:$0xff] }
 0x260   : > { %2335 = vmatpush.msra.mxu0 %v2111_v20  ;;  %2358 = vmatpush.msra.mxu1 %v2175_v21  ;;  %v2127_v20 = vld [vmem:[#allocation8 + $0xa38] sm:$0xff] }
 0x261   : > { %2290 = vmatpush.msra.mxu2 %v2106_v22  ;;  %2313 = vmatpush.msra.mxu3 %v2170_v23  ;;  %v2058_v22 = vld [vmem:[#allocation8 + $0x810] sm:$0xff] }
 0x262   : > { %2336 = vmatpush.msra.mxu0 %v2107_v24  ;;  %2359 = vmatpush.msra.mxu1 %v2171_v25  ;;  %v2122_v23 = vld [vmem:[#allocation8 + $0xa10] sm:$0xff]  ;;  %v2059_v24 = vld [vmem:[#allocation8 + $0x818] sm:$0xff] }
 0x263   : > { %2214 = vmatmul.f32.gmra.mxu2 %v4595_v5  ;;  %2237 = vmatmul.f32.gmra.mxu3 %v4598_v6  ;;  %v2123_v25 = vld [vmem:[#allocation8 + $0xa18] sm:$0xff] }
 0x264   : > { %2260 = vmatmul.f32.gmra.mxu0 %v4595_v5  ;;  %2283 = vmatmul.f32.gmra.mxu1 %v4598_v6 }
 0x265   : > { %2291 = vmatpush.msra.mxu2 %v2102_v26  ;;  %2314 = vmatpush.msra.mxu3 %v2166_v27 }
 0x266   : > { %2337 = vmatpush.msra.mxu0 %v2103_v28  ;;  %2360 = vmatpush.msra.mxu1 %v2167_v29  ;;  %v1750_v43 = vpop.f32.mrf.mxu0 }
 0x267   : > { %2292 = vmatpush.msra.mxu2 %v2098_v30  ;;  %2315 = vmatpush.msra.mxu3 %v2162_v37  ;;  %v1773_v31 = vpop.f32.mrf.mxu1 }
 0x268   : > { %2338 = vmatpush.msra.mxu0 %v2099_v38  ;;  %2361 = vmatpush.msra.mxu1 %v2163_v33  ;;  %v4616_v34 = vadd.f32 %v1773_v31, %v1750_v43 }
 0x269   : > { %2293 = vmatpush.msra.mxu2 %v2094_v35  ;;  %2316 = vmatpush.msra.mxu3 %v2158_v36 }
 0x26a   : > { %2339 = vmatpush.msra.mxu0 %v2095_v41  ;;  %2362 = vmatpush.msra.mxu1 %v2159_v42 }
 0x26b   : > { %2294 = vmatpush.msra.mxu2 %v2090_v32  ;;  %2317 = vmatpush.msra.mxu3 %v2154_v44 }
 0x26c   : > { %2340 = vmatpush.msra.mxu0 %v2091_v45  ;;  %2363 = vmatpush.msra.mxu1 %v2155_v46  ;;  %v1704_v59 = vpop.f32.mrf.mxu2 }
 0x26d   : > { %v1727_v57 = vpop.f32.mrf.mxu3  ;;  %2295 = vmatpush.msra.mxu2 %v2086_v47  ;;  %2318 = vmatpush.msra.mxu3 %v2150_v48 }
 0x26e   : > { %v4618_v63 = vadd.f32 %v1727_v57, %v1704_v59  ;;  %2341 = vmatpush.msra.mxu0 %v2087_v49  ;;  %2364 = vmatpush.msra.mxu1 %v2151_v50 }
 0x26f   : > { %2296 = vmatpush.msra.mxu2 %v2082_v51  ;;  %2319 = vmatpush.msra.mxu3 %v2146_v40 }
 0x270   : > { %2342 = vmatpush.msra.mxu0 %v2083_v60  ;;  %2365 = vmatpush.msra.mxu1 %v2147_v61 }
 0x271   : > { %2297 = vmatpush.msra.mxu2 %v2078_v0  ;;  %2320 = vmatpush.msra.mxu3 %v2142_v56  ;;  %v1753_v39 = vpop.f32.mrf.mxu0  ;;  %v1776_v7 = vpop.f32.mrf.mxu1 }
 0x272   : > { %2343 = vmatpush.msra.mxu0 %v2079_v58  ;;  %2366 = vmatpush.msra.mxu1 %v2143_v1  ;;  %v4620_v11 = vadd.f32 %v1776_v7, %v1753_v39  ;;  %v2537_v39 = vld [vmem:[#allocation13 + $0x1e8] sm:$0xff] }
 0x273   : > { %2298 = vmatpush.msra.mxu2 %v2074_v2  ;;  %2321 = vmatpush.msra.mxu3 %v2138_v3  ;;  %v2539_v3 = vld [vmem:[#allocation13 + $0x1f8] sm:$0xff] }
 0x274   : > { %2344 = vmatpush.msra.mxu0 %v2075_v4  ;;  %2367 = vmatpush.msra.mxu1 %v2139_v62 }
 0x275   : > { %2299 = vmatpush.msra.mxu2 %v2070_v8  ;;  %2322 = vmatpush.msra.mxu3 %v2134_v10 }
 0x276   : > { %2345 = vmatpush.msra.mxu0 %v2071_v12  ;;  %2368 = vmatpush.msra.mxu1 %v2135_v13  ;;  %v1707_v18 = vpop.f32.mrf.mxu2  ;;  %v1730_v9 = vpop.f32.mrf.mxu3  ;;  %v2535_v12 = vld [vmem:[#allocation13 + $0x1d8] sm:$0xff] }
 0x277   : > { %2300 = vmatpush.msra.mxu2 %v2066_v14  ;;  %2323 = vmatpush.msra.mxu3 %v2130_v15  ;;  %v4622_v21 = vadd.f32 %v1730_v9, %v1707_v18  ;;  %v2507_v13 = vld [vmem:[#allocation13 + $0xf8] sm:$0xff]  ;;  %v4652_v9 = vld [vmem:[#allocation10] sm:$0x3] }
 0x278   : > { %2346 = vmatpush.msra.mxu0 %v2067_v52  ;;  %2369 = vmatpush.msra.mxu1 %v2131_v53 }
 0x279   : > { %2301 = vmatpush.msra.mxu2 %v2062_v16  ;;  %2324 = vmatpush.msra.mxu3 %v2126_v17  ;;  %v2533_v16 = vld [vmem:[#allocation13 + $0x1c8] sm:$0xff] }
 0x27a   : > { %2347 = vmatpush.msra.mxu0 %v2063_v19  ;;  %2370 = vmatpush.msra.mxu1 %v2127_v20  ;;  %v2505_v17 = vld [vmem:[#allocation13 + $0xe8] sm:$0xff] }
 0x27b   : > { %2302 = vmatpush.msra.mxu2 %v2058_v22  ;;  %2325 = vmatpush.msra.mxu3 %v2122_v23  ;;  %v1842_v26 = vpop.f32.mrf.mxu0  ;;  %v1865_v27 = vpop.f32.mrf.mxu1 }
 0x27c   : > { %2348 = vmatpush.msra.mxu0 %v2059_v24  ;;  %2371 = vmatpush.msra.mxu1 %v2123_v25  ;;  %v1866_v28 = vadd.f32 %v1865_v27, %v1842_v26  ;;  %v2503_v25 = vld [vmem:[#allocation13 + $0xd8] sm:$0xff] }
 0x27d   : > { %2303 = vmatmul.f32.vlgmr.msra.gmra.mxu2 %v4603_v54  ;;  %2326 = vmatmul.f32.vlgmr.msra.gmra.mxu3 %v4606_v55 }
 0x27e   : > { %2349 = vmatmul.f32.vlgmr.msra.gmra.mxu0 %v4603_v54  ;;  %2372 = vmatmul.f32.vlgmr.msra.gmra.mxu1 %v4606_v55 }
 0x27f   : > { %2600 = vmatpush.msrb.mxu1 %v2539_v3  ;;  %2580 = vmatpush.msrb.mxu0 %v2507_v13 }
 0x280   : > { %v1796_v29 = vpop.f32.mrf.mxu2  ;;  %v1819_v30 = vpop.f32.mrf.mxu3 }
 0x281   : > { %v1820_v37 = vadd.f32 %v1819_v30, %v1796_v29  ;;  %2601 = vmatpush.msrb.mxu1 %v2537_v39  ;;  %2581 = vmatpush.msrb.mxu0 %v2505_v17  ;;  %v2394_v30 = vperm.slane %v4652_v9, 1  ;;  %v2515_v17 = vld [vmem:[#allocation13 + $0x138] sm:$0xff] }
 0x283   : > { %2602 = vmatpush.msrb.mxu1 %v2535_v12  ;;  %2582 = vmatpush.msrb.mxu0 %v2503_v25  ;;  %v2491_v12 = vld [vmem:[#allocation13 + $0x78] sm:$0xff]  ;;  %v2538_v25 = vld [vmem:[#allocation13 + $0x1f0] sm:$0xff] }
 0x285   : > { %2306 = vmatmul.f32.gmra.mxu2 %v4595_v5  ;;  %2329 = vmatmul.f32.gmra.mxu3 %v4598_v6  ;;  %v1845_v38 = vpop.f32.mrf.mxu0  ;;  %v1868_v33 = vpop.f32.mrf.mxu1 }
 0x286   : > { %2352 = vmatmul.f32.gmra.mxu0 %v4595_v5  ;;  %2375 = vmatmul.f32.gmra.mxu1 %v4598_v6 }
 0x287   : > { %2603 = vmatpush.msrb.mxu1 %v2533_v16 }
 0x28a   : > { %v4632_v35 = vpop.f32.mrf.mxu2  ;;  %v4634_v36 = vpop.f32.mrf.mxu3 }
 0x291   : > { %v1934_v54 = vpop.f32.mrf.mxu0  ;;  %v1957_v41 = vpop.f32.mrf.mxu1 }
 0x292   : > { %v1935_v0 = vadd.f32 %v1934_v54, %v4616_v34  ;;  %v1869_v34 = vadd.f32 %v1868_v33, %v1845_v38  ;;  %v2501_v38 = vld [vmem:[#allocation13 + $0xc8] sm:$0xff]  ;;  %v1823_v33 = vadd.f32 %v4634_v36, %v4632_v35 }
 0x293   : > { %2583 = vmatpush.msrb.mxu0 %v2501_v38 }
 0x294   : > { %v1958_v7 = vadd.f32 %v1957_v41, %v1935_v0 }
 0x296   : > { %v1888_v55 = vpop.f32.mrf.mxu2  ;;  %v1911_v42 = vpop.f32.mrf.mxu3 }
 0x297   : > { %v1889_v14 = vadd.f32 %v1888_v55, %v4618_v63  ;;  %v2531_v63 = vld [vmem:[#allocation13 + $0x1b8] sm:$0xff] }
 0x298   : > { %2604 = vmatpush.msrb.mxu1 %v2531_v63 }
 0x299   : > { %v1912_v26 = vadd.f32 %v1911_v42, %v1889_v14  ;;  %v2517_v14 = vld [vmem:[#allocation13 + $0x148] sm:$0xff] }
 0x29b   : > { %v1937_v43 = vpop.f32.mrf.mxu0  ;;  %v4636_v31 = vpop.f32.mrf.mxu1 }
 0x29c   : > { %v1938_v19 = vadd.f32 %v1937_v43, %v4620_v11 }
 0x29e   : > { %v1961_v42 = vadd.f32 %v4636_v31, %v1938_v19 }
 0x2a0   : > { %v4638_v32 = vpop.f32.mrf.mxu2  ;;  %v4640_v44 = vpop.f32.mrf.mxu3 }
 0x2b3   : > { %v2026_v5 = vpop.f32.mrf.mxu0  ;;  %v2049_v45 = vpop.f32.mrf.mxu1 }
 0x2b4   : > { %v2027_v56 = vadd.f32 %v2026_v5, %v1866_v28 }
 0x2b6   : > { %v2050_v8 = vadd.f32 %v2049_v45, %v2027_v56  ;;  %v2527_v45 = vld [vmem:[#allocation13 + $0x198] sm:$0xff] }
 0x2b8   : > { %v1980_v6 = vpop.f32.mrf.mxu2  ;;  %v2003_v46 = vpop.f32.mrf.mxu3 }
 0x2b9   : > { %v1981_v15 = vadd.f32 %v1980_v6, %v1820_v37  ;;  %v2529_v37 = vld [vmem:[#allocation13 + $0x1a8] sm:$0xff]  ;;  %v2499_v6 = vld [vmem:[#allocation13 + $0xb8] sm:$0xff] }
 0x2ba   : > { %2605 = vmatpush.msrb.mxu1 %v2529_v37  ;;  %2584 = vmatpush.msrb.mxu0 %v2499_v6  ;;  %v2481_v37 = vld [vmem:[#allocation13 + $0x28] sm:$0xff] }
 0x2bb   : > { %v2004_v27 = vadd.f32 %v2003_v46, %v1981_v15  ;;  %v1892_v46 = vadd.f32 %v4638_v32, %v4622_v21  ;;  %v2523_v32 = vld [vmem:[#allocation13 + $0x178] sm:$0xff]  ;;  %v2489_v15 = vld [vmem:[#allocation13 + $0x68] sm:$0xff] }
 0x2bc   : > { %2606 = vmatpush.msrb.mxu1 %v2527_v45  ;;  %v2530_v45 = vld [vmem:[#allocation13 + $0x1b0] sm:$0xff]  ;;  %v2477_v6 = vld [vmem:[#allocation13 + $0x8] sm:$0xff] }
 0x2bd   : > { %v2029_v47 = vpop.f32.mrf.mxu0  ;;  %v2052_v48 = vpop.f32.mrf.mxu1  ;;  %v1915_v0 = vadd.f32 %v4640_v44, %v1892_v46  ;;  %v2502_v46 = vld [vmem:[#allocation13 + $0xd0] sm:$0xff] }
 0x2be   : > { %v2030_v20 = vadd.f32 %v2029_v47, %v1869_v34 }
 0x2c0   : > { %v2053_v43 = vadd.f32 %v2052_v48, %v2030_v20  ;;  %v2393_v48 = vperm.slane %v4652_v9, 0  ;;  %v2423_v20 = vld [vmem:[#allocation11] sm:$0x1f] }
 0x2c2   : > { %v4642_v49 = vpop.f32.mrf.mxu2  ;;  %v4644_v50 = vpop.f32.mrf.mxu3 }
 0x2c3   : > { %v1984_v47 = vadd.f32 %v4642_v49, %v1823_v33  ;;  %v2495_v49 = vld [vmem:[#allocation13 + $0x98] sm:$0xff]  ;;  %v2509_v33 = vld [vmem:[#allocation13 + $0x108] sm:$0xff] }
 0x2c5   : > { %v2007_v56 = vadd.f32 %v4644_v50, %v1984_v47  ;;  %v2686_v47 = vld [vmem:[#allocation13 + $0x3d8] sm:$0xff] }
 0x2d7   : > { %v2258_v51 = vpop.f32.mrf.mxu0  ;;  %v2281_v40 = vpop.f32.mrf.mxu1 }
 0x2d8   : > { %v2282_v2 = vadd.f32 %v2281_v40, %v2258_v51 }
 0x2da   : > { %v2380_v52 = vadd.f32 %v2282_v2, %v1958_v7 }
 0x2dc   : > { %v2212_v59 = vpop.f32.mrf.mxu2  ;;  %v2235_v57 = vpop.f32.mrf.mxu3 }
 0x2dd   : > { %v2236_v18 = vadd.f32 %v2235_v57, %v2212_v59  ;;  %v2525_v59 = vld [vmem:[#allocation13 + $0x188] sm:$0xff] }
 0x2de   : > { %v2497_v57 = vld [vmem:[#allocation13 + $0xa8] sm:$0xff]  ;;  %2607 = vmatpush.msrb.mxu1 %v2525_v59  ;;  %v2526_v59 = vld [vmem:[#allocation13 + $0x190] sm:$0xff] }
 0x2df   : > { %v2379_v11 = vadd.f32 %v2236_v18, %v1912_v26  ;;  %2585 = vmatpush.msrb.mxu0 %v2497_v57  ;;  %v2487_v18 = vld [vmem:[#allocation13 + $0x58] sm:$0xff]  ;;  %v2656_v57 = vld [vmem:[#allocation13 + $0x2e8] sm:$0xff] }
 0x2e0   : > { %2608 = vmatpush.msrb.mxu1 %v2523_v32  ;;  %v2511_v26 = vld [vmem:[#allocation13 + $0x118] sm:$0xff]  ;;  %v2680_v32 = vld [vmem:[#allocation13 + $0x3a8] sm:$0xff] }
 0x2e1   : > { %v2261_v60 = vpop.f32.mrf.mxu0  ;;  %v2284_v61 = vpop.f32.mrf.mxu1  ;;  %2586 = vmatpush.msrb.mxu0 %v2495_v49  ;;  %v2522_v49 = vld [vmem:[#allocation13 + $0x170] sm:$0xff] }
 0x2e2   : > { %v2285_v29 = vadd.f32 %v2284_v61, %v2261_v60 }
 0x2e4   : > { %v2384_v35 = vadd.f32 %v2285_v29, %v1961_v42  ;;  %v2479_v42 = vld [vmem:[#allocation13 + $0x18] sm:$0xff] }
 0x2e6   : > { %v4647_v58 = vpop.f32.mrf.mxu2  ;;  %v4649_v1 = vpop.f32.mrf.mxu3 }
 0x2e7   : > { %v2239_v31 = vadd.f32 %v4649_v1, %v4647_v58  ;;  %v2493_v58 = vld [vmem:[#allocation13 + $0x88] sm:$0xff] }
 0x2e8   : > { %2587 = vmatpush.msrb.mxu0 %v2493_v58  ;;  %v2676_v58 = vld [vmem:[#allocation13 + $0x388] sm:$0xff] }
 0x2e9   : > { %v2383_v1 = vadd.f32 %v2239_v31, %v1915_v0  ;;  %v2498_v31 = vld [vmem:[#allocation13 + $0xb0] sm:$0xff]  ;;  %v2652_v0 = vld [vmem:[#allocation13 + $0x2c8] sm:$0xff] }
 0x2ea   : > { %2588 = vmatpush.msrb.mxu0 %v2491_v12  ;;  %v2646_v12 = vld [vmem:[#allocation13 + $0x298] sm:$0xff] }
 0x2ec   : > { %2589 = vmatpush.msrb.mxu0 %v2489_v15  ;;  %v2486_v15 = vld [vmem:[#allocation13 + $0x50] sm:$0xff] }
 0x2ee   : > { %2590 = vmatpush.msrb.mxu0 %v2487_v18  ;;  %v2510_v18 = vld [vmem:[#allocation13 + $0x110] sm:$0xff] }
 0x2fb   : > { %v2350_v4 = vpop.f32.mrf.mxu0  ;;  %v2373_v62 = vpop.f32.mrf.mxu1 }
 0x2fc   : > { %v2374_v10 = vadd.f32 %v2373_v62, %v2350_v4  ;;  %v2521_v62 = vld [vmem:[#allocation13 + $0x168] sm:$0xff] }
 0x2fd   : > { %2609 = vmatpush.msrb.mxu1 %v2521_v62  ;;  %v2492_v62 = vld [vmem:[#allocation13 + $0x80] sm:$0xff] }
 0x2fe   : > { %v2382_v53 = vadd.f32 %v2374_v10, %v2050_v8  ;;  %v2519_v10 = vld [vmem:[#allocation13 + $0x158] sm:$0xff] }
 0x2ff   : > { %2610 = vmatpush.msrb.mxu1 %v2519_v10  ;;  %v2516_v10 = vld [vmem:[#allocation13 + $0x140] sm:$0xff] }
 0x300   : > { %v2388_v22 = vmax.f32 %v2380_v52, %v2382_v53  ;;  %v2304_v23 = vpop.f32.mrf.mxu2  ;;  %v2327_v24 = vpop.f32.mrf.mxu3 }
 0x301   : > { %v2328_v28 = vadd.f32 %v2327_v24, %v2304_v23  ;;  %2611 = vmatpush.msrb.mxu1 %v2517_v14  ;;  %v2485_v23 = vld [vmem:[#allocation13 + $0x48] sm:$0xff] }
 0x302   : > { %v2398_v40 = vadd.f32 %v2394_v30, %v2388_v22  ;;  %v2513_v22 = vld [vmem:[#allocation13 + $0x128] sm:$0xff]  ;;  %2591 = vmatpush.msrb.mxu0 %v2485_v23  ;;  %v2638_v23 = vld [vmem:[#allocation13 + $0x258] sm:$0xff] }
 0x303   : > { %v2381_v54 = vadd.f32 %v2328_v28, %v2004_v27  ;;  %v2353_v41 = vpop.f32.mrf.mxu0  ;;  %v2376_v55 = vpop.f32.mrf.mxu1  ;;  %2612 = vmatpush.msrb.mxu1 %v2515_v17  ;;  %v2483_v27 = vld [vmem:[#allocation13 + $0x38] sm:$0xff]  ;;  %v2644_v14 = vld [vmem:[#allocation13 + $0x288] sm:$0xff] }
 0x304   : > { %v2377_v5 = vadd.f32 %v2376_v55, %v2353_v41  ;;  %v2402_v4 = vmax.f32 %v2398_v40, 0.0  ;;  %2592 = vmatpush.msrb.mxu0 %v2483_v27  ;;  %v2690_v41 = vld [vmem:[#allocation13 + $0x3f8] sm:$0xff]  ;;  %v2532_v55 = vld [vmem:[#allocation13 + $0x1c0] sm:$0xff]  ;;  %v2684_v40 = vld [vmem:[#allocation13 + $0x3c8] sm:$0xff] }
 0x305   : > { %v2387_v51 = vmax.f32 %v2379_v11, %v2381_v54  ;;  %2613 = vmatpush.msrb.mxu1 %v2513_v22  ;;  %v2534_v11 = vld [vmem:[#allocation13 + $0x1d0] sm:$0xff]  ;;  %v2668_v17 = vld [vmem:[#allocation13 + $0x348] sm:$0xff]  ;;  %v2508_v22 = vld [vmem:[#allocation13 + $0x100] sm:$0xff] }
 0x306   : > { %v2386_v36 = vadd.f32 %v2377_v5, %v2053_v43  ;;  %v2412_v50 = vrot.slane %v2402_v4, 1  ;;  %v2506_v54 = vld [vmem:[#allocation13 + $0xf0] sm:$0xff]  ;;  %2593 = vmatpush.msrb.mxu0 %v2481_v37  ;;  %v2504_v43 = vld [vmem:[#allocation13 + $0xe0] sm:$0xff]  ;;  %v2688_v5 = vld [vmem:[#allocation13 + $0x3e8] sm:$0xff] }
 0x307   : > { %v2397_v7 = vadd.f32 %v2393_v48, %v2387_v51  ;;  %2614 = vmatpush.msrb.mxu1 %v2511_v26  ;;  %v2528_v51 = vld [vmem:[#allocation13 + $0x1a0] sm:$0xff]  ;;  %v2636_v26 = vld [vmem:[#allocation13 + $0x248] sm:$0xff] }
 0x308   : > { %v2390_v60 = vmax.f32 %v2384_v35, %v2386_v36  ;;  %v2307_v61 = vpop.f32.mrf.mxu2  ;;  %v2330_v21 = vpop.f32.mrf.mxu3  ;;  %2594 = vmatpush.msrb.mxu0 %v2479_v42  ;;  %v2658_v35 = vld [vmem:[#allocation13 + $0x2f8] sm:$0xff]  ;;  %v2500_v36 = vld [vmem:[#allocation13 + $0xc0] sm:$0xff] }
 0x309   : > { %v2331_v2 = vadd.f32 %v2330_v21, %v2307_v61  ;;  %v2401_v52 = vmax.f32 %v2397_v7, 0.0  ;;  %2615 = vmatpush.msrb.mxu1 %v2509_v33  ;;  %v2654_v61 = vld [vmem:[#allocation13 + $0x2d8] sm:$0xff]  ;;  %v2496_v21 = vld [vmem:[#allocation13 + $0xa0] sm:$0xff]  ;;  %v2490_v7 = vld [vmem:[#allocation13 + $0x70] sm:$0xff] }
 0x30a   : > { %v2400_v3 = vadd.f32 %v2394_v30, %v2390_v60  ;;  %v2536_v30 = vld [vmem:[#allocation13 + $0x1e0] sm:$0xff]  ;;  %2595 = vmatpush.msrb.mxu0 %v2477_v6 }
 0x30b   : > { %v2385_v39 = vadd.f32 %v2331_v2, %v2007_v56  ;;  %v2409_v63 = vrot.slane %v2401_v52, 1  ;;  %2757 = vmatpush.msra.mxu1 %v2690_v41  ;;  %v2524_v60 = vld [vmem:[#allocation13 + $0x180] sm:$0xff]  ;;  %v2494_v56 = vld [vmem:[#allocation13 + $0x90] sm:$0xff]  ;;  %v2678_v2 = vld [vmem:[#allocation13 + $0x398] sm:$0xff] }
 0x30c   : > { %v2404_v8 = vmax.f32 %v2400_v3, 0.0  ;;  %2737 = vmatpush.msra.mxu0 %v2658_v35  ;;  %v2520_v3 = vld [vmem:[#allocation13 + $0x160] sm:$0xff]  ;;  %v2653_v41 = vld [vmem:[#allocation13 + $0x2d0] sm:$0xff] }
 0x30d   : > { %v2389_v13 = vmax.f32 %v2383_v1, %v2385_v39  ;;  %2758 = vmatpush.msra.mxu1 %v2688_v5  ;;  %v2518_v1 = vld [vmem:[#allocation13 + $0x150] sm:$0xff]  ;;  %v2648_v39 = vld [vmem:[#allocation13 + $0x2a8] sm:$0xff]  ;;  %v2687_v27 = vld [vmem:[#allocation13 + $0x3e0] sm:$0xff] }
 0x30e   : > { %v2413_v44 = vrot.slane %v2404_v8, 1  ;;  %2738 = vmatpush.msra.mxu0 %v2656_v57  ;;  %v2476_v37 = vld [vmem:[#allocation13] sm:$0xff]  ;;  %v2649_v5 = vld [vmem:[#allocation13 + $0x2b0] sm:$0xff] }
 0x30f   : > { %v2399_v34 = vadd.f32 %v2393_v48, %v2389_v13  ;;  %2759 = vmatpush.msra.mxu1 %v2686_v47  ;;  %v2682_v48 = vld [vmem:[#allocation13 + $0x3b8] sm:$0xff]  ;;  %v2488_v13 = vld [vmem:[#allocation13 + $0x60] sm:$0xff]  ;;  %v2645_v47 = vld [vmem:[#allocation13 + $0x290] sm:$0xff] }
 0x310   : > { %v2422_v53 = vmax.f32 %v2404_v8, %v2413_v44  ;;  %v2414_v16 = vsel %vm1332_vm2, %v2412_v50, %v2413_v44  ;;  %2739 = vmatpush.msra.mxu0 %v2654_v61  ;;  %v2674_v8 = vld [vmem:[#allocation13 + $0x378] sm:$0xff]  ;;  %v2672_v44 = vld [vmem:[#allocation13 + $0x368] sm:$0xff]  ;;  %v2514_v50 = vld [vmem:[#allocation13 + $0x130] sm:$0xff] }
 0x311   : > { %v2403_v9 = vmax.f32 %v2399_v34, 0.0  ;;  %v2420_v19 = vmax.f32 %v2402_v4, %v2414_v16  ;;  %2760 = vmatpush.msra.mxu1 %v2684_v40  ;;  %v2650_v4 = vld [vmem:[#allocation13 + $0x2b8] sm:$0xff]  ;;  %v2484_v16 = vld [vmem:[#allocation13 + $0x40] sm:$0xff]  ;;  %v2641_v40 = vld [vmem:[#allocation13 + $0x270] sm:$0xff] }
 0x312   : > { %3607 = vmatpush.msk.msrb.mxu3 %vm2428_vm5, %v2422_v53  ;;  %2740 = vmatpush.msra.mxu0 %v2652_v0  ;;  %v2670_v34 = vld [vmem:[#allocation13 + $0x358] sm:$0xff]  ;;  %v2683_v33 = vld [vmem:[#allocation13 + $0x3c0] sm:$0xff] }
 0x313   : > { %v2410_v24 = vrot.slane %v2403_v9, 1  ;;  %2761 = vmatpush.msra.mxu1 %v2682_v48  ;;  %v2642_v53 = vld [vmem:[#allocation13 + $0x278] sm:$0xff]  ;;  %v2651_v42 = vld [vmem:[#allocation13 + $0x2c0] sm:$0xff]  ;;  %v2637_v48 = vld [vmem:[#allocation13 + $0x250] sm:$0xff] }
 0x314   : > { %2470 = vmatpush.msrb.mxu3 %v2420_v19  ;;  %2741 = vmatpush.msra.mxu0 %v2650_v4  ;;  %v2482_v19 = vld [vmem:[#allocation13 + $0x30] sm:$0xff]  ;;  %v2647_v6 = vld [vmem:[#allocation13 + $0x2a0] sm:$0xff]  ;;  %v2634_v0 = vld [vmem:[#allocation13 + $0x238] sm:$0xff] }
 0x315   : > { %v2421_v28 = vmax.f32 %v2403_v9, %v2410_v24  ;;  %3608 = vmatmul.msk.f32.vlgmr.msrb.gmra.mxu3 %vm2424_vm6, %v2423_v20  ;;  %v2411_v29 = vsel %vm1332_vm2, %v2409_v63, %v2410_v24  ;;  %2762 = vmatpush.msra.mxu1 %v2680_v32  ;;  %v2640_v9 = vld [vmem:[#allocation13 + $0x268] sm:$0xff]  ;;  %v2689_v24 = vld [vmem:[#allocation13 + $0x3f0] sm:$0xff]  ;;  %v2480_v63 = vld [vmem:[#allocation13 + $0x20] sm:$0xff] }
 0x316   : > { %v2419_v38 = vmax.f32 %v2401_v52, %v2411_v29  ;;  %2560 = vmatpush.msra.mxu3 %v2538_v25  ;;  %2742 = vmatpush.msra.mxu0 %v2648_v39  ;;  %v2512_v52 = vld [vmem:[#allocation13 + $0x120] sm:$0xff]  ;;  %v2664_v25 = vld [vmem:[#allocation13 + $0x328] sm:$0xff]  ;;  %v2662_v29 = vld [vmem:[#allocation13 + $0x318] sm:$0xff] }
 0x317   : > { %3605 = vmatpush.msk.msrb.mxu2 %vm2428_vm5, %v2421_v28  ;;  %2763 = vmatpush.msra.mxu1 %v2678_v2  ;;  %v2478_v28 = vld [vmem:[#allocation13 + $0x10] sm:$0xff]  ;;  %v2643_v35 = vld [vmem:[#allocation13 + $0x280] sm:$0xff] }
 0x318   : > { %2561 = vmatpush.msra.mxu3 %v2536_v30  ;;  %2743 = vmatpush.msra.mxu0 %v2646_v12  ;;  %v2685_v30 = vld [vmem:[#allocation13 + $0x3d0] sm:$0xff]  ;;  %v2639_v57 = vld [vmem:[#allocation13 + $0x260] sm:$0xff]  ;;  %v2845_v12 = vld [vmem:[#allocation13 + $0x5e8] sm:$0xff] }
 0x319   : > { %2450 = vmatpush.msrb.mxu2 %v2419_v38  ;;  %2764 = vmatpush.msra.mxu1 %v2676_v58  ;;  %v2657_v38 = vld [vmem:[#allocation13 + $0x2f0] sm:$0xff]  ;;  %v2635_v61 = vld [vmem:[#allocation13 + $0x240] sm:$0xff] }
 0x31a   : > { %3606 = vmatmul.msk.f32.vlgmr.msrb.gmra.mxu2 %vm2424_vm6, %v2423_v20  ;;  %2562 = vmatpush.msra.mxu3 %v2534_v11  ;;  %v2666_v20 = vld [vmem:[#allocation13 + $0x338] sm:$0xff]  ;;  %v2655_v11 = vld [vmem:[#allocation13 + $0x2e0] sm:$0xff]  ;;  %v2633_v32 = vld [vmem:[#allocation13 + $0x230] sm:$0xff] }
 0x31b   : > { %2540 = vmatpush.msra.mxu2 %v2506_v54  ;;  %2765 = vmatpush.msra.mxu1 %v2674_v8  ;;  %v2681_v54 = vld [vmem:[#allocation13 + $0x3b0] sm:$0xff]  ;;  %v2631_v2 = vld [vmem:[#allocation13 + $0x220] sm:$0xff] }
 0x31c   : > { %2563 = vmatpush.msra.mxu3 %v2532_v55  ;;  %2744 = vmatpush.msra.mxu0 %v2644_v14  ;;  %v2679_v55 = vld [vmem:[#allocation13 + $0x3a0] sm:$0xff]  ;;  %v2629_v4 = vld [vmem:[#allocation13 + $0x210] sm:$0xff] }
 0x31d   : > { %2541 = vmatpush.msra.mxu2 %v2504_v43  ;;  %2766 = vmatpush.msra.mxu1 %v2672_v44  ;;  %v2677_v43 = vld [vmem:[#allocation13 + $0x390] sm:$0xff]  ;;  %v2627_v58 = vld [vmem:[#allocation13 + $0x200] sm:$0xff]  ;;  %v2843_v44 = vld [vmem:[#allocation13 + $0x5d8] sm:$0xff] }
 0x31e   : > { %2564 = vmatpush.msra.mxu3 %v2530_v45  ;;  %2745 = vmatpush.msra.mxu0 %v2642_v53  ;;  %v2675_v45 = vld [vmem:[#allocation13 + $0x380] sm:$0xff]  ;;  %v2846_v39 = vld [vmem:[#allocation13 + $0x5f0] sm:$0xff]  ;;  %v2841_v53 = vld [vmem:[#allocation13 + $0x5c8] sm:$0xff] }
 0x31f   : > { %2542 = vmatpush.msra.mxu2 %v2502_v46  ;;  %2767 = vmatpush.msra.mxu1 %v2670_v34  ;;  %v2673_v46 = vld [vmem:[#allocation13 + $0x370] sm:$0xff] }
 0x320   : > { %2565 = vmatpush.msra.mxu3 %v2528_v51  ;;  %2746 = vmatpush.msra.mxu0 %v2640_v9  ;;  %v2671_v51 = vld [vmem:[#allocation13 + $0x360] sm:$0xff]  ;;  %v2814_v14 = vld [vmem:[#allocation13 + $0x4f0] sm:$0xff]  ;;  %v2839_v9 = vld [vmem:[#allocation13 + $0x5b8] sm:$0xff] }
 0x321   : > { %2543 = vmatpush.msra.mxu2 %v2500_v36  ;;  %2768 = vmatpush.msra.mxu1 %v2668_v17  ;;  %v2669_v36 = vld [vmem:[#allocation13 + $0x350] sm:$0xff] }
 0x322   : > { %2566 = vmatpush.msra.mxu3 %v2526_v59  ;;  %2747 = vmatpush.msra.mxu0 %v2638_v23  ;;  %v2667_v59 = vld [vmem:[#allocation13 + $0x340] sm:$0xff]  ;;  %v2838_v17 = vld [vmem:[#allocation13 + $0x5b0] sm:$0xff]  ;;  %v2837_v23 = vld [vmem:[#allocation13 + $0x5a8] sm:$0xff] }
 0x323   : > { %2544 = vmatpush.msra.mxu2 %v2498_v31  ;;  %2769 = vmatpush.msra.mxu1 %v2666_v20  ;;  %v2665_v31 = vld [vmem:[#allocation13 + $0x330] sm:$0xff]  ;;  %v2836_v20 = vld [vmem:[#allocation13 + $0x5a0] sm:$0xff] }
 0x324   : > { %2567 = vmatpush.msra.mxu3 %v2524_v60  ;;  %2748 = vmatpush.msra.mxu0 %v2636_v26  ;;  %v2663_v60 = vld [vmem:[#allocation13 + $0x320] sm:$0xff]  ;;  %v2835_v26 = vld [vmem:[#allocation13 + $0x598] sm:$0xff] }
 0x325   : > { %2545 = vmatpush.msra.mxu2 %v2496_v21  ;;  %2770 = vmatpush.msra.mxu1 %v2664_v25  ;;  %v2661_v21 = vld [vmem:[#allocation13 + $0x310] sm:$0xff]  ;;  %v2809_v25 = vld [vmem:[#allocation13 + $0x4c8] sm:$0xff] }
 0x326   : > { %2568 = vmatpush.msra.mxu3 %v2522_v49  ;;  %v2659_v49 = vld [vmem:[#allocation13 + $0x300] sm:$0xff]  ;;  %2749 = vmatpush.msra.mxu0 %v2634_v0  ;;  %v2793_v0 = vld [vmem:[#allocation13 + $0x448] sm:$0xff] }
 0x327   : > { %2546 = vmatpush.msra.mxu2 %v2494_v56  ;;  %2771 = vmatpush.msra.mxu1 %v2662_v29  ;;  %v2660_v56 = vld [vmem:[#allocation13 + $0x308] sm:$0xff]  ;;  %v2832_v29 = vld [vmem:[#allocation13 + $0x580] sm:$0xff] }
 0x328   : > { %2569 = vmatpush.msra.mxu3 %v2520_v3  ;;  %v2632_v3 = vld [vmem:[#allocation13 + $0x228] sm:$0xff] }
 0x329   : > { %2547 = vmatpush.msra.mxu2 %v2492_v62  ;;  %2772 = vmatpush.msra.mxu1 %v2660_v56  ;;  %v2630_v62 = vld [vmem:[#allocation13 + $0x218] sm:$0xff] }
 0x32a   : > { %2570 = vmatpush.msra.mxu3 %v2518_v1  ;;  %2750 = vmatpush.msra.mxu0 %v2632_v3  ;;  %v2628_v1 = vld [vmem:[#allocation13 + $0x208] sm:$0xff]  ;;  %v2819_v56 = vld [vmem:[#allocation13 + $0x518] sm:$0xff]  ;;  %v2816_v3 = vld [vmem:[#allocation13 + $0x500] sm:$0xff] }
 0x32b   : > { %2548 = vmatpush.msra.mxu2 %v2490_v7  ;;  %v2847_v7 = vld [vmem:[#allocation13 + $0x5f8] sm:$0xff] }
 0x32c   : > { %2571 = vmatpush.msra.mxu3 %v2516_v10  ;;  %2751 = vmatpush.msra.mxu0 %v2630_v62  ;;  %v2844_v10 = vld [vmem:[#allocation13 + $0x5e0] sm:$0xff]  ;;  %v2817_v62 = vld [vmem:[#allocation13 + $0x508] sm:$0xff] }
 0x32d   : > { %2549 = vmatpush.msra.mxu2 %v2488_v13  ;;  %v2842_v13 = vld [vmem:[#allocation13 + $0x5d0] sm:$0xff] }
 0x32e   : > { %2572 = vmatpush.msra.mxu3 %v2514_v50  ;;  %2752 = vmatpush.msra.mxu0 %v2628_v1  ;;  %v3001_v1 = vld [vmem:[#allocation13 + $0x7f0] sm:$0xff] }
 0x32f   : > { %2550 = vmatpush.msra.mxu2 %v2486_v15  ;;  %v2840_v15 = vld [vmem:[#allocation13 + $0x5c0] sm:$0xff] }
 0x330   : > { %2573 = vmatpush.msra.mxu3 %v2512_v52  ;;  %v2815_v52 = vld [vmem:[#allocation13 + $0x4f8] sm:$0xff] }
 0x331   : > { %2551 = vmatpush.msra.mxu2 %v2484_v16  ;;  %v2812_v16 = vld [vmem:[#allocation13 + $0x4e0] sm:$0xff] }
 0x332   : > { %2574 = vmatpush.msra.mxu3 %v2510_v18  ;;  %v2813_v18 = vld [vmem:[#allocation13 + $0x4e8] sm:$0xff] }
 0x333   : > { %2552 = vmatpush.msra.mxu2 %v2482_v19  ;;  %v2810_v19 = vld [vmem:[#allocation13 + $0x4d0] sm:$0xff] }
 0x334   : > { %2575 = vmatpush.msra.mxu3 %v2508_v22  ;;  %v2811_v22 = vld [vmem:[#allocation13 + $0x4d8] sm:$0xff] }
 0x335   : > { %2553 = vmatpush.msra.mxu2 %v2480_v63  ;;  %v2834_v63 = vld [vmem:[#allocation13 + $0x590] sm:$0xff] }
 0x336   : > { %2717 = vmatpush.msrb.mxu3 %v2689_v24  ;;  %v2808_v24 = vld [vmem:[#allocation13 + $0x4c0] sm:$0xff] }
 0x337   : > { %2554 = vmatpush.msra.mxu2 %v2478_v28  ;;  %v2806_v28 = vld [vmem:[#allocation13 + $0x4b0] sm:$0xff] }
 0x338   : > { %2718 = vmatpush.msrb.mxu3 %v2687_v27 }
 0x339   : > { %2555 = vmatpush.msra.mxu2 %v2476_v37  ;;  %v2833_v37 = vld [vmem:[#allocation13 + $0x588] sm:$0xff] }
 0x33a   : > { %2719 = vmatpush.msrb.mxu3 %v2685_v30  ;;  %v2807_v30 = vld [vmem:[#allocation13 + $0x4b8] sm:$0xff] }
 0x33b   : > { %2697 = vmatpush.msrb.mxu2 %v2657_v38  ;;  %v2804_v38 = vld [vmem:[#allocation13 + $0x4a0] sm:$0xff] }
 0x33c   : > { %2720 = vmatpush.msrb.mxu3 %v2683_v33  ;;  %v2830_v33 = vld [vmem:[#allocation13 + $0x570] sm:$0xff] }
 0x33d   : > { %2698 = vmatpush.msrb.mxu2 %v2655_v11  ;;  %v2805_v11 = vld [vmem:[#allocation13 + $0x4a8] sm:$0xff] }
 0x33e   : > { %2721 = vmatpush.msrb.mxu3 %v2681_v54  ;;  %v2831_v54 = vld [vmem:[#allocation13 + $0x578] sm:$0xff] }
 0x33f   : > { %2699 = vmatpush.msrb.mxu2 %v2653_v41  ;;  %v2802_v41 = vld [vmem:[#allocation13 + $0x490] sm:$0xff] }
 0x340   : > { %2722 = vmatpush.msrb.mxu3 %v2679_v55  ;;  %v2828_v55 = vld [vmem:[#allocation13 + $0x560] sm:$0xff] }
 0x341   : > { %2700 = vmatpush.msrb.mxu2 %v2651_v42  ;;  %v2803_v42 = vld [vmem:[#allocation13 + $0x498] sm:$0xff] }
 0x342   : > { %2723 = vmatpush.msrb.mxu3 %v2677_v43  ;;  %v2829_v43 = vld [vmem:[#allocation13 + $0x568] sm:$0xff] }
 0x343   : > { %2701 = vmatpush.msrb.mxu2 %v2649_v5  ;;  %v2800_v5 = vld [vmem:[#allocation13 + $0x480] sm:$0xff] }
 0x344   : > { %2724 = vmatpush.msrb.mxu3 %v2675_v45  ;;  %v2826_v45 = vld [vmem:[#allocation13 + $0x550] sm:$0xff] }
 0x345   : > { %2702 = vmatpush.msrb.mxu2 %v2647_v6  ;;  %v2801_v6 = vld [vmem:[#allocation13 + $0x488] sm:$0xff] }
 0x346   : > { %2725 = vmatpush.msrb.mxu3 %v2673_v46  ;;  %v2827_v46 = vld [vmem:[#allocation13 + $0x558] sm:$0xff] }
 0x347   : > { %2703 = vmatpush.msrb.mxu2 %v2645_v47  ;;  %v2798_v47 = vld [vmem:[#allocation13 + $0x470] sm:$0xff] }
 0x348   : > { %2726 = vmatpush.msrb.mxu3 %v2671_v51  ;;  %v2824_v51 = vld [vmem:[#allocation13 + $0x540] sm:$0xff] }
 0x349   : > { %2704 = vmatpush.msrb.mxu2 %v2643_v35  ;;  %v2799_v35 = vld [vmem:[#allocation13 + $0x478] sm:$0xff] }
 0x34a   : > { %2727 = vmatpush.msrb.mxu3 %v2669_v36  ;;  %v2825_v36 = vld [vmem:[#allocation13 + $0x548] sm:$0xff] }
 0x34b   : > { %2705 = vmatpush.msrb.mxu2 %v2641_v40  ;;  %v2796_v40 = vld [vmem:[#allocation13 + $0x460] sm:$0xff] }
 0x34c   : > { %2728 = vmatpush.msrb.mxu3 %v2667_v59  ;;  %v2822_v59 = vld [vmem:[#allocation13 + $0x530] sm:$0xff] }
 0x34d   : > { %2706 = vmatpush.msrb.mxu2 %v2639_v57  ;;  %v2797_v57 = vld [vmem:[#allocation13 + $0x468] sm:$0xff] }
 0x34e   : > { %2729 = vmatpush.msrb.mxu3 %v2665_v31  ;;  %v2823_v31 = vld [vmem:[#allocation13 + $0x538] sm:$0xff] }
 0x34f   : > { %2707 = vmatpush.msrb.mxu2 %v2637_v48  ;;  %v2794_v48 = vld [vmem:[#allocation13 + $0x450] sm:$0xff] }
 0x350   : > { %2730 = vmatpush.msrb.mxu3 %v2663_v60  ;;  %v2820_v60 = vld [vmem:[#allocation13 + $0x520] sm:$0xff] }
 0x351   : > { %2708 = vmatpush.msrb.mxu2 %v2635_v61  ;;  %v2795_v61 = vld [vmem:[#allocation13 + $0x458] sm:$0xff] }
 0x352   : > { %2731 = vmatpush.msrb.mxu3 %v2661_v21  ;;  %v2821_v21 = vld [vmem:[#allocation13 + $0x528] sm:$0xff] }
 0x353   : > { %2709 = vmatpush.msrb.mxu2 %v2633_v32  ;;  %v2792_v32 = vld [vmem:[#allocation13 + $0x440] sm:$0xff] }
 0x354   : > { %2732 = vmatpush.msrb.mxu3 %v2659_v49  ;;  %v2818_v49 = vld [vmem:[#allocation13 + $0x510] sm:$0xff] }
 0x355   : > { %2710 = vmatpush.msrb.mxu2 %v2631_v2  ;;  %v2790_v2 = vld [vmem:[#allocation13 + $0x430] sm:$0xff] }
 0x357   : > { %2711 = vmatpush.msrb.mxu2 %v2629_v4  ;;  %v2791_v4 = vld [vmem:[#allocation13 + $0x438] sm:$0xff] }
 0x359   : > { %2712 = vmatpush.msrb.mxu2 %v2627_v58 }
 0x398   : > { %v4673_v8 = vpop.f32.mrf.mxu3 }
 0x399   : > { %2576 = vmatmul.f32.vlgmr.msra.gmra.mxu3 %v4673_v8  ;;  %2616 = vmatmul.f32.vlgmr.msrb.gmra.mxu1 %v4673_v8  ;;  %v2694_v34 = vrot.slane %v4673_v8, 1  ;;  %v2849_v58 = vrot.slane %v4673_v8, 2 }
 0x39a   : > { %2872 = vmatpush.msra.mxu3 %v2846_v39  ;;  %2912 = vmatpush.msrb.mxu1 %v2847_v7  ;;  %v3002_v39 = vld [vmem:[#allocation13 + $0x7f8] sm:$0xff]  ;;  %v2788_v7 = vld [vmem:[#allocation13 + $0x420] sm:$0xff] }
 0x39c   : > { %2873 = vmatpush.msra.mxu3 %v2844_v10  ;;  %2913 = vmatpush.msrb.mxu1 %v2845_v12  ;;  %v2789_v10 = vld [vmem:[#allocation13 + $0x428] sm:$0xff]  ;;  %v2999_v12 = vld [vmem:[#allocation13 + $0x7e0] sm:$0xff] }
 0x39d   : > { %v4677_v50 = vpop.f32.mrf.mxu2 }
 0x39e   : > { %2874 = vmatpush.msra.mxu3 %v2842_v13  ;;  %2914 = vmatpush.msrb.mxu1 %v2843_v44  ;;  %v2693_v27 = vrot.slane %v4677_v50, 1  ;;  %v3000_v13 = vld [vmem:[#allocation13 + $0x7e8] sm:$0xff]  ;;  %v2786_v44 = vld [vmem:[#allocation13 + $0x410] sm:$0xff] }
 0x39f   : > { %2556 = vmatmul.f32.vlgmr.msra.gmra.mxu2 %v4677_v50  ;;  %2596 = vmatmul.f32.vlgmr.msrb.gmra.mxu0 %v4677_v50 }
 0x3a0   : > { %2852 = vmatpush.msra.mxu2 %v2814_v14  ;;  %2875 = vmatpush.msra.mxu3 %v2840_v15  ;;  %v2787_v14 = vld [vmem:[#allocation13 + $0x418] sm:$0xff]  ;;  %v2997_v15 = vld [vmem:[#allocation13 + $0x7d0] sm:$0xff] }
 0x3a1   : > { %2892 = vmatpush.msrb.mxu0 %v2815_v52  ;;  %2915 = vmatpush.msrb.mxu1 %v2841_v53  ;;  %v2784_v52 = vld [vmem:[#allocation13 + $0x400] sm:$0xff]  ;;  %v2785_v53 = vld [vmem:[#allocation13 + $0x408] sm:$0xff] }
 0x3a2   : > { %2733 = vmatmul.f32.vlgmr.msrb.gmra.mxu3 %v2694_v34  ;;  %2773 = vmatmul.f32.vlgmr.msra.gmra.mxu1 %v2694_v34  ;;  %v2998_v34 = vld [vmem:[#allocation13 + $0x7d8] sm:$0xff] }
 0x3a3   : > { %2853 = vmatpush.msra.mxu2 %v2812_v16  ;;  %2876 = vmatpush.msra.mxu3 %v2838_v17  ;;  %v2848_v16 = vrot.slane %v4677_v50, 2  ;;  %v2969_v17 = vld [vmem:[#allocation13 + $0x6f0] sm:$0xff] }
 0x3a4   : > { %2893 = vmatpush.msrb.mxu0 %v2813_v18  ;;  %2916 = vmatpush.msrb.mxu1 %v2839_v9  ;;  %v2995_v18 = vld [vmem:[#allocation13 + $0x7c0] sm:$0xff]  ;;  %v2970_v9 = vld [vmem:[#allocation13 + $0x6f8] sm:$0xff] }
 0x3a5   : > { %2854 = vmatpush.msra.mxu2 %v2810_v19  ;;  %2877 = vmatpush.msra.mxu3 %v2836_v20  ;;  %v2996_v19 = vld [vmem:[#allocation13 + $0x7c8] sm:$0xff]  ;;  %v2967_v20 = vld [vmem:[#allocation13 + $0x6e0] sm:$0xff] }
 0x3a6   : > { %2894 = vmatpush.msrb.mxu0 %v2811_v22  ;;  %2917 = vmatpush.msrb.mxu1 %v2837_v23  ;;  %v2993_v22 = vld [vmem:[#allocation13 + $0x7b0] sm:$0xff]  ;;  %v2968_v23 = vld [vmem:[#allocation13 + $0x6e8] sm:$0xff] }
 0x3a7   : > { %2855 = vmatpush.msra.mxu2 %v2808_v24  ;;  %2878 = vmatpush.msra.mxu3 %v2834_v63  ;;  %v2994_v24 = vld [vmem:[#allocation13 + $0x7b8] sm:$0xff]  ;;  %v2965_v63 = vld [vmem:[#allocation13 + $0x6d0] sm:$0xff] }
 0x3a8   : > { %2895 = vmatpush.msrb.mxu0 %v2809_v25  ;;  %2918 = vmatpush.msrb.mxu1 %v2835_v26  ;;  %v2991_v25 = vld [vmem:[#allocation13 + $0x7a0] sm:$0xff]  ;;  %v2966_v26 = vld [vmem:[#allocation13 + $0x6d8] sm:$0xff] }
 0x3a9   : > { %2713 = vmatmul.f32.vlgmr.msrb.gmra.mxu2 %v2693_v27  ;;  %2753 = vmatmul.f32.vlgmr.msra.gmra.mxu0 %v2693_v27  ;;  %v2992_v27 = vld [vmem:[#allocation13 + $0x7a8] sm:$0xff] }
 0x3aa   : > { %2856 = vmatpush.msra.mxu2 %v2806_v28  ;;  %2879 = vmatpush.msra.mxu3 %v2832_v29  ;;  %v2963_v28 = vld [vmem:[#allocation13 + $0x6c0] sm:$0xff]  ;;  %v2989_v29 = vld [vmem:[#allocation13 + $0x790] sm:$0xff] }
 0x3ab   : > { %2896 = vmatpush.msrb.mxu0 %v2807_v30  ;;  %2919 = vmatpush.msrb.mxu1 %v2833_v37  ;;  %v2964_v30 = vld [vmem:[#allocation13 + $0x6c8] sm:$0xff]  ;;  %v2990_v37 = vld [vmem:[#allocation13 + $0x798] sm:$0xff] }
 0x3ac   : > { %2857 = vmatpush.msra.mxu2 %v2804_v38  ;;  %2880 = vmatpush.msra.mxu3 %v2830_v33  ;;  %v2961_v38 = vld [vmem:[#allocation13 + $0x6b0] sm:$0xff]  ;;  %v2987_v33 = vld [vmem:[#allocation13 + $0x780] sm:$0xff] }
 0x3ad   : > { %2897 = vmatpush.msrb.mxu0 %v2805_v11  ;;  %2920 = vmatpush.msrb.mxu1 %v2831_v54  ;;  %v2962_v11 = vld [vmem:[#allocation13 + $0x6b8] sm:$0xff]  ;;  %v2988_v54 = vld [vmem:[#allocation13 + $0x788] sm:$0xff] }
 0x3ae   : > { %2858 = vmatpush.msra.mxu2 %v2802_v41  ;;  %2881 = vmatpush.msra.mxu3 %v2828_v55  ;;  %v2959_v41 = vld [vmem:[#allocation13 + $0x6a0] sm:$0xff]  ;;  %v2985_v55 = vld [vmem:[#allocation13 + $0x770] sm:$0xff] }
 0x3af   : > { %2898 = vmatpush.msrb.mxu0 %v2803_v42  ;;  %2921 = vmatpush.msrb.mxu1 %v2829_v43  ;;  %v2960_v42 = vld [vmem:[#allocation13 + $0x6a8] sm:$0xff]  ;;  %v2986_v43 = vld [vmem:[#allocation13 + $0x778] sm:$0xff] }
 0x3b0   : > { %2859 = vmatpush.msra.mxu2 %v2800_v5  ;;  %2882 = vmatpush.msra.mxu3 %v2826_v45  ;;  %v2957_v5 = vld [vmem:[#allocation13 + $0x690] sm:$0xff]  ;;  %v2983_v45 = vld [vmem:[#allocation13 + $0x760] sm:$0xff] }
 0x3b1   : > { %2899 = vmatpush.msrb.mxu0 %v2801_v6  ;;  %2922 = vmatpush.msrb.mxu1 %v2827_v46  ;;  %v2958_v6 = vld [vmem:[#allocation13 + $0x698] sm:$0xff]  ;;  %v2984_v46 = vld [vmem:[#allocation13 + $0x768] sm:$0xff] }
 0x3b2   : > { %2860 = vmatpush.msra.mxu2 %v2798_v47  ;;  %2883 = vmatpush.msra.mxu3 %v2824_v51  ;;  %v2955_v47 = vld [vmem:[#allocation13 + $0x680] sm:$0xff]  ;;  %v2981_v51 = vld [vmem:[#allocation13 + $0x750] sm:$0xff] }
 0x3b3   : > { %2900 = vmatpush.msrb.mxu0 %v2799_v35  ;;  %2923 = vmatpush.msrb.mxu1 %v2825_v36  ;;  %v2956_v35 = vld [vmem:[#allocation13 + $0x688] sm:$0xff]  ;;  %v2982_v36 = vld [vmem:[#allocation13 + $0x758] sm:$0xff] }
 0x3b4   : > { %2861 = vmatpush.msra.mxu2 %v2796_v40  ;;  %2884 = vmatpush.msra.mxu3 %v2822_v59  ;;  %v2953_v40 = vld [vmem:[#allocation13 + $0x670] sm:$0xff]  ;;  %v2979_v59 = vld [vmem:[#allocation13 + $0x740] sm:$0xff] }
 0x3b5   : > { %2901 = vmatpush.msrb.mxu0 %v2797_v57  ;;  %2924 = vmatpush.msrb.mxu1 %v2823_v31  ;;  %v2954_v57 = vld [vmem:[#allocation13 + $0x678] sm:$0xff]  ;;  %v2980_v31 = vld [vmem:[#allocation13 + $0x748] sm:$0xff] }
 0x3b6   : > { %2862 = vmatpush.msra.mxu2 %v2794_v48  ;;  %2885 = vmatpush.msra.mxu3 %v2820_v60  ;;  %v2951_v48 = vld [vmem:[#allocation13 + $0x660] sm:$0xff]  ;;  %v2977_v60 = vld [vmem:[#allocation13 + $0x730] sm:$0xff] }
 0x3b7   : > { %2902 = vmatpush.msrb.mxu0 %v2795_v61  ;;  %2925 = vmatpush.msrb.mxu1 %v2821_v21  ;;  %v2952_v61 = vld [vmem:[#allocation13 + $0x668] sm:$0xff]  ;;  %v2978_v21 = vld [vmem:[#allocation13 + $0x738] sm:$0xff] }
 0x3b8   : > { %2863 = vmatpush.msra.mxu2 %v2792_v32  ;;  %2886 = vmatpush.msra.mxu3 %v2818_v49  ;;  %v2949_v32 = vld [vmem:[#allocation13 + $0x650] sm:$0xff]  ;;  %v2975_v49 = vld [vmem:[#allocation13 + $0x720] sm:$0xff] }
 0x3b9   : > { %2903 = vmatpush.msrb.mxu0 %v2793_v0  ;;  %2926 = vmatpush.msrb.mxu1 %v2819_v56  ;;  %v2950_v0 = vld [vmem:[#allocation13 + $0x658] sm:$0xff]  ;;  %v2976_v56 = vld [vmem:[#allocation13 + $0x728] sm:$0xff] }
 0x3ba   : > { %2864 = vmatpush.msra.mxu2 %v2790_v2  ;;  %2887 = vmatpush.msra.mxu3 %v2816_v3  ;;  %v2947_v2 = vld [vmem:[#allocation13 + $0x640] sm:$0xff]  ;;  %v2973_v3 = vld [vmem:[#allocation13 + $0x710] sm:$0xff] }
 0x3bb   : > { %2904 = vmatpush.msrb.mxu0 %v2791_v4  ;;  %2927 = vmatpush.msrb.mxu1 %v2817_v62  ;;  %v2948_v4 = vld [vmem:[#allocation13 + $0x648] sm:$0xff]  ;;  %v2974_v62 = vld [vmem:[#allocation13 + $0x718] sm:$0xff] }
 0x3bc   : > { %2888 = vmatmul.f32.vlgmr.msra.gmra.mxu3 %v2849_v58  ;;  %2928 = vmatmul.f32.vlgmr.msrb.gmra.mxu1 %v2849_v58  ;;  %v2945_v58 = vld [vmem:[#allocation13 + $0x630] sm:$0xff] }
 0x3bd   : > { %3027 = vmatpush.msrb.mxu3 %v3001_v1  ;;  %3067 = vmatpush.msra.mxu1 %v3002_v39  ;;  %v2971_v1 = vld [vmem:[#allocation13 + $0x700] sm:$0xff]  ;;  %v2946_v39 = vld [vmem:[#allocation13 + $0x638] sm:$0xff] }
 0x3be   : > { %2865 = vmatpush.msra.mxu2 %v2788_v7  ;;  %2905 = vmatpush.msrb.mxu0 %v2789_v10  ;;  %v2972_v7 = vld [vmem:[#allocation13 + $0x708] sm:$0xff]  ;;  %v3004_v10 = vrot.slane %v4673_v8, 3 }
 0x3bf   : > { %3028 = vmatpush.msrb.mxu3 %v2999_v12  ;;  %3068 = vmatpush.msra.mxu1 %v3000_v13  ;;  %v3156_v12 = vld [vmem:[#allocation13 + $0x9f0] sm:$0xff]  ;;  %v3157_v13 = vld [vmem:[#allocation13 + $0x9f8] sm:$0xff] }
 0x3c0   : > { %2866 = vmatpush.msra.mxu2 %v2786_v44  ;;  %2906 = vmatpush.msrb.mxu0 %v2787_v14  ;;  %v2943_v44 = vld [vmem:[#allocation13 + $0x620] sm:$0xff]  ;;  %v2944_v14 = vld [vmem:[#allocation13 + $0x628] sm:$0xff] }
 0x3c1   : > { %3029 = vmatpush.msrb.mxu3 %v2997_v15  ;;  %3069 = vmatpush.msra.mxu1 %v2998_v34  ;;  %v3154_v15 = vld [vmem:[#allocation13 + $0x9e0] sm:$0xff]  ;;  %v3155_v34 = vld [vmem:[#allocation13 + $0x9e8] sm:$0xff] }
 0x3c2   : > { %2867 = vmatpush.msra.mxu2 %v2784_v52  ;;  %2907 = vmatpush.msrb.mxu0 %v2785_v53  ;;  %v2941_v52 = vld [vmem:[#allocation13 + $0x610] sm:$0xff]  ;;  %v2942_v53 = vld [vmem:[#allocation13 + $0x618] sm:$0xff] }
 0x3c3   : > { %2868 = vmatmul.f32.vlgmr.msra.gmra.mxu2 %v2848_v16  ;;  %2908 = vmatmul.f32.vlgmr.msrb.gmra.mxu0 %v2848_v16  ;;  %v3152_v16 = vld [vmem:[#allocation13 + $0x9d0] sm:$0xff] }
 0x3c4   : > { %3007 = vmatpush.msrb.mxu2 %v2969_v17  ;;  %3030 = vmatpush.msrb.mxu3 %v2995_v18  ;;  %v3153_v17 = vld [vmem:[#allocation13 + $0x9d8] sm:$0xff]  ;;  %v2939_v18 = vld [vmem:[#allocation13 + $0x600] sm:$0xff] }
 0x3c5   : > { %3047 = vmatpush.msra.mxu0 %v2970_v9  ;;  %3070 = vmatpush.msra.mxu1 %v2996_v19  ;;  %v2940_v9 = vld [vmem:[#allocation13 + $0x608] sm:$0xff]  ;;  %v3003_v19 = vrot.slane %v4677_v50, 3 }
 0x3c6   : > { %3008 = vmatpush.msrb.mxu2 %v2967_v20  ;;  %3031 = vmatpush.msrb.mxu3 %v2993_v22  ;;  %v3124_v20 = vld [vmem:[#allocation13 + $0x8f0] sm:$0xff]  ;;  %v3150_v22 = vld [vmem:[#allocation13 + $0x9c0] sm:$0xff] }
 0x3c7   : > { %3048 = vmatpush.msra.mxu0 %v2968_v23  ;;  %3071 = vmatpush.msra.mxu1 %v2994_v24  ;;  %v3125_v23 = vld [vmem:[#allocation13 + $0x8f8] sm:$0xff]  ;;  %v3151_v24 = vld [vmem:[#allocation13 + $0x9c8] sm:$0xff] }
 0x3c8   : > { %3009 = vmatpush.msrb.mxu2 %v2965_v63  ;;  %3032 = vmatpush.msrb.mxu3 %v2991_v25  ;;  %v3122_v63 = vld [vmem:[#allocation13 + $0x8e0] sm:$0xff]  ;;  %v3148_v25 = vld [vmem:[#allocation13 + $0x9b0] sm:$0xff] }
 0x3c9   : > { %3049 = vmatpush.msra.mxu0 %v2966_v26  ;;  %3072 = vmatpush.msra.mxu1 %v2992_v27  ;;  %v3123_v26 = vld [vmem:[#allocation13 + $0x8e8] sm:$0xff]  ;;  %v3149_v27 = vld [vmem:[#allocation13 + $0x9b8] sm:$0xff] }
 0x3ca   : > { %3010 = vmatpush.msrb.mxu2 %v2963_v28  ;;  %3033 = vmatpush.msrb.mxu3 %v2989_v29  ;;  %v3120_v28 = vld [vmem:[#allocation13 + $0x8d0] sm:$0xff]  ;;  %v3146_v29 = vld [vmem:[#allocation13 + $0x9a0] sm:$0xff] }
 0x3cb   : > { %3050 = vmatpush.msra.mxu0 %v2964_v30  ;;  %3073 = vmatpush.msra.mxu1 %v2990_v37  ;;  %v3121_v30 = vld [vmem:[#allocation13 + $0x8d8] sm:$0xff]  ;;  %v3147_v37 = vld [vmem:[#allocation13 + $0x9a8] sm:$0xff] }
 0x3cc   : > { %3011 = vmatpush.msrb.mxu2 %v2961_v38  ;;  %3034 = vmatpush.msrb.mxu3 %v2987_v33  ;;  %v3118_v38 = vld [vmem:[#allocation13 + $0x8c0] sm:$0xff]  ;;  %v3144_v33 = vld [vmem:[#allocation13 + $0x990] sm:$0xff] }
 0x3cd   : > { %3051 = vmatpush.msra.mxu0 %v2962_v11  ;;  %3074 = vmatpush.msra.mxu1 %v2988_v54  ;;  %v3119_v11 = vld [vmem:[#allocation13 + $0x8c8] sm:$0xff]  ;;  %v3145_v54 = vld [vmem:[#allocation13 + $0x998] sm:$0xff] }
 0x3ce   : > { %3012 = vmatpush.msrb.mxu2 %v2959_v41  ;;  %3035 = vmatpush.msrb.mxu3 %v2985_v55  ;;  %v3116_v41 = vld [vmem:[#allocation13 + $0x8b0] sm:$0xff]  ;;  %v3142_v55 = vld [vmem:[#allocation13 + $0x980] sm:$0xff] }
 0x3cf   : > { %3052 = vmatpush.msra.mxu0 %v2960_v42  ;;  %3075 = vmatpush.msra.mxu1 %v2986_v43  ;;  %v3117_v42 = vld [vmem:[#allocation13 + $0x8b8] sm:$0xff]  ;;  %v3143_v43 = vld [vmem:[#allocation13 + $0x988] sm:$0xff] }
 0x3d0   : > { %3013 = vmatpush.msrb.mxu2 %v2957_v5  ;;  %3036 = vmatpush.msrb.mxu3 %v2983_v45  ;;  %v3114_v5 = vld [vmem:[#allocation13 + $0x8a0] sm:$0xff]  ;;  %v3140_v45 = vld [vmem:[#allocation13 + $0x970] sm:$0xff] }
 0x3d1   : > { %3053 = vmatpush.msra.mxu0 %v2958_v6  ;;  %3076 = vmatpush.msra.mxu1 %v2984_v46  ;;  %v3115_v6 = vld [vmem:[#allocation13 + $0x8a8] sm:$0xff]  ;;  %v3141_v46 = vld [vmem:[#allocation13 + $0x978] sm:$0xff] }
 0x3d2   : > { %3014 = vmatpush.msrb.mxu2 %v2955_v47  ;;  %3037 = vmatpush.msrb.mxu3 %v2981_v51  ;;  %v3112_v47 = vld [vmem:[#allocation13 + $0x890] sm:$0xff]  ;;  %v3138_v51 = vld [vmem:[#allocation13 + $0x960] sm:$0xff] }
 0x3d3   : > { %3054 = vmatpush.msra.mxu0 %v2956_v35  ;;  %3077 = vmatpush.msra.mxu1 %v2982_v36  ;;  %v3113_v35 = vld [vmem:[#allocation13 + $0x898] sm:$0xff]  ;;  %v3139_v36 = vld [vmem:[#allocation13 + $0x968] sm:$0xff] }
 0x3d4   : > { %3015 = vmatpush.msrb.mxu2 %v2953_v40  ;;  %3038 = vmatpush.msrb.mxu3 %v2979_v59  ;;  %v3110_v40 = vld [vmem:[#allocation13 + $0x880] sm:$0xff]  ;;  %v3136_v59 = vld [vmem:[#allocation13 + $0x950] sm:$0xff] }
 0x3d5   : > { %3055 = vmatpush.msra.mxu0 %v2954_v57  ;;  %3078 = vmatpush.msra.mxu1 %v2980_v31  ;;  %v3111_v57 = vld [vmem:[#allocation13 + $0x888] sm:$0xff]  ;;  %v3137_v31 = vld [vmem:[#allocation13 + $0x958] sm:$0xff] }
 0x3d6   : > { %3016 = vmatpush.msrb.mxu2 %v2951_v48  ;;  %3039 = vmatpush.msrb.mxu3 %v2977_v60  ;;  %v3108_v48 = vld [vmem:[#allocation13 + $0x870] sm:$0xff]  ;;  %v3134_v60 = vld [vmem:[#allocation13 + $0x940] sm:$0xff] }
 0x3d7   : > { %3056 = vmatpush.msra.mxu0 %v2952_v61  ;;  %3079 = vmatpush.msra.mxu1 %v2978_v21  ;;  %v3109_v61 = vld [vmem:[#allocation13 + $0x878] sm:$0xff]  ;;  %v3135_v21 = vld [vmem:[#allocation13 + $0x948] sm:$0xff] }
 0x3d8   : > { %3017 = vmatpush.msrb.mxu2 %v2949_v32  ;;  %3040 = vmatpush.msrb.mxu3 %v2975_v49  ;;  %v3106_v32 = vld [vmem:[#allocation13 + $0x860] sm:$0xff]  ;;  %v3132_v49 = vld [vmem:[#allocation13 + $0x930] sm:$0xff] }
 0x3d9   : > { %3057 = vmatpush.msra.mxu0 %v2950_v0  ;;  %3080 = vmatpush.msra.mxu1 %v2976_v56  ;;  %v3107_v0 = vld [vmem:[#allocation13 + $0x868] sm:$0xff]  ;;  %v3133_v56 = vld [vmem:[#allocation13 + $0x938] sm:$0xff] }
 0x3da   : > { %3018 = vmatpush.msrb.mxu2 %v2947_v2  ;;  %3041 = vmatpush.msrb.mxu3 %v2973_v3  ;;  %v3104_v2 = vld [vmem:[#allocation13 + $0x850] sm:$0xff]  ;;  %v3130_v3 = vld [vmem:[#allocation13 + $0x920] sm:$0xff] }
 0x3db   : > { %3058 = vmatpush.msra.mxu0 %v2948_v4  ;;  %3081 = vmatpush.msra.mxu1 %v2974_v62  ;;  %v3105_v4 = vld [vmem:[#allocation13 + $0x858] sm:$0xff]  ;;  %v3131_v62 = vld [vmem:[#allocation13 + $0x928] sm:$0xff] }
 0x3dc   : > { %3019 = vmatpush.msrb.mxu2 %v2945_v58  ;;  %3042 = vmatpush.msrb.mxu3 %v2971_v1  ;;  %v3102_v58 = vld [vmem:[#allocation13 + $0x840] sm:$0xff]  ;;  %v3128_v1 = vld [vmem:[#allocation13 + $0x910] sm:$0xff] }
 0x3dd   : > { %3059 = vmatpush.msra.mxu0 %v2946_v39  ;;  %3082 = vmatpush.msra.mxu1 %v2972_v7  ;;  %v3103_v39 = vld [vmem:[#allocation13 + $0x848] sm:$0xff]  ;;  %v3129_v7 = vld [vmem:[#allocation13 + $0x918] sm:$0xff] }
 0x3de   : > { %3043 = vmatmul.f32.vlgmr.msrb.gmra.mxu3 %v3004_v10  ;;  %3083 = vmatmul.f32.vlgmr.msra.gmra.mxu1 %v3004_v10  ;;  %v3100_v10 = vld [vmem:[#allocation13 + $0x830] sm:$0xff] }
 0x3df   : > { %3182 = vmatpush.msra.mxu3 %v3156_v12  ;;  %3222 = vmatpush.msrb.mxu1 %v3157_v13  ;;  %v3126_v12 = vld [vmem:[#allocation13 + $0x900] sm:$0xff]  ;;  %v3101_v13 = vld [vmem:[#allocation13 + $0x838] sm:$0xff] }
 0x3e0   : > { %3020 = vmatpush.msrb.mxu2 %v2943_v44  ;;  %3060 = vmatpush.msra.mxu0 %v2944_v14  ;;  %v3127_v44 = vld [vmem:[#allocation13 + $0x908] sm:$0xff]  ;;  %v3159_v14 = vrot.slane %v4673_v8, 4  ;;  %v3263_v8 = vld [vmem:[#allocation16 + $0x78] sm:$0xff] }
 0x3e1   : > { %3183 = vmatpush.msra.mxu3 %v3154_v15  ;;  %3223 = vmatpush.msrb.mxu1 %v3155_v34  ;;  %v3098_v15 = vld [vmem:[#allocation13 + $0x820] sm:$0xff]  ;;  %v3099_v34 = vld [vmem:[#allocation13 + $0x828] sm:$0xff] }
 0x3e2   : > { %3021 = vmatpush.msrb.mxu2 %v2941_v52  ;;  %3061 = vmatpush.msra.mxu0 %v2942_v53  ;;  %v3096_v52 = vld [vmem:[#allocation13 + $0x810] sm:$0xff]  ;;  %v3097_v53 = vld [vmem:[#allocation13 + $0x818] sm:$0xff] }
 0x3e3   : > { %3184 = vmatpush.msra.mxu3 %v3152_v16  ;;  %3224 = vmatpush.msrb.mxu1 %v3153_v17  ;;  %v3094_v16 = vld [vmem:[#allocation13 + $0x800] sm:$0xff]  ;;  %v3095_v17 = vld [vmem:[#allocation13 + $0x808] sm:$0xff] }
 0x3e4   : > { %3022 = vmatpush.msrb.mxu2 %v2939_v18  ;;  %3062 = vmatpush.msra.mxu0 %v2940_v9  ;;  %v3158_v18 = vrot.slane %v4677_v50, 4  ;;  %v3279_v9 = vld [vmem:[#allocation16 + $0xf8] sm:$0xff] }
 0x3e5   : > { %3023 = vmatmul.f32.vlgmr.msrb.gmra.mxu2 %v3003_v19  ;;  %3063 = vmatmul.f32.vlgmr.msra.gmra.mxu0 %v3003_v19  ;;  %v3262_v19 = vld [vmem:[#allocation16 + $0x70] sm:$0xff]  ;;  %v3275_v50 = vld [vmem:[#allocation16 + $0xd8] sm:$0xff] }
 0x3e6   : > { %3162 = vmatpush.msra.mxu2 %v3124_v20  ;;  %3185 = vmatpush.msra.mxu3 %v3150_v22  ;;  %v3278_v20 = vld [vmem:[#allocation16 + $0xf0] sm:$0xff]  ;;  %v3261_v22 = vld [vmem:[#allocation16 + $0x68] sm:$0xff] }
 0x3e7   : > { %3202 = vmatpush.msrb.mxu0 %v3125_v23  ;;  %3225 = vmatpush.msrb.mxu1 %v3151_v24  ;;  %v3277_v23 = vld [vmem:[#allocation16 + $0xe8] sm:$0xff]  ;;  %v3260_v24 = vld [vmem:[#allocation16 + $0x60] sm:$0xff] }
 0x3e8   : > { %3163 = vmatpush.msra.mxu2 %v3122_v63  ;;  %3186 = vmatpush.msra.mxu3 %v3148_v25  ;;  %v3276_v63 = vld [vmem:[#allocation16 + $0xe0] sm:$0xff]  ;;  %v3259_v25 = vld [vmem:[#allocation16 + $0x58] sm:$0xff] }
 0x3e9   : > { %3203 = vmatpush.msrb.mxu0 %v3123_v26  ;;  %3226 = vmatpush.msrb.mxu1 %v3149_v27  ;;  %v3258_v26 = vld [vmem:[#allocation16 + $0x50] sm:$0xff] }
 0x3ea   : > { %3164 = vmatpush.msra.mxu2 %v3120_v28  ;;  %3187 = vmatpush.msra.mxu3 %v3146_v29  ;;  %v3274_v27 = vld [vmem:[#allocation16 + $0xd0] sm:$0xff]  ;;  %v3257_v28 = vld [vmem:[#allocation16 + $0x48] sm:$0xff] }
 0x3eb   : > { %3204 = vmatpush.msrb.mxu0 %v3121_v30  ;;  %3227 = vmatpush.msrb.mxu1 %v3147_v37  ;;  %v3273_v29 = vld [vmem:[#allocation16 + $0xc8] sm:$0xff]  ;;  %v3256_v30 = vld [vmem:[#allocation16 + $0x40] sm:$0xff] }
 0x3ec   : > { %3165 = vmatpush.msra.mxu2 %v3118_v38  ;;  %3188 = vmatpush.msra.mxu3 %v3144_v33  ;;  %v3272_v37 = vld [vmem:[#allocation16 + $0xc0] sm:$0xff]  ;;  %v3255_v38 = vld [vmem:[#allocation16 + $0x38] sm:$0xff] }
 0x3ed   : > { %3205 = vmatpush.msrb.mxu0 %v3119_v11  ;;  %3228 = vmatpush.msrb.mxu1 %v3145_v54  ;;  %v3271_v33 = vld [vmem:[#allocation16 + $0xb8] sm:$0xff] }
 0x3ee   : > { %3166 = vmatpush.msra.mxu2 %v3116_v41  ;;  %3189 = vmatpush.msra.mxu3 %v3142_v55  ;;  %v3254_v41 = vld [vmem:[#allocation16 + $0x30] sm:$0xff] }
 0x3ef   : > { %3206 = vmatpush.msrb.mxu0 %v3117_v42  ;;  %3229 = vmatpush.msrb.mxu1 %v3143_v43  ;;  %v3270_v55 = vld [vmem:[#allocation16 + $0xb0] sm:$0xff]  ;;  %v3253_v42 = vld [vmem:[#allocation16 + $0x28] sm:$0xff] }
 0x3f0   : > { %3167 = vmatpush.msra.mxu2 %v3114_v5  ;;  %3190 = vmatpush.msra.mxu3 %v3140_v45  ;;  %v3269_v43 = vld [vmem:[#allocation16 + $0xa8] sm:$0xff]  ;;  %v3252_v5 = vld [vmem:[#allocation16 + $0x20] sm:$0xff] }
 0x3f1   : > { %3207 = vmatpush.msrb.mxu0 %v3115_v6  ;;  %3230 = vmatpush.msrb.mxu1 %v3141_v46  ;;  %v3268_v45 = vld [vmem:[#allocation16 + $0xa0] sm:$0xff] }
 0x3f2   : > { %3168 = vmatpush.msra.mxu2 %v3112_v47  ;;  %3191 = vmatpush.msra.mxu3 %v3138_v51  ;;  %v3251_v47 = vld [vmem:[#allocation16 + $0x18] sm:$0xff] }
 0x3f3   : > { %3208 = vmatpush.msrb.mxu0 %v3113_v35  ;;  %3231 = vmatpush.msrb.mxu1 %v3139_v36  ;;  %v3267_v51 = vld [vmem:[#allocation16 + $0x98] sm:$0xff]  ;;  %v3250_v36 = vld [vmem:[#allocation16 + $0x10] sm:$0xff] }
 0x3f4   : > { %3169 = vmatpush.msra.mxu2 %v3110_v40  ;;  %3192 = vmatpush.msra.mxu3 %v3136_v59  ;;  %v3266_v40 = vld [vmem:[#allocation16 + $0x90] sm:$0xff] }
 0x3f5   : > { %3209 = vmatpush.msrb.mxu0 %v3111_v57  ;;  %3232 = vmatpush.msrb.mxu1 %v3137_v31  ;;  %v3249_v57 = vld [vmem:[#allocation16 + $0x8] sm:$0xff] }
 0x3f6   : > { %3170 = vmatpush.msra.mxu2 %v3108_v48  ;;  %3193 = vmatpush.msra.mxu3 %v3134_v60  ;;  %v3265_v31 = vld [vmem:[#allocation16 + $0x88] sm:$0xff]  ;;  %v3248_v48 = vld [vmem:[#allocation16] sm:$0xff] }
 0x3f7   : > { %3210 = vmatpush.msrb.mxu0 %v3109_v61  ;;  %3233 = vmatpush.msrb.mxu1 %v3135_v21  ;;  %v3264_v60 = vld [vmem:[#allocation16 + $0x80] sm:$0xff] }
 0x3f8   : > { %3171 = vmatpush.msra.mxu2 %v3106_v32  ;;  %3194 = vmatpush.msra.mxu3 %v3132_v49 }
 0x3f9   : > { %3211 = vmatpush.msrb.mxu0 %v3107_v0  ;;  %3234 = vmatpush.msrb.mxu1 %v3133_v56 }
 0x3fa   : > { %3172 = vmatpush.msra.mxu2 %v3104_v2  ;;  %3195 = vmatpush.msra.mxu3 %v3130_v3 }
 0x3fb   : > { %3212 = vmatpush.msrb.mxu0 %v3105_v4  ;;  %3235 = vmatpush.msrb.mxu1 %v3131_v62 }
 0x3fc   : > { %3173 = vmatpush.msra.mxu2 %v3102_v58  ;;  %3196 = vmatpush.msra.mxu3 %v3128_v1 }
 0x3fd   : > { %3213 = vmatpush.msrb.mxu0 %v3103_v39  ;;  %3236 = vmatpush.msrb.mxu1 %v3129_v7 }
 0x3fe   : > { %3174 = vmatpush.msra.mxu2 %v3100_v10  ;;  %3197 = vmatpush.msra.mxu3 %v3126_v12 }
 0x3ff   : > { %3214 = vmatpush.msrb.mxu0 %v3101_v13  ;;  %3237 = vmatpush.msrb.mxu1 %v3127_v44  ;;  %v2475_v13 = vld [vmem:[#allocation14] sm:$0x3] }
 0x400   : > { %3198 = vmatmul.f32.vlgmr.msra.gmra.mxu3 %v3159_v14  ;;  %3238 = vmatmul.f32.vlgmr.msrb.gmra.mxu1 %v3159_v14 }
 0x401   : > { %3175 = vmatpush.msra.mxu2 %v3098_v15  ;;  %3215 = vmatpush.msrb.mxu0 %v3099_v34 }
 0x402   : > { %3306 = vmatpush.msrb.mxu3 %v3279_v9 }
 0x403   : > { %3176 = vmatpush.msra.mxu2 %v3096_v52  ;;  %3216 = vmatpush.msrb.mxu0 %v3097_v53 }
 0x404   : > { %3307 = vmatpush.msrb.mxu3 %v3278_v20 }
 0x405   : > { %3177 = vmatpush.msra.mxu2 %v3094_v16  ;;  %3217 = vmatpush.msrb.mxu0 %v3095_v17 }
 0x406   : > { %3178 = vmatmul.f32.vlgmr.msra.gmra.mxu2 %v3158_v18  ;;  %3218 = vmatmul.f32.vlgmr.msrb.gmra.mxu0 %v3158_v18 }
 0x407   : > { %3286 = vmatpush.msrb.mxu2 %v3263_v8  ;;  %3308 = vmatpush.msrb.mxu3 %v3277_v23 }
 0x409   : > { %3287 = vmatpush.msrb.mxu2 %v3262_v19  ;;  %3309 = vmatpush.msrb.mxu3 %v3276_v63 }
 0x40b   : > { %3288 = vmatpush.msrb.mxu2 %v3261_v22  ;;  %3310 = vmatpush.msrb.mxu3 %v3275_v50 }
 0x40d   : > { %3289 = vmatpush.msrb.mxu2 %v3260_v24  ;;  %3311 = vmatpush.msrb.mxu3 %v3274_v27 }
 0x40f   : > { %3290 = vmatpush.msrb.mxu2 %v3259_v25  ;;  %3312 = vmatpush.msrb.mxu3 %v3273_v29 }
 0x411   : > { %3291 = vmatpush.msrb.mxu2 %v3258_v26  ;;  %3313 = vmatpush.msrb.mxu3 %v3272_v37 }
 0x413   : > { %3292 = vmatpush.msrb.mxu2 %v3257_v28  ;;  %3314 = vmatpush.msrb.mxu3 %v3271_v33 }
 0x415   : > { %3293 = vmatpush.msrb.mxu2 %v3256_v30  ;;  %3315 = vmatpush.msrb.mxu3 %v3270_v55 }
 0x416   : > { %v2617_v54 = vpop.f32.mrf.mxu1 }
 0x417   : > { %3294 = vmatpush.msrb.mxu2 %v3255_v38  ;;  %3316 = vmatpush.msrb.mxu3 %v3269_v43  ;;  %v3280_v38 = vld [vmem:[#allocation17] sm:$0x1] }
 0x419   : > { %3295 = vmatpush.msrb.mxu2 %v3254_v41  ;;  %3317 = vmatpush.msrb.mxu3 %v3268_v45 }
 0x41b   : > { %3296 = vmatpush.msrb.mxu2 %v3253_v42  ;;  %3318 = vmatpush.msrb.mxu3 %v3267_v51 }
 0x41c   : > { %v2597_v11 = vpop.f32.mrf.mxu0  ;;  %v2577_v6 = vpop.f32.mrf.mxu3 }
 0x41d   : > { %3297 = vmatpush.msrb.mxu2 %v3252_v5  ;;  %3319 = vmatpush.msrb.mxu3 %v3266_v40  ;;  %v2618_v3 = vadd.f32 %v2617_v54, %v2597_v11 }
 0x41f   : > { %3298 = vmatpush.msrb.mxu2 %v3251_v47  ;;  %v2774_v59 = vpop.f32.mrf.mxu1  ;;  %3320 = vmatpush.msrb.mxu3 %v3265_v31  ;;  %v2622_v1 = vrot.slane %v2618_v3, 7 }
 0x421   : > { %3299 = vmatpush.msrb.mxu2 %v3250_v36  ;;  %3321 = vmatpush.msrb.mxu3 %v3264_v60 }
 0x422   : > { %v2557_v46 = vpop.f32.mrf.mxu2 }
 0x423   : > { %3300 = vmatpush.msrb.mxu2 %v3249_v57  ;;  %v2578_v62 = vadd.f32 %v2577_v6, %v2557_v46 }
 0x425   : > { %3301 = vmatpush.msrb.mxu2 %v3248_v48  ;;  %v2734_v61 = vpop.f32.mrf.mxu3  ;;  %v2623_v44 = vsel %vm2428_vm5, %v2578_v62, %v2622_v1 }
 0x426   : > { %v2754_v35 = vpop.f32.mrf.mxu0  ;;  %v2625_v18 = vadd.f32 %v2623_v44, %v2475_v13 }
 0x427   : > { %v2775_v58 = vadd.f32 %v2774_v59, %v2754_v35 }
 0x429   : > { %v2779_v14 = vrot.slane %v2775_v58, 7 }
 0x42c   : > { %v2714_v21 = vpop.f32.mrf.mxu2 }
 0x42d   : > { %v2735_v39 = vadd.f32 %v2734_v61, %v2714_v21 }
 0x42f   : > { %v2780_v53 = vsel %vm2428_vm5, %v2735_v39, %v2779_v14 }
 0x430   : > { %v2782_v22 = vadd.f32 %v2780_v53, %v2625_v18 }
 0x439   : > { %v2929_v49 = vpop.f32.mrf.mxu1 }
 0x43f   : > { %v2889_v0 = vpop.f32.mrf.mxu3 }
 0x440   : > { %v2909_v32 = vpop.f32.mrf.mxu0 }
 0x441   : > { %v2930_v7 = vadd.f32 %v2929_v49, %v2909_v32 }
 0x443   : > { %v2934_v16 = vrot.slane %v2930_v7, 7 }
 0x446   : > { %v2869_v56 = vpop.f32.mrf.mxu2 }
 0x447   : > { %v2890_v15 = vadd.f32 %v2889_v0, %v2869_v56 }
 0x449   : > { %v2935_v9 = vsel %vm2428_vm5, %v2890_v15, %v2934_v16 }
 0x44a   : > { %v2937_v24 = vadd.f32 %v2935_v9, %v2782_v22 }
 0x45b   : > { %v3084_v4 = vpop.f32.mrf.mxu1 }
 0x461   : > { %v3044_v10 = vpop.f32.mrf.mxu3 }
 0x462   : > { %v3064_v2 = vpop.f32.mrf.mxu0 }
 0x463   : > { %v3085_v34 = vadd.f32 %v3084_v4, %v3064_v2 }
 0x465   : > { %v3089_v19 = vrot.slane %v3085_v34, 7 }
 0x468   : > { %v3024_v12 = vpop.f32.mrf.mxu2 }
 0x469   : > { %v3045_v17 = vadd.f32 %v3044_v10, %v3024_v12 }
 0x46b   : > { %v3090_v23 = vsel %vm2428_vm5, %v3045_v17, %v3089_v19 }
 0x46c   : > { %v3092_v27 = vadd.f32 %v3090_v23, %v2937_v24 }
 0x47d   : > { %v3239_v8 = vpop.f32.mrf.mxu1 }
 0x483   : > { %v3219_v52 = vpop.f32.mrf.mxu0  ;;  %v3199_v63 = vpop.f32.mrf.mxu3 }
 0x484   : > { %v3240_v20 = vadd.f32 %v3239_v8, %v3219_v52 }
 0x486   : > { %v3244_v50 = vrot.slane %v3240_v20, 7 }
 0x489   : > { %v3179_v25 = vpop.f32.mrf.mxu2 }
 0x48a   : > { %v3200_v26 = vadd.f32 %v3199_v63, %v3179_v25 }
 0x48c   : > { %v3245_v28 = vsel %vm2428_vm5, %v3200_v26, %v3244_v50 }
 0x48d   : > { %v3247_v29 = vadd.f32 %v3245_v28, %v3092_v27 }
 0x48f   : > { %v3282_v30 = vperm.slane %v3247_v29, 0  ;;  %v3283_v37 = vperm.slane %v3247_v29, 1 }
 0x491   : > { %3302 = vmatmul.f32.vlgmr.msrb.gmra.mxu2 %v3282_v30  ;;  %3322 = vmatmul.f32.vlgmr.msrb.gmra.mxu3 %v3283_v37 }
 0x514   : > { %v3303_v33 = vpop.f32.mrf.mxu2  ;;  %v3323_v54 = vpop.f32.mrf.mxu3 }
 0x515   : > { %v3304_v11 = vadd.f32 %v3303_v33, %v3280_v38 }
 0x517   : > { %v3324_v41 = vadd.f32 %v3323_v54, %v3304_v11 }
 0x519   : > { %3326 = vst [vmem:[%s534_s13] sm:$0x1] %v3324_v41 }
 0x51a   : > { %4093 = shalt.err (!%p4090_p8)
}
 0x51b   : > { %3660 = dma.vmem_to_hbm [thread:$0]  (%p4268_p5), %s3339_s4, 16, %s3341_s15, %s3328_s1  }
 0x51c PF: > { %p3717_p9 = scmp.ge.s32.totalorder %s4152_s20, 2  ;;  %s3352_s2 = sand.u32 1, %s4140_s17  }
 0x51d   : > { %s3353_s30 = scalar_lea.sflag [#allocation4], %s3352_s2 }
 0x51e   : > { %p3694_p10 = pnand %p3717_p9, %p4272_p6 }
 0x520   : > { %p3695_p11 = pneg %p3694_p10 }
 0x522   : > { %4135 = dma.done.wait (%p3695_p11), %s3353_s30, 16  }
 0x523   : > { %4137 = vsyncadd (%p3695_p11), %s3353_s30, 4294967280  ;;  %s4775_s20 = sld [smem:[#allocation28_spill]]  ;;  %s4778_s17 = smov %s4144_s18 }
 0x524   : > { %s4776_s6 = sld [smem:[#allocation27_spill]] }
 0x525   : > { %s4777_s19 = sld [smem:[#allocation29_spill]] }
 0x529   : > { %p27_p12 = scmp.ge.s32.totalorder %s4775_s20, 4  }
 0x52a   : > { %s4779_s18 = smov %s4776_s6 }
 0x52b   :  { %29 = sbr.rel (!%p27_p12) target bundleno = 14 (0xe), region = 150 }
 0x530   :  { %3358 = vsyncpa [#allocation3], 1 }
 0x531   :  { %3360 = vsyncpa [#allocation3 + $0x1], 1 }
 0x532   :  { %3361 = vsyncpa [#allocation6], 1 }
 0x533   :  { %3362 = vsyncpa [#allocation9], 1 }
 0x534   :  { %3363 = vsyncpa [#allocation12], 1 }
 0x535   :  { %3364 = vsyncpa [#allocation15], 1 }
 0x536   :  { %3365 = vsyncpa [#allocation18], 1 }
 0x537   :  { %3366 = vsyncpa [#allocation4], 1 }
 0x538   :  { %3368 = vsyncpa [#allocation4 + $0x1], 1 }

</bundles_post_ra>
